<compile_context>
chip_gen: v5e
topology: v5e:2x2
jax: 0.10.0
libtpu: 0.0.40
codegen_flags: <defaults>
</compile_context>

<pallas_src>
import functools

import jax
import jax.numpy as jnp
from jax.experimental import pallas as pl
from jax.experimental.pallas import tpu as pltpu

BN_EPS = 1e-5
C = 32  # channel width of the conv trunk


# ----------------------------------------------------------------------------
# The fused Pallas kernel (single invocation, no grid; all operands in VMEM)
# ----------------------------------------------------------------------------
def _phdnet_kernel(p1_ref, w1_ref, b1_ref, wc_ref, bc_ref,
                   wb1_ref, bb1_ref, wb2_ref, bb2_ref, wh_ref, bh_ref,
                   out_ref, pad2_ref, pad3_ref, pad46_ref, *, N, H, W):
    """Fused PHDNet forward.

    p1_ref : (N*H*W, 9)    bf16  layer-1 im2col patches (Cin = 1)
    w1_ref : (9, 32)       bf16  layer-1 weight (BN folded)
    b1_ref : (1, 32)       f32   layer-1 bias (BN folded)
    wc_ref : (5, 288, 32)  bf16  layers 2..6 weights (BN folded)
    bc_ref : (5, 1, 32)    f32   layers 2..6 biases (BN folded)
    wb1_ref: (32, 128)     bf16  [reg1 | class1] 1x1 weights
    wb2_ref: (128, 192)    bf16  block-diag [reg2, class2]
    wh_ref : (192, 128)    bf16  heads, zero-padded to 128 lanes
    out_ref: (N*(H//8)*(W//8), 128) f32  col0 = class, cols1:3 = reg
    pad*_ref: VMEM scratch used for SAME zero-padding of layers 2..6
    """

    def maxpool2x2(a, n, h, w):
        # (n, h, w, C) -> (n, h//2, w//2, C) with plain slices + elementwise max.
        a = a.reshape(n, h // 2, 2, w // 2, 2, C)
        a = jnp.maximum(a[:, :, 0], a[:, :, 1])               # pool along H
        a = jnp.maximum(a[:, :, :, 0, :], a[:, :, :, 1, :])   # pool along W
        return a

    def conv3x3_bn_relu(a, pad_ref, wmat, bias, n, h, w_):
        # SAME zero padding via a zeroed VMEM scratch, then one im2col matmul
        # of shape (n*h*w_, 9C) x (9C, C) on the MXU.
        pad_ref[...] = jnp.zeros(pad_ref.shape, pad_ref.dtype)
        pad_ref[:, 1:h + 1, 1:w_ + 1, :] = a
        xp = pad_ref[...]
        taps = [xp[:, dy:dy + h, dx:dx + w_, :]
                for dy in range(3) for dx in range(3)]
        patches = jnp.concatenate(taps, axis=-1)              # (n, h, w_, 9C)
        patches = patches.reshape(n * h * w_, 9 * C).astype(jnp.bfloat16)
        y = jnp.dot(patches, wmat, preferred_element_type=jnp.float32) + bias
        y = jnp.maximum(y, 0.0)
        return y.reshape(n, h, w_, C)

    # ---- layer 1 (Cin=1, im2col built in the wrapper) + pool -------------
    h1 = jnp.dot(p1_ref[...], w1_ref[...],
                 preferred_element_type=jnp.float32) + b1_ref[...]
    h1 = jnp.maximum(h1, 0.0)                                 # (N*H*W, 32)
    a = maxpool2x2(h1.reshape(N, H, W, C), N, H, W)           # (N, H/2, W/2, 32)

    # ---- layer 2 + pool ---------------------------------------------------
    h2, w2 = H // 2, W // 2
    a = conv3x3_bn_relu(a, pad2_ref, wc_ref[0], bc_ref[0], N, h2, w2)
    a = maxpool2x2(a, N, h2, w2)

    # ---- layer 3 + pool ---------------------------------------------------
    h3, w3 = H // 4, W // 4
    a = conv3x3_bn_relu(a, pad3_ref, wc_ref[1], bc_ref[1], N, h3, w3)
    a = maxpool2x2(a, N, h3, w3)

    # ---- layers 4-6 (no pool) --------------------------------------------
    h4, w4 = H // 8, W // 8
    a = conv3x3_bn_relu(a, pad46_ref, wc_ref[2], bc_ref[2], N, h4, w4)
    a = conv3x3_bn_relu(a, pad46_ref, wc_ref[3], bc_ref[3], N, h4, w4)
    a = conv3x3_bn_relu(a, pad46_ref, wc_ref[4], bc_ref[4], N, h4, w4)

    # ---- fused reg/class 1x1 branch stacks + heads ------------------------
    feat = a.reshape(N * h4 * w4, C).astype(jnp.bfloat16)     # (M2, 32)
    t = jnp.dot(feat, wb1_ref[...],
                preferred_element_type=jnp.float32) + bb1_ref[...]
    t = jnp.maximum(t, 0.0).astype(jnp.bfloat16)              # (M2, 128)
    t = jnp.dot(t, wb2_ref[...],
                preferred_element_type=jnp.float32) + bb2_ref[...]
    t = jnp.maximum(t, 0.0).astype(jnp.bfloat16)              # (M2, 192)
    out = jnp.dot(t, wh_ref[...],
                  preferred_element_type=jnp.float32) + bh_ref[...]
    out_ref[...] = out                                        # (M2, 128) lane-dense


# ----------------------------------------------------------------------------
# Parameter construction (mirrors the PyTorch module at default init)
# ----------------------------------------------------------------------------
def _conv_init(key, cin, cout, ksize):
    kw, kb = jax.random.split(key)
    fan_in = cin * ksize * ksize
    bound = fan_in ** -0.5
    w = jax.random.uniform(kw, (ksize * ksize, cin, cout), jnp.float32,
                           -bound, bound)
    b = jax.random.uniform(kb, (cout,), jnp.float32, -bound, bound)
    return w, b


def _bn_init(c):
    return dict(gamma=jnp.ones((c,), jnp.float32),
                beta=jnp.zeros((c,), jnp.float32),
                mean=jnp.zeros((c,), jnp.float32),
                var=jnp.ones((c,), jnp.float32))


def init_phdnet_params(key):
    keys = jax.random.split(key, 12)
    p = {}
    cins = [1, 32, 32, 32, 32, 32]
    for i, cin in enumerate(cins):                     # layers 1..6: conv3x3 + BN
        w, b = _conv_init(keys[i], cin, 32, 3)         # w: (9, cin, 32)
        p[f'conv{i + 1}'] = (w, b)
        p[f'bn{i + 1}'] = _bn_init(32)
    for j, name in enumerate(['reg', 'class']):        # 1x1 branch stacks
        w1, b1 = _conv_init(keys[6 + 2 * j], 32, 64, 1)
        w2, b2 = _conv_init(keys[7 + 2 * j], 64, 96, 1)
        p[f'{name}1'] = (w1.reshape(32, 64), b1)
        p[f'{name}1_bn'] = _bn_init(64)
        p[f'{name}2'] = (w2.reshape(64, 96), b2)
        p[f'{name}2_bn'] = _bn_init(96)
    wr, br = _conv_init(keys[10], 96, 2, 1)            # outReg (no BN)
    p['outReg'] = (wr.reshape(96, 2), br)
    wc, bc = _conv_init(keys[11], 96, 1, 1)            # outClass (no BN)
    p['outClass'] = (wc.reshape(96, 1), bc)
    return p


def _fold_bn(w, b, gamma, beta, mean, var):
    """Fold an eval-mode BatchNorm into the preceding conv (w: (K, Cout))."""
    scale = gamma / jnp.sqrt(var + BN_EPS)
    return w * scale[None, :], (b - mean) * scale + beta


def pack_params(p):
    """Fold BN, fuse branch weights, cast matmul operands to bf16."""
    bf16 = lambda a: a.astype(jnp.bfloat16)

    # layer 1 (Cin = 1): (9,1,32) -> (9,32)
    w1, b1 = p['conv1']
    w1, b1 = _fold_bn(w1.reshape(9, 32), b1, **p['bn1'])

    # layers 2..6: (9,32,32) -> (288,32), stacked into one operand
    wcs, bcs = [], []
    for i in range(2, 7):
        w, b = p[f'conv{i}']
        w, b = _fold_bn(w.reshape(9 * C, C), b, **p[f'bn{i}'])
        wcs.append(w)
        bcs.append(b)
    wconv = jnp.stack(wcs, axis=0)                     # (5, 288, 32)
    bconv = jnp.stack(bcs, axis=0)[:, None, :]         # (5, 1, 32)

    # branch stage 1: reg|class side by side -> one (32, 128) matmul
    wr1, br1 = _fold_bn(*p['reg1'], **p['reg1_bn'])
    wc1, bc1 = _fold_bn(*p['class1'], **p['class1_bn'])
    wb1 = jnp.concatenate([wr1, wc1], axis=1)          # (32, 128)
    bb1 = jnp.concatenate([br1, bc1])[None, :]         # (1, 128)

    # branch stage 2: block-diagonal -> one (128, 192) matmul
    wr2, br2 = _fold_bn(*p['reg2'], **p['reg2_bn'])
    wc2, bc2 = _fold_bn(*p['class2'], **p['class2_bn'])
    wb2 = jnp.zeros((128, 192), jnp.float32)
    wb2 = wb2.at[:64, :96].set(wr2).at[64:, 96:].set(wc2)
    bb2 = jnp.concatenate([br2, bc2])[None, :]         # (1, 192)

    # heads, zero-padded to 128 lanes: col 0 = class, cols 1:3 = reg
    whr, bhr = p['outReg']                             # (96, 2), (2,)
    whc, bhc = p['outClass']                           # (96, 1), (1,)
    wh = jnp.zeros((192, 128), jnp.float32)
    wh = wh.at[96:, 0:1].set(whc).at[:96, 1:3].set(whr)
    bh = jnp.zeros((128,), jnp.float32).at[0].set(bhc[0]).at[1:3].set(bhr)[None, :]

    return (bf16(w1), b1[None, :], bf16(wconv), bconv,
            bf16(wb1), bb1, bf16(wb2), bb2, bf16(wh), bh)


# ----------------------------------------------------------------------------
# Forward pass (NCHW in / NCHW out, matching the PyTorch module)
# ----------------------------------------------------------------------------
def phdnet_forward(x_nchw, params, branch_scheme='multi'):
    N, Cin, H, W = x_nchw.shape
    assert Cin == 1 and H % 8 == 0 and W % 8 == 0
    packed = pack_params(params)

    # Layer-1 im2col (Cin=1) built once in the wrapper: (N*H*W, 9) patches.
    x = x_nchw[:, 0].astype(jnp.float32)               # (N, H, W)
    xp = jnp.pad(x, ((0, 0), (1, 1), (1, 1)))
    patches1 = jnp.stack([xp[:, dy:dy + H, dx:dx + W]
                          for dy in range(3) for dx in range(3)], axis=-1)
    patches1 = patches1.reshape(N * H * W, 9).astype(jnp.bfloat16)

    hf, wf = H // 8, W // 8
    out = pl.pallas_call(
        functools.partial(_phdnet_kernel, N=N, H=H, W=W),
        out_shape=jax.ShapeDtypeStruct((N * hf * wf, 128), jnp.float32),
        scratch_shapes=[
            pltpu.VMEM((N, H // 2 + 2, W // 2 + 2, C), jnp.float32),  # layer 2 pad
            pltpu.VMEM((N, H // 4 + 2, W // 4 + 2, C), jnp.float32),  # layer 3 pad
            pltpu.VMEM((N, hf + 2, wf + 2, C), jnp.float32),          # layers 4-6 pad
        ],
    )(patches1, *packed)

    out = out.reshape(N, hf, wf, 128)
    out_class = jnp.transpose(out[..., 0:1], (0, 3, 1, 2))            # (N,1,hf,wf)
    out_reg = jnp.transpose(out[..., 1:3], (0, 3, 1, 2))[:, None]     # (N,1,2,hf,wf)

    # NOTE: in the PyTorch code `== 'multi' or 'displacement'` is always truthy,
    # so BOTH branches are always computed; replicated here.
    if branch_scheme == 'multi':
        return [out_class, out_reg]
    elif branch_scheme == 'heatmap':
        return out_class
    else:
        return out_reg


if __name__ == "__main__":
    key = jax.random.PRNGKey(0)
    kx, kp = jax.random.split(key)
    # PHDNet takes a single-channel image (Conv2d(1, 32, ...)).
    x = jax.random.normal(kx, (2, 1, 16, 16), jnp.float32)    # NCHW
    params = init_phdnet_params(kp)

    fwd = jax.jit(functools.partial(phdnet_forward, branch_scheme='multi'))
    out_class, out_reg = fwd(x, params)
    jax.block_until_ready(out_class)
    jax.block_until_ready(out_reg)

    # 16 -> 8 -> 4 -> 2 after three 2x2 max pools.
    assert out_class.shape == (2, 1, 2, 2), out_class.shape
    assert out_reg.shape == (2, 1, 2, 2, 2), out_reg.shape
    assert out_class.dtype == jnp.float32 and out_reg.dtype == jnp.float32
    print("KERNEL_OK")
</pallas_src>

<mosaic_0001>
module attributes {stable_mosaic.version = 11 : i64} {
  func.func @_phdnet_kernel(%arg0: memref<512x9xbf16, #tpu.memory_space<vmem>>, %arg1: memref<9x32xbf16, #tpu.memory_space<vmem>>, %arg2: memref<1x32xf32, #tpu.memory_space<vmem>>, %arg3: memref<5x288x32xbf16, #tpu.memory_space<vmem>>, %arg4: memref<5x1x32xf32, #tpu.memory_space<vmem>>, %arg5: memref<32x128xbf16, #tpu.memory_space<vmem>>, %arg6: memref<1x128xf32, #tpu.memory_space<vmem>>, %arg7: memref<128x192xbf16, #tpu.memory_space<vmem>>, %arg8: memref<1x192xf32, #tpu.memory_space<vmem>>, %arg9: memref<192x128xbf16, #tpu.memory_space<vmem>>, %arg10: memref<1x128xf32, #tpu.memory_space<vmem>>, %arg11: memref<8x128xf32, #tpu.memory_space<vmem>>, %arg12: memref<2x10x10x32xf32, #tpu.memory_space<vmem>>, %arg13: memref<2x6x6x32xf32, #tpu.memory_space<vmem>>, %arg14: memref<2x4x4x32xf32, #tpu.memory_space<vmem>>) attributes {dimension_semantics = [], scalar_prefetch = 0 : i64, scratch_operands = 3 : i64, tpu.core_type = #tpu.core_type<tc>} {
    %c0 = arith.constant 0 : index
    %c0_0 = arith.constant 0 : index
    %0 = vector.load %arg0[%c0, %c0_0] : memref<512x9xbf16, #tpu.memory_space<vmem>>, vector<512x9xbf16>
    %c0_1 = arith.constant 0 : index
    %c0_2 = arith.constant 0 : index
    %1 = vector.load %arg1[%c0_1, %c0_2] : memref<9x32xbf16, #tpu.memory_space<vmem>>, vector<9x32xbf16>
    %cst = arith.constant dense<0.000000e+00> : vector<512x32xf32>
    %2 = tpu.matmul %0, %1, %cst {dimension_numbers = #tpu.dot_dimension_numbers<[1], [0], [0], [1], [0, 0, 1, 1], [], []>} : vector<512x9xbf16>, vector<9x32xbf16>, vector<512x32xf32> -> vector<512x32xf32>
    %c0_3 = arith.constant 0 : index
    %c0_4 = arith.constant 0 : index
    %3 = vector.load %arg2[%c0_3, %c0_4] : memref<1x32xf32, #tpu.memory_space<vmem>>, vector<1x32xf32>
    %4 = vector.broadcast %3 : vector<1x32xf32> to vector<512x32xf32>
    %5 = arith.addf %2, %4 : vector<512x32xf32>
    %cst_5 = arith.constant 0.000000e+00 : f32
    %6 = vector.broadcast %cst_5 : f32 to vector<512x32xf32>
    %7 = arith.maximumf %5, %6 : vector<512x32xf32>
    %8 = vector.shape_cast %7 : vector<512x32xf32> to vector<2x16x16x32xf32>
    %9 = vector.shape_cast %8 : vector<2x16x16x32xf32> to vector<2x8x2x8x2x32xf32>
    %10 = vector.extract_strided_slice %9 {offsets = [0, 0, 0, 0, 0, 0], sizes = [2, 8, 1, 8, 2, 32], strides = [1, 1, 1, 1, 1, 1]} : vector<2x8x2x8x2x32xf32> to vector<2x8x1x8x2x32xf32>
    %11 = vector.shape_cast %10 : vector<2x8x1x8x2x32xf32> to vector<2x8x8x2x32xf32>
    %12 = vector.extract_strided_slice %9 {offsets = [0, 0, 1, 0, 0, 0], sizes = [2, 8, 1, 8, 2, 32], strides = [1, 1, 1, 1, 1, 1]} : vector<2x8x2x8x2x32xf32> to vector<2x8x1x8x2x32xf32>
    %13 = vector.shape_cast %12 : vector<2x8x1x8x2x32xf32> to vector<2x8x8x2x32xf32>
    %14 = arith.maximumf %11, %13 : vector<2x8x8x2x32xf32>
    %15 = vector.extract_strided_slice %14 {offsets = [0, 0, 0, 0, 0], sizes = [2, 8, 8, 1, 32], strides = [1, 1, 1, 1, 1]} : vector<2x8x8x2x32xf32> to vector<2x8x8x1x32xf32>
    %16 = vector.shape_cast %15 : vector<2x8x8x1x32xf32> to vector<2x8x8x32xf32>
    %17 = vector.extract_strided_slice %14 {offsets = [0, 0, 0, 1, 0], sizes = [2, 8, 8, 1, 32], strides = [1, 1, 1, 1, 1]} : vector<2x8x8x2x32xf32> to vector<2x8x8x1x32xf32>
    %18 = vector.shape_cast %17 : vector<2x8x8x1x32xf32> to vector<2x8x8x32xf32>
    %19 = arith.maximumf %16, %18 : vector<2x8x8x32xf32>
    %c0_6 = arith.constant 0 : index
    %c0_7 = arith.constant 0 : index
    %c0_8 = arith.constant 0 : index
    %20 = vector.load %arg3[%c0_6, %c0_7, %c0_8] : memref<5x288x32xbf16, #tpu.memory_space<vmem>>, vector<1x288x32xbf16>
    %21 = vector.shape_cast %20 : vector<1x288x32xbf16> to vector<288x32xbf16>
    %c0_9 = arith.constant 0 : index
    %c0_10 = arith.constant 0 : index
    %c0_11 = arith.constant 0 : index
    %22 = vector.load %arg4[%c0_9, %c0_10, %c0_11] : memref<5x1x32xf32, #tpu.memory_space<vmem>>, vector<1x1x32xf32>
    %23 = vector.shape_cast %22 : vector<1x1x32xf32> to vector<1x32xf32>
    %cst_12 = arith.constant 0.000000e+00 : f32
    %24 = vector.broadcast %cst_12 : f32 to vector<2x10x10x32xf32>
    %c0_13 = arith.constant 0 : index
    %c0_14 = arith.constant 0 : index
    %c0_15 = arith.constant 0 : index
    %c0_16 = arith.constant 0 : index
    %25 = vector.load %arg12[%c0_13, %c0_14, %c0_15, %c0_16] : memref<2x10x10x32xf32, #tpu.memory_space<vmem>>, vector<2x10x10x32xf32>
    tpu.vector_store %arg12[%c0_13, %c0_14, %c0_15, %c0_16], %24 {strides = array<i32>} : memref<2x10x10x32xf32, #tpu.memory_space<vmem>>, vector<2x10x10x32xf32>,
    %c0_17 = arith.constant 0 : index
    %c1 = arith.constant 1 : index
    %c1_18 = arith.constant 1 : index
    %c0_19 = arith.constant 0 : index
    %26 = vector.load %arg12[%c0_17, %c1, %c1_18, %c0_19] : memref<2x10x10x32xf32, #tpu.memory_space<vmem>>, vector<2x8x8x32xf32>
    tpu.vector_store %arg12[%c0_17, %c1, %c1_18, %c0_19], %19 {strides = array<i32>} : memref<2x10x10x32xf32, #tpu.memory_space<vmem>>, vector<2x8x8x32xf32>,
    %c0_20 = arith.constant 0 : index
    %c0_21 = arith.constant 0 : index
    %c0_22 = arith.constant 0 : index
    %c0_23 = arith.constant 0 : index
    %27 = vector.load %arg12[%c0_20, %c0_21, %c0_22, %c0_23] : memref<2x10x10x32xf32, #tpu.memory_space<vmem>>, vector<2x10x10x32xf32>
    %28 = vector.extract_strided_slice %27 {offsets = [0, 0, 0, 0], sizes = [2, 8, 8, 32], strides = [1, 1, 1, 1]} : vector<2x10x10x32xf32> to vector<2x8x8x32xf32>
    %29 = vector.extract_strided_slice %27 {offsets = [0, 0, 1, 0], sizes = [2, 8, 8, 32], strides = [1, 1, 1, 1]} : vector<2x10x10x32xf32> to vector<2x8x8x32xf32>
    %30 = vector.extract_strided_slice %27 {offsets = [0, 0, 2, 0], sizes = [2, 8, 8, 32], strides = [1, 1, 1, 1]} : vector<2x10x10x32xf32> to vector<2x8x8x32xf32>
    %31 = vector.extract_strided_slice %27 {offsets = [0, 1, 0, 0], sizes = [2, 8, 8, 32], strides = [1, 1, 1, 1]} : vector<2x10x10x32xf32> to vector<2x8x8x32xf32>
    %32 = vector.extract_strided_slice %27 {offsets = [0, 1, 1, 0], sizes = [2, 8, 8, 32], strides = [1, 1, 1, 1]} : vector<2x10x10x32xf32> to vector<2x8x8x32xf32>
    %33 = vector.extract_strided_slice %27 {offsets = [0, 1, 2, 0], sizes = [2, 8, 8, 32], strides = [1, 1, 1, 1]} : vector<2x10x10x32xf32> to vector<2x8x8x32xf32>
    %34 = vector.extract_strided_slice %27 {offsets = [0, 2, 0, 0], sizes = [2, 8, 8, 32], strides = [1, 1, 1, 1]} : vector<2x10x10x32xf32> to vector<2x8x8x32xf32>
    %35 = vector.extract_strided_slice %27 {offsets = [0, 2, 1, 0], sizes = [2, 8, 8, 32], strides = [1, 1, 1, 1]} : vector<2x10x10x32xf32> to vector<2x8x8x32xf32>
    %36 = vector.extract_strided_slice %27 {offsets = [0, 2, 2, 0], sizes = [2, 8, 8, 32], strides = [1, 1, 1, 1]} : vector<2x10x10x32xf32> to vector<2x8x8x32xf32>
    %37 = tpu.concatenate %28, %29, %30, %31, %32, %33, %34, %35, %36 in 3 : vector<2x8x8x32xf32>, vector<2x8x8x32xf32>, vector<2x8x8x32xf32>, vector<2x8x8x32xf32>, vector<2x8x8x32xf32>, vector<2x8x8x32xf32>, vector<2x8x8x32xf32>, vector<2x8x8x32xf32>, vector<2x8x8x32xf32> -> vector<2x8x8x288xf32>
    %38 = vector.shape_cast %37 : vector<2x8x8x288xf32> to vector<128x288xf32>
    %39 = arith.truncf %38 : vector<128x288xf32> to vector<128x288xbf16>
    %cst_24 = arith.constant dense<0.000000e+00> : vector<128x32xf32>
    %40 = tpu.matmul %39, %21, %cst_24 {dimension_numbers = #tpu.dot_dimension_numbers<[1], [0], [0], [1], [0, 0, 1, 1], [], []>} : vector<128x288xbf16>, vector<288x32xbf16>, vector<128x32xf32> -> vector<128x32xf32>
    %41 = vector.broadcast %23 : vector<1x32xf32> to vector<128x32xf32>
    %42 = arith.addf %40, %41 : vector<128x32xf32>
    %cst_25 = arith.constant 0.000000e+00 : f32
    %43 = vector.broadcast %cst_25 : f32 to vector<128x32xf32>
    %44 = arith.maximumf %42, %43 : vector<128x32xf32>
    %45 = vector.shape_cast %44 : vector<128x32xf32> to vector<2x8x8x32xf32>
    %46 = vector.shape_cast %45 : vector<2x8x8x32xf32> to vector<2x4x2x4x2x32xf32>
    %47 = vector.extract_strided_slice %46 {offsets = [0, 0, 0, 0, 0, 0], sizes = [2, 4, 1, 4, 2, 32], strides = [1, 1, 1, 1, 1, 1]} : vector<2x4x2x4x2x32xf32> to vector<2x4x1x4x2x32xf32>
    %48 = vector.shape_cast %47 : vector<2x4x1x4x2x32xf32> to vector<2x4x4x2x32xf32>
    %49 = vector.extract_strided_slice %46 {offsets = [0, 0, 1, 0, 0, 0], sizes = [2, 4, 1, 4, 2, 32], strides = [1, 1, 1, 1, 1, 1]} : vector<2x4x2x4x2x32xf32> to vector<2x4x1x4x2x32xf32>
    %50 = vector.shape_cast %49 : vector<2x4x1x4x2x32xf32> to vector<2x4x4x2x32xf32>
    %51 = arith.maximumf %48, %50 : vector<2x4x4x2x32xf32>
    %52 = vector.extract_strided_slice %51 {offsets = [0, 0, 0, 0, 0], sizes = [2, 4, 4, 1, 32], strides = [1, 1, 1, 1, 1]} : vector<2x4x4x2x32xf32> to vector<2x4x4x1x32xf32>
    %53 = vector.shape_cast %52 : vector<2x4x4x1x32xf32> to vector<2x4x4x32xf32>
    %54 = vector.extract_strided_slice %51 {offsets = [0, 0, 0, 1, 0], sizes = [2, 4, 4, 1, 32], strides = [1, 1, 1, 1, 1]} : vector<2x4x4x2x32xf32> to vector<2x4x4x1x32xf32>
    %55 = vector.shape_cast %54 : vector<2x4x4x1x32xf32> to vector<2x4x4x32xf32>
    %56 = arith.maximumf %53, %55 : vector<2x4x4x32xf32>
    %c1_26 = arith.constant 1 : index
    %c0_27 = arith.constant 0 : index
    %c0_28 = arith.constant 0 : index
    %57 = vector.load %arg3[%c1_26, %c0_27, %c0_28] : memref<5x288x32xbf16, #tpu.memory_space<vmem>>, vector<1x288x32xbf16>
    %58 = vector.shape_cast %57 : vector<1x288x32xbf16> to vector<288x32xbf16>
    %c1_29 = arith.constant 1 : index
    %c0_30 = arith.constant 0 : index
    %c0_31 = arith.constant 0 : index
    %59 = vector.load %arg4[%c1_29, %c0_30, %c0_31] : memref<5x1x32xf32, #tpu.memory_space<vmem>>, vector<1x1x32xf32>
    %60 = vector.shape_cast %59 : vector<1x1x32xf32> to vector<1x32xf32>
    %cst_32 = arith.constant 0.000000e+00 : f32
    %61 = vector.broadcast %cst_32 : f32 to vector<2x6x6x32xf32>
    %c0_33 = arith.constant 0 : index
    %c0_34 = arith.constant 0 : index
    %c0_35 = arith.constant 0 : index
    %c0_36 = arith.constant 0 : index
    %62 = vector.load %arg13[%c0_33, %c0_34, %c0_35, %c0_36] : memref<2x6x6x32xf32, #tpu.memory_space<vmem>>, vector<2x6x6x32xf32>
    tpu.vector_store %arg13[%c0_33, %c0_34, %c0_35, %c0_36], %61 {strides = array<i32>} : memref<2x6x6x32xf32, #tpu.memory_space<vmem>>, vector<2x6x6x32xf32>,
    %c0_37 = arith.constant 0 : index
    %c1_38 = arith.constant 1 : index
    %c1_39 = arith.constant 1 : index
    %c0_40 = arith.constant 0 : index
    %63 = vector.load %arg13[%c0_37, %c1_38, %c1_39, %c0_40] : memref<2x6x6x32xf32, #tpu.memory_space<vmem>>, vector<2x4x4x32xf32>
    tpu.vector_store %arg13[%c0_37, %c1_38, %c1_39, %c0_40], %56 {strides = array<i32>} : memref<2x6x6x32xf32, #tpu.memory_space<vmem>>, vector<2x4x4x32xf32>,
    %c0_41 = arith.constant 0 : index
    %c0_42 = arith.constant 0 : index
    %c0_43 = arith.constant 0 : index
    %c0_44 = arith.constant 0 : index
    %64 = vector.load %arg13[%c0_41, %c0_42, %c0_43, %c0_44] : memref<2x6x6x32xf32, #tpu.memory_space<vmem>>, vector<2x6x6x32xf32>
    %65 = vector.extract_strided_slice %64 {offsets = [0, 0, 0, 0], sizes = [2, 4, 4, 32], strides = [1, 1, 1, 1]} : vector<2x6x6x32xf32> to vector<2x4x4x32xf32>
    %66 = vector.extract_strided_slice %64 {offsets = [0, 0, 1, 0], sizes = [2, 4, 4, 32], strides = [1, 1, 1, 1]} : vector<2x6x6x32xf32> to vector<2x4x4x32xf32>
    %67 = vector.extract_strided_slice %64 {offsets = [0, 0, 2, 0], sizes = [2, 4, 4, 32], strides = [1, 1, 1, 1]} : vector<2x6x6x32xf32> to vector<2x4x4x32xf32>
    %68 = vector.extract_strided_slice %64 {offsets = [0, 1, 0, 0], sizes = [2, 4, 4, 32], strides = [1, 1, 1, 1]} : vector<2x6x6x32xf32> to vector<2x4x4x32xf32>
    %69 = vector.extract_strided_slice %64 {offsets = [0, 1, 1, 0], sizes = [2, 4, 4, 32], strides = [1, 1, 1, 1]} : vector<2x6x6x32xf32> to vector<2x4x4x32xf32>
    %70 = vector.extract_strided_slice %64 {offsets = [0, 1, 2, 0], sizes = [2, 4, 4, 32], strides = [1, 1, 1, 1]} : vector<2x6x6x32xf32> to vector<2x4x4x32xf32>
    %71 = vector.extract_strided_slice %64 {offsets = [0, 2, 0, 0], sizes = [2, 4, 4, 32], strides = [1, 1, 1, 1]} : vector<2x6x6x32xf32> to vector<2x4x4x32xf32>
    %72 = vector.extract_strided_slice %64 {offsets = [0, 2, 1, 0], sizes = [2, 4, 4, 32], strides = [1, 1, 1, 1]} : vector<2x6x6x32xf32> to vector<2x4x4x32xf32>
    %73 = vector.extract_strided_slice %64 {offsets = [0, 2, 2, 0], sizes = [2, 4, 4, 32], strides = [1, 1, 1, 1]} : vector<2x6x6x32xf32> to vector<2x4x4x32xf32>
    %74 = tpu.concatenate %65, %66, %67, %68, %69, %70, %71, %72, %73 in 3 : vector<2x4x4x32xf32>, vector<2x4x4x32xf32>, vector<2x4x4x32xf32>, vector<2x4x4x32xf32>, vector<2x4x4x32xf32>, vector<2x4x4x32xf32>, vector<2x4x4x32xf32>, vector<2x4x4x32xf32>, vector<2x4x4x32xf32> -> vector<2x4x4x288xf32>
    %75 = vector.shape_cast %74 : vector<2x4x4x288xf32> to vector<32x288xf32>
    %76 = arith.truncf %75 : vector<32x288xf32> to vector<32x288xbf16>
    %cst_45 = arith.constant dense<0.000000e+00> : vector<32x32xf32>
    %77 = tpu.matmul %76, %58, %cst_45 {dimension_numbers = #tpu.dot_dimension_numbers<[1], [0], [0], [1], [0, 0, 1, 1], [], []>} : vector<32x288xbf16>, vector<288x32xbf16>, vector<32x32xf32> -> vector<32x32xf32>
    %78 = vector.broadcast %60 : vector<1x32xf32> to vector<32x32xf32>
    %79 = arith.addf %77, %78 : vector<32x32xf32>
    %cst_46 = arith.constant 0.000000e+00 : f32
    %80 = vector.broadcast %cst_46 : f32 to vector<32x32xf32>
    %81 = arith.maximumf %79, %80 : vector<32x32xf32>
    %82 = vector.shape_cast %81 : vector<32x32xf32> to vector<2x4x4x32xf32>
    %83 = vector.shape_cast %82 : vector<2x4x4x32xf32> to vector<2x2x2x2x2x32xf32>
    %84 = vector.extract_strided_slice %83 {offsets = [0, 0, 0, 0, 0, 0], sizes = [2, 2, 1, 2, 2, 32], strides = [1, 1, 1, 1, 1, 1]} : vector<2x2x2x2x2x32xf32> to vector<2x2x1x2x2x32xf32>
    %85 = vector.shape_cast %84 : vector<2x2x1x2x2x32xf32> to vector<2x2x2x2x32xf32>
    %86 = vector.extract_strided_slice %83 {offsets = [0, 0, 1, 0, 0, 0], sizes = [2, 2, 1, 2, 2, 32], strides = [1, 1, 1, 1, 1, 1]} : vector<2x2x2x2x2x32xf32> to vector<2x2x1x2x2x32xf32>
    %87 = vector.shape_cast %86 : vector<2x2x1x2x2x32xf32> to vector<2x2x2x2x32xf32>
    %88 = arith.maximumf %85, %87 : vector<2x2x2x2x32xf32>
    %89 = vector.extract_strided_slice %88 {offsets = [0, 0, 0, 0, 0], sizes = [2, 2, 2, 1, 32], strides = [1, 1, 1, 1, 1]} : vector<2x2x2x2x32xf32> to vector<2x2x2x1x32xf32>
    %90 = vector.shape_cast %89 : vector<2x2x2x1x32xf32> to vector<2x2x2x32xf32>
    %91 = vector.extract_strided_slice %88 {offsets = [0, 0, 0, 1, 0], sizes = [2, 2, 2, 1, 32], strides = [1, 1, 1, 1, 1]} : vector<2x2x2x2x32xf32> to vector<2x2x2x1x32xf32>
    %92 = vector.shape_cast %91 : vector<2x2x2x1x32xf32> to vector<2x2x2x32xf32>
    %93 = arith.maximumf %90, %92 : vector<2x2x2x32xf32>
    %c2 = arith.constant 2 : index
    %c0_47 = arith.constant 0 : index
    %c0_48 = arith.constant 0 : index
    %94 = vector.load %arg3[%c2, %c0_47, %c0_48] : memref<5x288x32xbf16, #tpu.memory_space<vmem>>, vector<1x288x32xbf16>
    %95 = vector.shape_cast %94 : vector<1x288x32xbf16> to vector<288x32xbf16>
    %c2_49 = arith.constant 2 : index
    %c0_50 = arith.constant 0 : index
    %c0_51 = arith.constant 0 : index
    %96 = vector.load %arg4[%c2_49, %c0_50, %c0_51] : memref<5x1x32xf32, #tpu.memory_space<vmem>>, vector<1x1x32xf32>
    %97 = vector.shape_cast %96 : vector<1x1x32xf32> to vector<1x32xf32>
    %cst_52 = arith.constant 0.000000e+00 : f32
    %98 = vector.broadcast %cst_52 : f32 to vector<2x4x4x32xf32>
    %c0_53 = arith.constant 0 : index
    %c0_54 = arith.constant 0 : index
    %c0_55 = arith.constant 0 : index
    %c0_56 = arith.constant 0 : index
    %99 = vector.load %arg14[%c0_53, %c0_54, %c0_55, %c0_56] : memref<2x4x4x32xf32, #tpu.memory_space<vmem>>, vector<2x4x4x32xf32>
    tpu.vector_store %arg14[%c0_53, %c0_54, %c0_55, %c0_56], %98 {strides = array<i32>} : memref<2x4x4x32xf32, #tpu.memory_space<vmem>>, vector<2x4x4x32xf32>,
    %c0_57 = arith.constant 0 : index
    %c1_58 = arith.constant 1 : index
    %c1_59 = arith.constant 1 : index
    %c0_60 = arith.constant 0 : index
    %100 = vector.load %arg14[%c0_57, %c1_58, %c1_59, %c0_60] : memref<2x4x4x32xf32, #tpu.memory_space<vmem>>, vector<2x2x2x32xf32>
    tpu.vector_store %arg14[%c0_57, %c1_58, %c1_59, %c0_60], %93 {strides = array<i32>} : memref<2x4x4x32xf32, #tpu.memory_space<vmem>>, vector<2x2x2x32xf32>,
    %c0_61 = arith.constant 0 : index
    %c0_62 = arith.constant 0 : index
    %c0_63 = arith.constant 0 : index
    %c0_64 = arith.constant 0 : index
    %101 = vector.load %arg14[%c0_61, %c0_62, %c0_63, %c0_64] : memref<2x4x4x32xf32, #tpu.memory_space<vmem>>, vector<2x4x4x32xf32>
    %102 = vector.extract_strided_slice %101 {offsets = [0, 0, 0, 0], sizes = [2, 2, 2, 32], strides = [1, 1, 1, 1]} : vector<2x4x4x32xf32> to vector<2x2x2x32xf32>
    %103 = vector.extract_strided_slice %101 {offsets = [0, 0, 1, 0], sizes = [2, 2, 2, 32], strides = [1, 1, 1, 1]} : vector<2x4x4x32xf32> to vector<2x2x2x32xf32>
    %104 = vector.extract_strided_slice %101 {offsets = [0, 0, 2, 0], sizes = [2, 2, 2, 32], strides = [1, 1, 1, 1]} : vector<2x4x4x32xf32> to vector<2x2x2x32xf32>
    %105 = vector.extract_strided_slice %101 {offsets = [0, 1, 0, 0], sizes = [2, 2, 2, 32], strides = [1, 1, 1, 1]} : vector<2x4x4x32xf32> to vector<2x2x2x32xf32>
    %106 = vector.extract_strided_slice %101 {offsets = [0, 1, 1, 0], sizes = [2, 2, 2, 32], strides = [1, 1, 1, 1]} : vector<2x4x4x32xf32> to vector<2x2x2x32xf32>
    %107 = vector.extract_strided_slice %101 {offsets = [0, 1, 2, 0], sizes = [2, 2, 2, 32], strides = [1, 1, 1, 1]} : vector<2x4x4x32xf32> to vector<2x2x2x32xf32>
    %108 = vector.extract_strided_slice %101 {offsets = [0, 2, 0, 0], sizes = [2, 2, 2, 32], strides = [1, 1, 1, 1]} : vector<2x4x4x32xf32> to vector<2x2x2x32xf32>
    %109 = vector.extract_strided_slice %101 {offsets = [0, 2, 1, 0], sizes = [2, 2, 2, 32], strides = [1, 1, 1, 1]} : vector<2x4x4x32xf32> to vector<2x2x2x32xf32>
    %110 = vector.extract_strided_slice %101 {offsets = [0, 2, 2, 0], sizes = [2, 2, 2, 32], strides = [1, 1, 1, 1]} : vector<2x4x4x32xf32> to vector<2x2x2x32xf32>
    %111 = tpu.concatenate %102, %103, %104, %105, %106, %107, %108, %109, %110 in 3 : vector<2x2x2x32xf32>, vector<2x2x2x32xf32>, vector<2x2x2x32xf32>, vector<2x2x2x32xf32>, vector<2x2x2x32xf32>, vector<2x2x2x32xf32>, vector<2x2x2x32xf32>, vector<2x2x2x32xf32>, vector<2x2x2x32xf32> -> vector<2x2x2x288xf32>
    %112 = vector.shape_cast %111 : vector<2x2x2x288xf32> to vector<8x288xf32>
    %113 = arith.truncf %112 : vector<8x288xf32> to vector<8x288xbf16>
    %cst_65 = arith.constant dense<0.000000e+00> : vector<8x32xf32>
    %114 = tpu.matmul %113, %95, %cst_65 {dimension_numbers = #tpu.dot_dimension_numbers<[1], [0], [0], [1], [0, 0, 1, 1], [], []>} : vector<8x288xbf16>, vector<288x32xbf16>, vector<8x32xf32> -> vector<8x32xf32>
    %115 = vector.broadcast %97 : vector<1x32xf32> to vector<8x32xf32>
    %116 = arith.addf %114, %115 : vector<8x32xf32>
    %cst_66 = arith.constant 0.000000e+00 : f32
    %117 = vector.broadcast %cst_66 : f32 to vector<8x32xf32>
    %118 = arith.maximumf %116, %117 : vector<8x32xf32>
    %119 = vector.shape_cast %118 : vector<8x32xf32> to vector<2x2x2x32xf32>
    %c3 = arith.constant 3 : index
    %c0_67 = arith.constant 0 : index
    %c0_68 = arith.constant 0 : index
    %120 = vector.load %arg3[%c3, %c0_67, %c0_68] : memref<5x288x32xbf16, #tpu.memory_space<vmem>>, vector<1x288x32xbf16>
    %121 = vector.shape_cast %120 : vector<1x288x32xbf16> to vector<288x32xbf16>
    %c3_69 = arith.constant 3 : index
    %c0_70 = arith.constant 0 : index
    %c0_71 = arith.constant 0 : index
    %122 = vector.load %arg4[%c3_69, %c0_70, %c0_71] : memref<5x1x32xf32, #tpu.memory_space<vmem>>, vector<1x1x32xf32>
    %123 = vector.shape_cast %122 : vector<1x1x32xf32> to vector<1x32xf32>
    %cst_72 = arith.constant 0.000000e+00 : f32
    %124 = vector.broadcast %cst_72 : f32 to vector<2x4x4x32xf32>
    %c0_73 = arith.constant 0 : index
    %c0_74 = arith.constant 0 : index
    %c0_75 = arith.constant 0 : index
    %c0_76 = arith.constant 0 : index
    %125 = vector.load %arg14[%c0_73, %c0_74, %c0_75, %c0_76] : memref<2x4x4x32xf32, #tpu.memory_space<vmem>>, vector<2x4x4x32xf32>
    tpu.vector_store %arg14[%c0_73, %c0_74, %c0_75, %c0_76], %124 {strides = array<i32>} : memref<2x4x4x32xf32, #tpu.memory_space<vmem>>, vector<2x4x4x32xf32>,
    %c0_77 = arith.constant 0 : index
    %c1_78 = arith.constant 1 : index
    %c1_79 = arith.constant 1 : index
    %c0_80 = arith.constant 0 : index
    %126 = vector.load %arg14[%c0_77, %c1_78, %c1_79, %c0_80] : memref<2x4x4x32xf32, #tpu.memory_space<vmem>>, vector<2x2x2x32xf32>
    tpu.vector_store %arg14[%c0_77, %c1_78, %c1_79, %c0_80], %119 {strides = array<i32>} : memref<2x4x4x32xf32, #tpu.memory_space<vmem>>, vector<2x2x2x32xf32>,
    %c0_81 = arith.constant 0 : index
    %c0_82 = arith.constant 0 : index
    %c0_83 = arith.constant 0 : index
    %c0_84 = arith.constant 0 : index
    %127 = vector.load %arg14[%c0_81, %c0_82, %c0_83, %c0_84] : memref<2x4x4x32xf32, #tpu.memory_space<vmem>>, vector<2x4x4x32xf32>
    %128 = vector.extract_strided_slice %127 {offsets = [0, 0, 0, 0], sizes = [2, 2, 2, 32], strides = [1, 1, 1, 1]} : vector<2x4x4x32xf32> to vector<2x2x2x32xf32>
    %129 = vector.extract_strided_slice %127 {offsets = [0, 0, 1, 0], sizes = [2, 2, 2, 32], strides = [1, 1, 1, 1]} : vector<2x4x4x32xf32> to vector<2x2x2x32xf32>
    %130 = vector.extract_strided_slice %127 {offsets = [0, 0, 2, 0], sizes = [2, 2, 2, 32], strides = [1, 1, 1, 1]} : vector<2x4x4x32xf32> to vector<2x2x2x32xf32>
    %131 = vector.extract_strided_slice %127 {offsets = [0, 1, 0, 0], sizes = [2, 2, 2, 32], strides = [1, 1, 1, 1]} : vector<2x4x4x32xf32> to vector<2x2x2x32xf32>
    %132 = vector.extract_strided_slice %127 {offsets = [0, 1, 1, 0], sizes = [2, 2, 2, 32], strides = [1, 1, 1, 1]} : vector<2x4x4x32xf32> to vector<2x2x2x32xf32>
    %133 = vector.extract_strided_slice %127 {offsets = [0, 1, 2, 0], sizes = [2, 2, 2, 32], strides = [1, 1, 1, 1]} : vector<2x4x4x32xf32> to vector<2x2x2x32xf32>
    %134 = vector.extract_strided_slice %127 {offsets = [0, 2, 0, 0], sizes = [2, 2, 2, 32], strides = [1, 1, 1, 1]} : vector<2x4x4x32xf32> to vector<2x2x2x32xf32>
    %135 = vector.extract_strided_slice %127 {offsets = [0, 2, 1, 0], sizes = [2, 2, 2, 32], strides = [1, 1, 1, 1]} : vector<2x4x4x32xf32> to vector<2x2x2x32xf32>
    %136 = vector.extract_strided_slice %127 {offsets = [0, 2, 2, 0], sizes = [2, 2, 2, 32], strides = [1, 1, 1, 1]} : vector<2x4x4x32xf32> to vector<2x2x2x32xf32>
    %137 = tpu.concatenate %128, %129, %130, %131, %132, %133, %134, %135, %136 in 3 : vector<2x2x2x32xf32>, vector<2x2x2x32xf32>, vector<2x2x2x32xf32>, vector<2x2x2x32xf32>, vector<2x2x2x32xf32>, vector<2x2x2x32xf32>, vector<2x2x2x32xf32>, vector<2x2x2x32xf32>, vector<2x2x2x32xf32> -> vector<2x2x2x288xf32>
    %138 = vector.shape_cast %137 : vector<2x2x2x288xf32> to vector<8x288xf32>
    %139 = arith.truncf %138 : vector<8x288xf32> to vector<8x288xbf16>
    %cst_85 = arith.constant dense<0.000000e+00> : vector<8x32xf32>
    %140 = tpu.matmul %139, %121, %cst_85 {dimension_numbers = #tpu.dot_dimension_numbers<[1], [0], [0], [1], [0, 0, 1, 1], [], []>} : vector<8x288xbf16>, vector<288x32xbf16>, vector<8x32xf32> -> vector<8x32xf32>
    %141 = vector.broadcast %123 : vector<1x32xf32> to vector<8x32xf32>
    %142 = arith.addf %140, %141 : vector<8x32xf32>
    %cst_86 = arith.constant 0.000000e+00 : f32
    %143 = vector.broadcast %cst_86 : f32 to vector<8x32xf32>
    %144 = arith.maximumf %142, %143 : vector<8x32xf32>
    %145 = vector.shape_cast %144 : vector<8x32xf32> to vector<2x2x2x32xf32>
    %c4 = arith.constant 4 : index
    %c0_87 = arith.constant 0 : index
    %c0_88 = arith.constant 0 : index
    %146 = vector.load %arg3[%c4, %c0_87, %c0_88] : memref<5x288x32xbf16, #tpu.memory_space<vmem>>, vector<1x288x32xbf16>
    %147 = vector.shape_cast %146 : vector<1x288x32xbf16> to vector<288x32xbf16>
    %c4_89 = arith.constant 4 : index
    %c0_90 = arith.constant 0 : index
    %c0_91 = arith.constant 0 : index
    %148 = vector.load %arg4[%c4_89, %c0_90, %c0_91] : memref<5x1x32xf32, #tpu.memory_space<vmem>>, vector<1x1x32xf32>
    %149 = vector.shape_cast %148 : vector<1x1x32xf32> to vector<1x32xf32>
    %cst_92 = arith.constant 0.000000e+00 : f32
    %150 = vector.broadcast %cst_92 : f32 to vector<2x4x4x32xf32>
    %c0_93 = arith.constant 0 : index
    %c0_94 = arith.constant 0 : index
    %c0_95 = arith.constant 0 : index
    %c0_96 = arith.constant 0 : index
    %151 = vector.load %arg14[%c0_93, %c0_94, %c0_95, %c0_96] : memref<2x4x4x32xf32, #tpu.memory_space<vmem>>, vector<2x4x4x32xf32>
    tpu.vector_store %arg14[%c0_93, %c0_94, %c0_95, %c0_96], %150 {strides = array<i32>} : memref<2x4x4x32xf32, #tpu.memory_space<vmem>>, vector<2x4x4x32xf32>,
    %c0_97 = arith.constant 0 : index
    %c1_98 = arith.constant 1 : index
    %c1_99 = arith.constant 1 : index
    %c0_100 = arith.constant 0 : index
    %152 = vector.load %arg14[%c0_97, %c1_98, %c1_99, %c0_100] : memref<2x4x4x32xf32, #tpu.memory_space<vmem>>, vector<2x2x2x32xf32>
    tpu.vector_store %arg14[%c0_97, %c1_98, %c1_99, %c0_100], %145 {strides = array<i32>} : memref<2x4x4x32xf32, #tpu.memory_space<vmem>>, vector<2x2x2x32xf32>,
    %c0_101 = arith.constant 0 : index
    %c0_102 = arith.constant 0 : index
    %c0_103 = arith.constant 0 : index
    %c0_104 = arith.constant 0 : index
    %153 = vector.load %arg14[%c0_101, %c0_102, %c0_103, %c0_104] : memref<2x4x4x32xf32, #tpu.memory_space<vmem>>, vector<2x4x4x32xf32>
    %154 = vector.extract_strided_slice %153 {offsets = [0, 0, 0, 0], sizes = [2, 2, 2, 32], strides = [1, 1, 1, 1]} : vector<2x4x4x32xf32> to vector<2x2x2x32xf32>
    %155 = vector.extract_strided_slice %153 {offsets = [0, 0, 1, 0], sizes = [2, 2, 2, 32], strides = [1, 1, 1, 1]} : vector<2x4x4x32xf32> to vector<2x2x2x32xf32>
    %156 = vector.extract_strided_slice %153 {offsets = [0, 0, 2, 0], sizes = [2, 2, 2, 32], strides = [1, 1, 1, 1]} : vector<2x4x4x32xf32> to vector<2x2x2x32xf32>
    %157 = vector.extract_strided_slice %153 {offsets = [0, 1, 0, 0], sizes = [2, 2, 2, 32], strides = [1, 1, 1, 1]} : vector<2x4x4x32xf32> to vector<2x2x2x32xf32>
    %158 = vector.extract_strided_slice %153 {offsets = [0, 1, 1, 0], sizes = [2, 2, 2, 32], strides = [1, 1, 1, 1]} : vector<2x4x4x32xf32> to vector<2x2x2x32xf32>
    %159 = vector.extract_strided_slice %153 {offsets = [0, 1, 2, 0], sizes = [2, 2, 2, 32], strides = [1, 1, 1, 1]} : vector<2x4x4x32xf32> to vector<2x2x2x32xf32>
    %160 = vector.extract_strided_slice %153 {offsets = [0, 2, 0, 0], sizes = [2, 2, 2, 32], strides = [1, 1, 1, 1]} : vector<2x4x4x32xf32> to vector<2x2x2x32xf32>
    %161 = vector.extract_strided_slice %153 {offsets = [0, 2, 1, 0], sizes = [2, 2, 2, 32], strides = [1, 1, 1, 1]} : vector<2x4x4x32xf32> to vector<2x2x2x32xf32>
    %162 = vector.extract_strided_slice %153 {offsets = [0, 2, 2, 0], sizes = [2, 2, 2, 32], strides = [1, 1, 1, 1]} : vector<2x4x4x32xf32> to vector<2x2x2x32xf32>
    %163 = tpu.concatenate %154, %155, %156, %157, %158, %159, %160, %161, %162 in 3 : vector<2x2x2x32xf32>, vector<2x2x2x32xf32>, vector<2x2x2x32xf32>, vector<2x2x2x32xf32>, vector<2x2x2x32xf32>, vector<2x2x2x32xf32>, vector<2x2x2x32xf32>, vector<2x2x2x32xf32>, vector<2x2x2x32xf32> -> vector<2x2x2x288xf32>
    %164 = vector.shape_cast %163 : vector<2x2x2x288xf32> to vector<8x288xf32>
    %165 = arith.truncf %164 : vector<8x288xf32> to vector<8x288xbf16>
    %cst_105 = arith.constant dense<0.000000e+00> : vector<8x32xf32>
    %166 = tpu.matmul %165, %147, %cst_105 {dimension_numbers = #tpu.dot_dimension_numbers<[1], [0], [0], [1], [0, 0, 1, 1], [], []>} : vector<8x288xbf16>, vector<288x32xbf16>, vector<8x32xf32> -> vector<8x32xf32>
    %167 = vector.broadcast %149 : vector<1x32xf32> to vector<8x32xf32>
    %168 = arith.addf %166, %167 : vector<8x32xf32>
    %cst_106 = arith.constant 0.000000e+00 : f32
    %169 = vector.broadcast %cst_106 : f32 to vector<8x32xf32>
    %170 = arith.maximumf %168, %169 : vector<8x32xf32>
    %171 = vector.shape_cast %170 : vector<8x32xf32> to vector<2x2x2x32xf32>
    %172 = vector.shape_cast %171 : vector<2x2x2x32xf32> to vector<8x32xf32>
    %173 = arith.truncf %172 : vector<8x32xf32> to vector<8x32xbf16>
    %c0_107 = arith.constant 0 : index
    %c0_108 = arith.constant 0 : index
    %174 = vector.load %arg5[%c0_107, %c0_108] : memref<32x128xbf16, #tpu.memory_space<vmem>>, vector<32x128xbf16>
    %cst_109 = arith.constant dense<0.000000e+00> : vector<8x128xf32>
    %175 = tpu.matmul %173, %174, %cst_109 {dimension_numbers = #tpu.dot_dimension_numbers<[1], [0], [0], [1], [0, 0, 1, 1], [], []>} : vector<8x32xbf16>, vector<32x128xbf16>, vector<8x128xf32> -> vector<8x128xf32>
    %c0_110 = arith.constant 0 : index
    %c0_111 = arith.constant 0 : index
    %176 = vector.load %arg6[%c0_110, %c0_111] : memref<1x128xf32, #tpu.memory_space<vmem>>, vector<1x128xf32>
    %177 = vector.broadcast %176 : vector<1x128xf32> to vector<8x128xf32>
    %178 = arith.addf %175, %177 : vector<8x128xf32>
    %cst_112 = arith.constant 0.000000e+00 : f32
    %179 = vector.broadcast %cst_112 : f32 to vector<8x128xf32>
    %180 = arith.maximumf %178, %179 : vector<8x128xf32>
    %181 = arith.truncf %180 : vector<8x128xf32> to vector<8x128xbf16>
    %c0_113 = arith.constant 0 : index
    %c0_114 = arith.constant 0 : index
    %182 = vector.load %arg7[%c0_113, %c0_114] : memref<128x192xbf16, #tpu.memory_space<vmem>>, vector<128x192xbf16>
    %cst_115 = arith.constant dense<0.000000e+00> : vector<8x192xf32>
    %183 = tpu.matmul %181, %182, %cst_115 {dimension_numbers = #tpu.dot_dimension_numbers<[1], [0], [0], [1], [0, 0, 1, 1], [], []>} : vector<8x128xbf16>, vector<128x192xbf16>, vector<8x192xf32> -> vector<8x192xf32>
    %c0_116 = arith.constant 0 : index
    %c0_117 = arith.constant 0 : index
    %184 = vector.load %arg8[%c0_116, %c0_117] : memref<1x192xf32, #tpu.memory_space<vmem>>, vector<1x192xf32>
    %185 = vector.broadcast %184 : vector<1x192xf32> to vector<8x192xf32>
    %186 = arith.addf %183, %185 : vector<8x192xf32>
    %cst_118 = arith.constant 0.000000e+00 : f32
    %187 = vector.broadcast %cst_118 : f32 to vector<8x192xf32>
    %188 = arith.maximumf %186, %187 : vector<8x192xf32>
    %189 = arith.truncf %188 : vector<8x192xf32> to vector<8x192xbf16>
    %c0_119 = arith.constant 0 : index
    %c0_120 = arith.constant 0 : index
    %190 = vector.load %arg9[%c0_119, %c0_120] : memref<192x128xbf16, #tpu.memory_space<vmem>>, vector<192x128xbf16>
    %cst_121 = arith.constant dense<0.000000e+00> : vector<8x128xf32>
    %191 = tpu.matmul %189, %190, %cst_121 {dimension_numbers = #tpu.dot_dimension_numbers<[1], [0], [0], [1], [0, 0, 1, 1], [], []>} : vector<8x192xbf16>, vector<192x128xbf16>, vector<8x128xf32> -> vector<8x128xf32>
    %c0_122 = arith.constant 0 : index
    %c0_123 = arith.constant 0 : index
    %192 = vector.load %arg10[%c0_122, %c0_123] : memref<1x128xf32, #tpu.memory_space<vmem>>, vector<1x128xf32>
    %193 = vector.broadcast %192 : vector<1x128xf32> to vector<8x128xf32>
    %194 = arith.addf %191, %193 : vector<8x128xf32>
    %c0_124 = arith.constant 0 : index
    %c0_125 = arith.constant 0 : index
    %195 = vector.load %arg11[%c0_124, %c0_125] : memref<8x128xf32, #tpu.memory_space<vmem>>, vector<8x128xf32>
    tpu.vector_store %arg11[%c0_124, %c0_125], %194 {strides = array<i32>} : memref<8x128xf32, #tpu.memory_space<vmem>>, vector<8x128xf32>,
    return
  }
}

</mosaic_0001>

<bundles_post_ra>
// kernel: phdnet_forward.1
= control target key start
LH: loop header
LB: loop body
LE: loop exit
PB: predicated region body
PF: predicated region fallthrough
CT: control target
= control target key end

     0   :  { %vm371_vm0 = vcmask 1043456   ;;  %vm372_vm1 = vcmask 1044480   ;;  %v7181_v2 = vmov 65535   ;;  %vm274_vm2 = vcmask 72704   ;;  %s7183_s28 = smov 64   ;;  %s7184_s24 = smov 96   ;;  %s9738_s1 = inlined_call_operand.vmem [shape: bf16[9,32], index: 1, kind: input, shape index: {}]   ;;  %s9739_s2 = inlined_call_operand.vmem [shape: f32[1,32], index: 2, kind: input, shape index: {}]   ;;  %s9740_s0 = inlined_call_operand.vmem [shape: bf16[512,9], index: 0, kind: input, shape index: {}]   ;;  %s9741_s3 = inlined_call_operand.vmem [shape: bf16[5,288,32], index: 3, kind: input, shape index: {}]   ;;  %s9742_s4 = inlined_call_operand.vmem [shape: f32[5,1,32], index: 4, kind: input, shape index: {}]   ;;  %s9743_s6 = inlined_call_operand.vmem [shape: f32[1,128], index: 6, kind: input, shape index: {}]   ;;  %s9744_s5 = inlined_call_operand.vmem [shape: bf16[32,128], index: 5, kind: input, shape index: {}]   ;;  %s9745_s7 = inlined_call_operand.vmem [shape: bf16[128,192], index: 7, kind: input, shape index: {}]   ;;  %s9746_s9 = inlined_call_operand.vmem [shape: bf16[192,128], index: 9, kind: input, shape index: {}]   ;;  %s9747_s8 = inlined_call_operand.vmem [shape: f32[1,192], index: 8, kind: input, shape index: {}]   ;;  %s9748_s10 = inlined_call_operand.vmem [shape: f32[1,128], index: 10, kind: input, shape index: {}]   ;;  %s9749_s11 = inlined_call_operand.vmem [shape: f32[8,128], index: 11, kind: output, shape index: {}]  }
   0x1   :  { %v5911_v0 = vld [vmem:[%s9738_s1] sm:$0xf]  ;;  %v6794_v1 = vld [vmem:[%s9738_s1] sm:$0x10]  ;;  %v373_v3 = vsel %vm371_vm0, 4294967295, %v7181_v2  ;;  %v6763_v8 = vld [vmem:[%s9740_s0 + $0x8] sm:$0xff] }
   0x2   :  { %v5912_v4 = vor.u32 %v6794_v1, %v5911_v0  ;;  %v374_v5 = vsel %vm372_vm1, %v373_v3, 0  ;;  %v6762_v7 = vld [vmem:[%s9740_s0] sm:$0xff]  ;;  %v6764_v9 = vld [vmem:[%s9740_s0 + $0x10] sm:$0xff]  ;;  %v6765_v10 = vld [vmem:[%s9740_s0 + $0x18] sm:$0xff]  ;;  %vm1864_vm3 = vcmask 261120   ;;  %vm1866_vm4 = vcmask 254976  }
   0x3   :  { %v6766_v11 = vld [vmem:[%s9740_s0 + $0x20] sm:$0xff]  ;;  %v6767_v12 = vld [vmem:[%s9740_s0 + $0x28] sm:$0xff]  ;;  %v6768_v13 = vld [vmem:[%s9740_s0 + $0x30] sm:$0xff]  ;;  %v9750_v17 = vmov 0.0   ;;  %vm2162_vm5 = vcmask 1041409   ;;  %vm2164_vm6 = vcmask 1042434  }
   0x4   :  { %v376_v6 = vand.u32 %v5912_v4, %v374_v5  ;;  %v6769_v14 = vld [vmem:[%s9740_s0 + $0x38] sm:$0xff]  ;;  %v6770_v15 = vld [vmem:[%s9740_s0 + $0x40] sm:$0xff]  ;;  %1868 = vst.msk [vmem:[#allocation2 + $0x10] sm:$0xff] %vm1864_vm3, %v9750_v17  ;;  %v6771_v21 = vld [vmem:[%s9740_s0 + $0x48] sm:$0xff]  ;;  %vm2166_vm7 = vcmask 1043459   ;;  %vm2168_vm8 = vcmask 1044484  }
   0x5   :  { %1869 = vst.msk [vmem:[#allocation2 + $0x18] sm:$0x3] %vm1866_vm4, %v9750_v17  ;;  %v7298_v18 = vld [vmem:[%s9739_s2] ss:$0 sm:$0xff]  ;;  %v6772_v59 = vld [vmem:[%s9740_s0 + $0x50] sm:$0xff]  ;;  %vm2170_vm9 = vcmask 1045509  }
   0x6   :  { %385 = vmatpush.bf16.msra.mxu0 %v376_v6  ;;  %6915 = vmatpush.bf16.msra.mxu1 %v376_v6  ;;  %1865 = vst.msk [vmem:[#allocation2] sm:$0xff] %vm1864_vm3, %v9750_v17  ;;  %vm2172_vm10 = vcmask 1046534   ;;  %vm2174_vm11 = vcmask 1047559   ;;  %vm2483_vm12 = vcmask 1045504   ;;  %s7185_s26 = smov 32   ;;  %vm2386_vm13 = vcmask 1046528  }
   0x7   :  { %6916 = vmatpush.bf16.msra.mxu2 %v376_v6  ;;  %1867 = vst.msk [vmem:[#allocation2 + $0x8] sm:$0x3] %vm1866_vm4, %v9750_v17  ;;  %vm2852_vm14 = vcmask 523264   ;;  %vm2869_vm15 = vcmask 785408   ;;  %vm3599_vm1 = vcmask 259072  }
   0x8   :  { %1870 = vst.msk [vmem:[#allocation2 + $0x20] sm:$0xff] %vm1864_vm3, %v9750_v17 }
   0x9   :  { %5913 = vmatmul.msk.bf16.vlgmr.msra.gmra.mxu0 %vm274_vm2, %v6762_v7  ;;  %1871 = vst.msk [vmem:[#allocation2 + $0x28] sm:$0x3] %vm1866_vm4, %v9750_v17 }
   0xa   :  { %1872 = vst.msk [vmem:[#allocation2 + $0x30] sm:$0xff] %vm1864_vm3, %v9750_v17 }
   0xb   :  { %1873 = vst.msk [vmem:[#allocation2 + $0x38] sm:$0x3] %vm1866_vm4, %v9750_v17 }
   0xc   :  { %1874 = vst.msk [vmem:[#allocation2 + $0x40] sm:$0xff] %vm1864_vm3, %v9750_v17 }
   0xd   :  { %1875 = vst.msk [vmem:[#allocation2 + $0x48] sm:$0x3] %vm1866_vm4, %v9750_v17 }
   0xe   :  { %1876 = vst.msk [vmem:[#allocation2 + $0x50] sm:$0xff] %vm1864_vm3, %v9750_v17 }
   0xf   :  { %1877 = vst.msk [vmem:[#allocation2 + $0x58] sm:$0x3] %vm1866_vm4, %v9750_v17 }
  0x10   :  { %1878 = vst.msk [vmem:[#allocation2 + $0x60] sm:$0xff] %vm1864_vm3, %v9750_v17 }
  0x11   :  { %1879 = vst.msk [vmem:[#allocation2 + $0x68] sm:$0x3] %vm1866_vm4, %v9750_v17 }
  0x12   :  { %1880 = vst.msk [vmem:[#allocation2 + $0x70] sm:$0xff] %vm1864_vm3, %v9750_v17 }
  0x13   :  { %1881 = vst.msk [vmem:[#allocation2 + $0x78] sm:$0x3] %vm1866_vm4, %v9750_v17 }
  0x14   :  { %1882 = vst.msk [vmem:[#allocation2 + $0x80] sm:$0xff] %vm1864_vm3, %v9750_v17 }
  0x15   :  { %1883 = vst.msk [vmem:[#allocation2 + $0x88] sm:$0x3] %vm1866_vm4, %v9750_v17 }
  0x16   :  { %1884 = vst.msk [vmem:[#allocation2 + $0x90] sm:$0xff] %vm1864_vm3, %v9750_v17 }
  0x17   :  { %1885 = vst.msk [vmem:[#allocation2 + $0x98] sm:$0x3] %vm1866_vm4, %v9750_v17 }
  0x18   :  { %1886 = vst.msk [vmem:[#allocation2 + $0xa0] sm:$0xff] %vm1864_vm3, %v9750_v17 }
  0x19   :  { %5914 = vmatmul.msk.bf16.gmra.mxu0 %vm274_vm2, %v6763_v8  ;;  %1887 = vst.msk [vmem:[#allocation2 + $0xa8] sm:$0x3] %vm1866_vm4, %v9750_v17 }
  0x1a   :  { %1888 = vst.msk [vmem:[#allocation2 + $0xb0] sm:$0xff] %vm1864_vm3, %v9750_v17 }
  0x1b   :  { %1889 = vst.msk [vmem:[#allocation2 + $0xb8] sm:$0x3] %vm1866_vm4, %v9750_v17 }
  0x1c   :  { %1890 = vst.msk [vmem:[#allocation2 + $0xc0] sm:$0xff] %vm1864_vm3, %v9750_v17 }
  0x1d   :  { %1891 = vst.msk [vmem:[#allocation2 + $0xc8] sm:$0x3] %vm1866_vm4, %v9750_v17 }
  0x1e   :  { %1892 = vst.msk [vmem:[#allocation2 + $0xd0] sm:$0xff] %vm1864_vm3, %v9750_v17 }
  0x1f   :  { %1893 = vst.msk [vmem:[#allocation2 + $0xd8] sm:$0x3] %vm1866_vm4, %v9750_v17 }
  0x20   :  { %1894 = vst.msk [vmem:[#allocation2 + $0xe0] sm:$0xff] %vm1864_vm3, %v9750_v17 }
  0x21   :  { %1895 = vst.msk [vmem:[#allocation2 + $0xe8] sm:$0x3] %vm1866_vm4, %v9750_v17 }
  0x22   :  { %1896 = vst.msk [vmem:[#allocation2 + $0xf0] sm:$0xff] %vm1864_vm3, %v9750_v17 }
  0x23   :  { %1897 = vst.msk [vmem:[#allocation2 + $0xf8] sm:$0x3] %vm1866_vm4, %v9750_v17 }
  0x24   :  { %1898 = vst.msk [vmem:[#allocation2 + $0x100] sm:$0xff] %vm1864_vm3, %v9750_v17 }
  0x25   :  { %1899 = vst.msk [vmem:[#allocation2 + $0x108] sm:$0x3] %vm1866_vm4, %v9750_v17 }
  0x26   :  { %1900 = vst.msk [vmem:[#allocation2 + $0x110] sm:$0xff] %vm1864_vm3, %v9750_v17 }
  0x27   :  { %1901 = vst.msk [vmem:[#allocation2 + $0x118] sm:$0x3] %vm1866_vm4, %v9750_v17 }
  0x28   :  { %1902 = vst.msk [vmem:[#allocation2 + $0x120] sm:$0xff] %vm1864_vm3, %v9750_v17 }
  0x29   :  { %5915 = vmatmul.msk.bf16.gmra.mxu0 %vm274_vm2, %v6764_v9  ;;  %1903 = vst.msk [vmem:[#allocation2 + $0x128] sm:$0x3] %vm1866_vm4, %v9750_v17 }
  0x2a   :  { %1904 = vst.msk [vmem:[#allocation2 + $0x130] sm:$0xff] %vm1864_vm3, %v9750_v17 }
  0x2b   :  { %1905 = vst.msk [vmem:[#allocation2 + $0x138] sm:$0x3] %vm1866_vm4, %v9750_v17 }
  0x39   :  { %5916 = vmatmul.msk.bf16.gmra.mxu0 %vm274_vm2, %v6765_v10 }
  0x49   :  { %5917 = vmatmul.msk.bf16.gmra.mxu0 %vm274_vm2, %v6766_v11 }
  0x59   :  { %5918 = vmatmul.msk.bf16.gmra.mxu0 %vm274_vm2, %v6767_v12 }
  0x69   :  { %5919 = vmatmul.msk.bf16.gmra.mxu0 %vm274_vm2, %v6768_v13 }
  0x79   :  { %5920 = vmatmul.msk.bf16.gmra.mxu0 %vm274_vm2, %v6769_v14 }
  0x86   :  { %v387_v16 = vpop.f32.mrf.mxu0 }
  0x87   :  { %v388_v20 = vadd.f32 %v7298_v18, %v387_v16 }
  0x89   :  { %5921 = vmatmul.msk.bf16.gmra.mxu0 %vm274_vm2, %v6770_v15  ;;  %v547_v22 = vmax.f32 %v388_v20, 0.0 }
  0x8b   :  { %v675_v26 = vrot.slane %v547_v22, 2  ;;  %v676_v27 = vrot.slane %v547_v22, 4  ;;  %v677_v28 = vrot.slane %v547_v22, 6 }
  0x8e   :  { %v389_v19 = vpop.f32.mrf.mxu0 }
  0x8f   :  { %v390_v29 = vadd.f32 %v7298_v18, %v389_v19 }
  0x91   :  { %v548_v38 = vmax.f32 %v390_v29, 0.0 }
  0x93   :  { %v678_v47 = vrot.slane %v548_v38, 2  ;;  %v679_v49 = vrot.slane %v548_v38, 4  ;;  %v680_v50 = vrot.slane %v548_v38, 6 }
  0x96   :  { %v392_v23 = vpop.f32.mrf.mxu0 }
  0x97   :  { %v393_v24 = vadd.f32 %v7298_v18, %v392_v23 }
  0x99   :  { %v549_v25 = vmax.f32 %v393_v24, 0.0  ;;  %5922 = vmatmul.msk.bf16.gmra.mxu0 %vm274_vm2, %v6771_v21  ;;  %v7393_v24 = vld [vmem:[#allocation2] sm:$0xff] }
  0x9b   :  { %v681_v30 = vrot.slane %v549_v25, 2  ;;  %v682_v31 = vrot.slane %v549_v25, 4  ;;  %v683_v32 = vrot.slane %v549_v25, 6  ;;  %v1059_v33 = vmax.f32 %v547_v22, %v549_v25  ;;  %v7395_v25 = vld [vmem:[#allocation2 + $0x8] sm:$0x3] }
  0x9d   :  { %v1060_v34 = vmax.f32 %v675_v26, %v681_v30  ;;  %v1061_v35 = vmax.f32 %v676_v27, %v682_v31  ;;  %v1062_v36 = vmax.f32 %v677_v28, %v683_v32  ;;  %v5945_v37 = vrot.slane %v1059_v33, 9  ;;  %v6773_v26 = vld [vmem:[%s9740_s0 + $0x58] sm:$0xff] }
  0x9e   :  { %v394_v39 = vpop.f32.mrf.mxu0  ;;  %v2484_v27 = vrot.slane %v7393_v24, 2  ;;  %v2485_v28 = vrot.slane %v7395_v25, 2 }
  0x9f   :  { %v5946_v40 = vrot.slane %v1060_v34, 9  ;;  %v5947_v41 = vrot.slane %v1061_v35, 9  ;;  %v1699_v42 = vmax.f32 %v1059_v33, %v5945_v37  ;;  %v395_v43 = vadd.f32 %v7298_v18, %v394_v39 }
  0xa0   :  { %v5948_v44 = vrot.slane %v1062_v36, 9 }
  0xa1   :  { %v1700_v45 = vmax.f32 %v1060_v34, %v5946_v40  ;;  %v1701_v46 = vmax.f32 %v1061_v35, %v5947_v41  ;;  %v550_v48 = vmax.f32 %v395_v43, 0.0  ;;  %v2034_v51 = vperm.slane %v1699_v42, 0  ;;  %v6783_v42 = vld [vmem:[%s9740_s0 + $0xa8] sm:$0xff] }
  0xa2   :  { %v1702_v57 = vmax.f32 %v1062_v36, %v5948_v44  ;;  %v2486_v35 = vsel %vm2483_vm12, %v2484_v27, %v2485_v28  ;;  %5934 = vmatmul.msk.bf16.vlgmr.msra.gmra.mxu1 %vm274_vm2, %v6783_v42 }
  0xa3   :  { %v2035_v52 = vperm.slane %v1700_v45, 0  ;;  %v684_v53 = vrot.slane %v550_v48, 2  ;;  %v685_v54 = vrot.slane %v550_v48, 4  ;;  %v686_v55 = vrot.slane %v550_v48, 6 }
  0xa4   :  { %v1063_v56 = vmax.f32 %v548_v38, %v550_v48  ;;  %v2036_v58 = vperm.slane %v1701_v46, 0  ;;  %v2037_v7 = vperm.slane %v1702_v57, 0 }
  0xa5   :  { %v2163_v60 = vsel %vm2162_vm5, %v2035_v52, %v2034_v51  ;;  %v1064_v61 = vmax.f32 %v678_v47, %v684_v53  ;;  %v1065_v62 = vmax.f32 %v679_v49, %v685_v54  ;;  %v1066_v63 = vmax.f32 %v680_v50, %v686_v55 }
  0xa6   :  { %v397_v0 = vpop.f32.mrf.mxu0  ;;  %v5949_v1 = vrot.slane %v1063_v56, 9  ;;  %v2165_v5 = vsel %vm2164_vm6, %v2036_v58, %v2163_v60 }
  0xa7   :  { %v5950_v2 = vrot.slane %v1064_v61, 9  ;;  %v5951_v3 = vrot.slane %v1065_v62, 9  ;;  %v5952_v4 = vrot.slane %v1066_v63, 9  ;;  %v2167_v12 = vsel %vm2166_vm7, %v2037_v7, %v2165_v5 }
  0xa8   :  { %v1703_v6 = vmax.f32 %v1063_v56, %v5949_v1  ;;  %v398_v23 = vadd.f32 %v7298_v18, %v397_v0 }
  0xa9   :  { %5923 = vmatmul.msk.bf16.gmra.mxu0 %vm274_vm2, %v6772_v59  ;;  %v1704_v8 = vmax.f32 %v1064_v61, %v5950_v2  ;;  %v1705_v9 = vmax.f32 %v1065_v62, %v5951_v3  ;;  %v1706_v10 = vmax.f32 %v1066_v63, %v5952_v4 }
  0xaa   :  { %v2038_v11 = vperm.slane %v1703_v6, 0  ;;  %v551_v29 = vmax.f32 %v398_v23, 0.0 }
  0xab   :  { %v2039_v13 = vperm.slane %v1704_v8, 0  ;;  %v2040_v14 = vperm.slane %v1705_v9, 0  ;;  %v2041_v16 = vperm.slane %v1706_v10, 0  ;;  %v6788_v8 = vld [vmem:[%s9740_s0 + $0xd0] sm:$0xff] }
  0xac   :  { %v2169_v15 = vsel %vm2168_vm8, %v2038_v11, %v2167_v12  ;;  %v687_v38 = vrot.slane %v551_v29, 2  ;;  %v688_v39 = vrot.slane %v551_v29, 4  ;;  %v689_v40 = vrot.slane %v551_v29, 6  ;;  %v6774_v11 = vld [vmem:[%s9740_s0 + $0x60] sm:$0xff]  ;;  %5939 = vmatmul.msk.bf16.vlgmr.msra.gmra.mxu2 %vm274_vm2, %v6788_v8 }
  0xad   :  { %v2171_v19 = vsel %vm2170_vm9, %v2039_v13, %v2169_v15 }
  0xae   :  { %v399_v20 = vpop.f32.mrf.mxu0  ;;  %v2173_v21 = vsel %vm2172_vm10, %v2040_v14, %v2171_v19 }
  0xaf   :  { %v2175_v22 = vsel %vm2174_vm11, %v2041_v16, %v2173_v21  ;;  %v400_v41 = vadd.f32 %v7298_v18, %v399_v20 }
  0xb0   :  { %2298 = vst.msk [vmem:[#allocation2 + $0x11] sm:$0xff] %vm1864_vm3, %v2175_v22 }
  0xb1   :  { %v552_v52 = vmax.f32 %v400_v41, 0.0 }
  0xb3   :  { %v690_v62 = vrot.slane %v552_v52, 2  ;;  %v691_v0 = vrot.slane %v552_v52, 4  ;;  %v692_v1 = vrot.slane %v552_v52, 6 }
  0xb6   :  { %v402_v30 = vpop.f32.mrf.mxu0 }
  0xb7   :  { %v403_v31 = vadd.f32 %v7298_v18, %v402_v30  ;;  %v7405_v32 = vld [vmem:[#allocation2 + $0x10] sm:$0xff]  ;;  %v7407_v33 = vld [vmem:[#allocation2 + $0x18] sm:$0x3] }
  0xb8   :  { %v2487_v36 = vrot.slane %v7405_v32, 2  ;;  %v2488_v37 = vrot.slane %v7407_v33, 2 }
  0xb9   :  { %v553_v34 = vmax.f32 %v403_v31, 0.0  ;;  %5924 = vmatmul.msk.bf16.gmra.mxu0 %vm274_vm2, %v6773_v26  ;;  %v6784_v31 = vld [vmem:[%s9740_s0 + $0xb0] sm:$0xff] }
  0xba   :  { %v7418_v47 = vsel %vm2483_vm12, %v2487_v36, %v2488_v37  ;;  %5935 = vmatmul.msk.bf16.gmra.mxu1 %vm274_vm2, %v6784_v31 }
  0xbb   :  { %v693_v43 = vrot.slane %v553_v34, 2  ;;  %v694_v44 = vrot.slane %v553_v34, 4  ;;  %v695_v45 = vrot.slane %v553_v34, 6  ;;  %v1067_v46 = vmax.f32 %v551_v29, %v553_v34 }
  0xbc   :  { %v6942_v53 = vpack.i.bf16 %v7418_v47, %v2486_v35 }
  0xbd   :  { %v1068_v48 = vmax.f32 %v687_v38, %v693_v43  ;;  %v1069_v49 = vmax.f32 %v688_v39, %v694_v44  ;;  %v1070_v50 = vmax.f32 %v689_v40, %v695_v45  ;;  %v5953_v51 = vrot.slane %v1067_v46, 9  ;;  %v6789_v45 = vld [vmem:[%s9740_s0 + $0xd8] sm:$0xff] }
  0xbe   :  { %v404_v54 = vpop.f32.mrf.mxu0  ;;  %6943 = vrot.lane.b32.xlu2 %v6942_v53, %s7183_s28  ;;  %5940 = vmatmul.msk.bf16.gmra.mxu2 %vm274_vm2, %v6789_v45 }
  0xbf   :  { %v5954_v55 = vrot.slane %v1068_v48, 9  ;;  %v5955_v56 = vrot.slane %v1069_v49, 9  ;;  %v1707_v57 = vmax.f32 %v1067_v46, %v5953_v51  ;;  %v405_v58 = vadd.f32 %v7298_v18, %v404_v54  ;;  %v6775_v46 = vld [vmem:[%s9740_s0 + $0x68] sm:$0xff] }
  0xc0   :  { %v5956_v59 = vrot.slane %v1070_v50, 9  ;;  %v6812_v51 = vld [vmem:[%s9741_s3 + $0x88] sm:$0xff] }
  0xc1   :  { %v1708_v60 = vmax.f32 %v1068_v48, %v5954_v55  ;;  %v1709_v61 = vmax.f32 %v1069_v49, %v5955_v56  ;;  %v554_v63 = vmax.f32 %v405_v58, 0.0  ;;  %v2042_v2 = vperm.slane %v1707_v57, 0  ;;  %3197 = vmatpush.bf16.msra.mxu3 %v6812_v51 }
  0xc2   :  { %v1710_v9 = vmax.f32 %v1070_v50, %v5956_v59 }
  0xc3   :  { %v2043_v3 = vperm.slane %v1708_v60, 0  ;;  %v696_v4 = vrot.slane %v554_v63, 2  ;;  %v697_v5 = vrot.slane %v554_v63, 4  ;;  %v698_v6 = vrot.slane %v554_v63, 6 }
  0xc4   :  { %v1071_v7 = vmax.f32 %v552_v52, %v554_v63  ;;  %v2044_v10 = vperm.slane %v1709_v61, 0  ;;  %v2045_v27 = vperm.slane %v1710_v9, 0 }
  0xc5   :  { %v2176_v12 = vsel %vm2162_vm5, %v2043_v3, %v2042_v2  ;;  %v1072_v13 = vmax.f32 %v690_v62, %v696_v4  ;;  %v1073_v14 = vmax.f32 %v691_v0, %v697_v5  ;;  %v1074_v15 = vmax.f32 %v692_v1, %v698_v6  ;;  %v6785_v62 = vld [vmem:[%s9740_s0 + $0xb8] sm:$0xff]  ;;  %v6811_v3 = vld [vmem:[%s9741_s3 + $0x80] sm:$0xff] }
  0xc6   :  { %v407_v16 = vpop.f32.mrf.mxu0  ;;  %v5957_v19 = vrot.slane %v1071_v7, 9  ;;  %v2177_v23 = vsel %vm2164_vm6, %v2044_v10, %v2176_v12  ;;  %3198 = vmatpush.bf16.msra.mxu3 %v6811_v3 }
  0xc7   :  { %v5958_v20 = vrot.slane %v1072_v13, 9  ;;  %v5959_v21 = vrot.slane %v1073_v14, 9  ;;  %v5960_v22 = vrot.slane %v1074_v15, 9  ;;  %v2178_v35 = vsel %vm2166_vm7, %v2045_v27, %v2177_v23 }
  0xc8   :  { %v1711_v26 = vmax.f32 %v1071_v7, %v5957_v19  ;;  %v408_v44 = vadd.f32 %v7298_v18, %v407_v16 }
  0xc9   :  { %5925 = vmatmul.msk.bf16.gmra.mxu0 %vm274_vm2, %v6774_v11  ;;  %v1712_v28 = vmax.f32 %v1072_v13, %v5958_v20  ;;  %v1713_v29 = vmax.f32 %v1073_v14, %v5959_v21  ;;  %v1714_v30 = vmax.f32 %v1074_v15, %v5960_v22 }
  0xca   :  { %v2046_v34 = vperm.slane %v1711_v26, 0  ;;  %v555_v48 = vmax.f32 %v408_v44, 0.0  ;;  %5936 = vmatmul.msk.bf16.gmra.mxu1 %vm274_vm2, %v6785_v62 }
  0xcb   :  { %v2047_v36 = vperm.slane %v1712_v28, 0  ;;  %v2048_v37 = vperm.slane %v1713_v29, 0  ;;  %v2049_v39 = vperm.slane %v1714_v30, 0 }
  0xcc   :  { %v2179_v38 = vsel %vm2168_vm8, %v2046_v34, %v2178_v35  ;;  %v699_v58 = vrot.slane %v555_v48, 2  ;;  %v700_v59 = vrot.slane %v555_v48, 4  ;;  %v701_v60 = vrot.slane %v555_v48, 6  ;;  %v6790_v34 = vld [vmem:[%s9740_s0 + $0xe0] sm:$0xff] }
  0xcd   :  { %v2180_v40 = vsel %vm2170_vm9, %v2047_v36, %v2179_v38 }
  0xce   :  { %v409_v41 = vpop.f32.mrf.mxu0  ;;  %v2181_v42 = vsel %vm2172_vm10, %v2048_v37, %v2180_v40  ;;  %v6776_v37 = vld [vmem:[%s9740_s0 + $0x70] sm:$0xff]  ;;  %5941 = vmatmul.msk.bf16.gmra.mxu2 %vm274_vm2, %v6790_v34 }
  0xcf   :  { %v2182_v43 = vsel %vm2174_vm11, %v2049_v39, %v2181_v42  ;;  %v410_v61 = vadd.f32 %v7298_v18, %v409_v41 }
  0xd0   :  { %2299 = vst.msk [vmem:[#allocation2 + $0x21] sm:$0xff] %vm1864_vm3, %v2182_v43 }
  0xd1   :  { %v556_v9 = vmax.f32 %v410_v61, 0.0 }
  0xd3   :  { %v702_v21 = vrot.slane %v556_v9, 2  ;;  %v703_v23 = vrot.slane %v556_v9, 4  ;;  %v704_v26 = vrot.slane %v556_v9, 6 }
  0xd6   :  { %v412_v49 = vpop.f32.mrf.mxu0 }
  0xd7   :  { %v413_v50 = vadd.f32 %v7298_v18, %v412_v49  ;;  %v7456_v52 = vld [vmem:[#allocation2 + $0x20] sm:$0xff]  ;;  %v7458_v53 = vld [vmem:[#allocation2 + $0x28] sm:$0x3] }
  0xd8   :  { %v6947_v55 = vpack.i.bf16 %v7456_v52, %v7405_v32  ;;  %v2490_v56 = vrot.slane %v7456_v52, 2  ;;  %v2491_v57 = vrot.slane %v7458_v53, 2 }
  0xd9   :  { %v557_v54 = vmax.f32 %v413_v50, 0.0  ;;  %5926 = vmatmul.msk.bf16.gmra.mxu0 %vm274_vm2, %v6775_v46 }
  0xda   :  { %6948 = vrot.lane.b32.xlu2 %v6947_v55, %s7184_s24  ;;  %v7474_v4 = vsel %vm2483_vm12, %v2490_v56, %v2491_v57  ;;  %v6786_v56 = vld [vmem:[%s9740_s0 + $0xc0] sm:$0xff] }
  0xdb   :  { %v705_v63 = vrot.slane %v557_v54, 2  ;;  %v706_v0 = vrot.slane %v557_v54, 4  ;;  %v707_v1 = vrot.slane %v557_v54, 6  ;;  %v1075_v2 = vmax.f32 %v555_v48, %v557_v54  ;;  %5937 = vmatmul.msk.bf16.gmra.mxu1 %vm274_vm2, %v6786_v56 }
  0xdc   :  { %v6922_v10 = vpack.i.bf16 %v7474_v4, %v7418_v47 }
  0xdd   :  { %v1076_v5 = vmax.f32 %v699_v58, %v705_v63  ;;  %v1077_v6 = vmax.f32 %v700_v59, %v706_v0  ;;  %v1078_v7 = vmax.f32 %v701_v60, %v707_v1  ;;  %v5961_v8 = vrot.slane %v1075_v2, 9 }
  0xde   :  { %v414_v11 = vpop.f32.mrf.mxu0  ;;  %6923 = vrot.lane.b32.xlu0 %v6922_v10, %s7185_s26  ;;  %v2391_v10 = vrot.slane %v7407_v33, 1 }
  0xdf   :  { %v5962_v12 = vrot.slane %v1076_v5, 9  ;;  %v5963_v13 = vrot.slane %v1077_v6, 9  ;;  %v1715_v14 = vmax.f32 %v1075_v2, %v5961_v8  ;;  %v415_v15 = vadd.f32 %v7298_v18, %v414_v11 }
  0xe0   :  { %v5964_v16 = vrot.slane %v1078_v7, 9  ;;  %v2388_v8 = vrot.slane %v7395_v25, 1 }
  0xe1   :  { %v1716_v19 = vmax.f32 %v1076_v5, %v5962_v12  ;;  %v1717_v20 = vmax.f32 %v1077_v6, %v5963_v13  ;;  %v558_v22 = vmax.f32 %v415_v15, 0.0  ;;  %v2050_v27 = vperm.slane %v1715_v14, 0  ;;  %v6791_v5 = vld [vmem:[%s9740_s0 + $0xe8] sm:$0xff] }
  0xe2   :  { %v1718_v35 = vmax.f32 %v1078_v7, %v5964_v16  ;;  %v6777_v7 = vld [vmem:[%s9740_s0 + $0x78] sm:$0xff]  ;;  %5942 = vmatmul.msk.bf16.gmra.mxu2 %vm274_vm2, %v6791_v5  ;;  %v2393_v12 = vrot.slane %v7456_v52, 1  ;;  %v2387_v13 = vrot.slane %v7393_v24, 1 }
  0xe3   :  { %v2051_v28 = vperm.slane %v1716_v19, 0  ;;  %v708_v29 = vrot.slane %v558_v22, 2  ;;  %v709_v47 = vrot.slane %v558_v22, 4  ;;  %v710_v30 = vrot.slane %v558_v22, 6 }
  0xe4   :  { %v1079_v31 = vmax.f32 %v556_v9, %v558_v22  ;;  %v2052_v36 = vperm.slane %v1717_v20, 0  ;;  %v2053_v50 = vperm.slane %v1718_v35, 0  ;;  %v2394_v20 = vrot.slane %v7458_v53, 1  ;;  %v6787_v53 = vld [vmem:[%s9740_s0 + $0xc8] sm:$0xff] }
  0xe5   :  { %v2183_v38 = vsel %vm2162_vm5, %v2051_v28, %v2050_v27  ;;  %v1080_v39 = vmax.f32 %v702_v21, %v708_v29  ;;  %v1081_v40 = vmax.f32 %v703_v23, %v709_v47  ;;  %v1082_v41 = vmax.f32 %v704_v26, %v710_v30 }
  0xe6   :  { %v417_v42 = vpop.f32.mrf.mxu0  ;;  %v5965_v43 = vrot.slane %v1079_v31, 9  ;;  %v2184_v48 = vsel %vm2164_vm6, %v2052_v36, %v2183_v38  ;;  %v2390_v35 = vrot.slane %v7405_v32, 1  ;;  %v2389_v56 = vsel %vm2386_vm13, %v2387_v13, %v2388_v8 }
  0xe7   :  { %v5966_v44 = vrot.slane %v1080_v39, 9  ;;  %v5967_v45 = vrot.slane %v1081_v40, 9  ;;  %v5968_v46 = vrot.slane %v1082_v41, 9  ;;  %v2185_v58 = vsel %vm2166_vm7, %v2053_v50, %v2184_v48 }
  0xe8   :  { %v1719_v49 = vmax.f32 %v1079_v31, %v5965_v43  ;;  %v418_v3 = vadd.f32 %v7298_v18, %v417_v42  ;;  %v7531_v31 = vsel %vm2386_vm13, %v2393_v12, %v2394_v20 }
  0xe9   :  { %5927 = vmatmul.msk.bf16.gmra.mxu0 %vm274_vm2, %v6776_v37  ;;  %v1720_v51 = vmax.f32 %v1080_v39, %v5966_v44  ;;  %v1721_v54 = vmax.f32 %v1081_v40, %v5967_v45  ;;  %v1722_v55 = vmax.f32 %v1082_v41, %v5968_v46 }
  0xea   :  { %v2054_v57 = vperm.slane %v1719_v49, 0  ;;  %v559_v6 = vmax.f32 %v418_v3, 0.0 }
  0xeb   :  { %v2055_v59 = vperm.slane %v1720_v51, 0  ;;  %v2056_v60 = vperm.slane %v1721_v54, 0  ;;  %v2057_v62 = vperm.slane %v1722_v55, 0  ;;  %5938 = vmatmul.msk.bf16.gmra.mxu1 %vm274_vm2, %v6787_v53 }
  0xec   :  { %v2186_v61 = vsel %vm2168_vm8, %v2054_v57, %v2185_v58  ;;  %v711_v14 = vrot.slane %v559_v6, 2  ;;  %v712_v15 = vrot.slane %v559_v6, 4  ;;  %v713_v23 = vrot.slane %v559_v6, 6 }
  0xed   :  { %v2187_v63 = vsel %vm2170_vm9, %v2055_v59, %v2186_v61  ;;  %v7552_v57 = vsel %vm2386_vm13, %v2390_v35, %v2391_v10 }
  0xee   :  { %v419_v0 = vpop.f32.mrf.mxu0  ;;  %v2188_v1 = vsel %vm2172_vm10, %v2056_v60, %v2187_v63  ;;  %v6937_v5 = vpack.i.bf16 %v7552_v57, %v2389_v56 }
  0xef   :  { %v2189_v2 = vsel %vm2174_vm11, %v2057_v62, %v2188_v1  ;;  %v420_v26 = vadd.f32 %v7298_v18, %v419_v0 }
  0xf0   :  { %2300 = vst.msk [vmem:[#allocation2 + $0x31] sm:$0xff] %vm1864_vm3, %v2189_v2 }
  0xf1   :  { %v560_v40 = vmax.f32 %v420_v26, 0.0 }
  0xf3   :  { %v714_v54 = vrot.slane %v560_v40, 2  ;;  %v715_v58 = vrot.slane %v560_v40, 4  ;;  %v716_v59 = vrot.slane %v560_v40, 6 }
  0xf6   :  { %v422_v9 = vpop.f32.mrf.mxu0 }
  0xf7   :  { %v423_v11 = vadd.f32 %v7298_v18, %v422_v9  ;;  %v7514_v16 = vld [vmem:[#allocation2 + $0x30] sm:$0xff]  ;;  %v2321_v19 = vld [vmem:[#allocation2 + $0x38] sm:$0x3] }
  0xf8   :  { %v6927_v21 = vpack.i.bf16 %v7514_v16, %v7456_v52  ;;  %v2493_v33 = vrot.slane %v7514_v16, 2  ;;  %v2494_v22 = vrot.slane %v2321_v19, 2  ;;  %v2396_v24 = vrot.slane %v7514_v16, 1 }
  0xf9   :  { %v561_v25 = vmax.f32 %v423_v11, 0.0  ;;  %5928 = vmatmul.msk.bf16.gmra.mxu0 %vm274_vm2, %v6777_v7  ;;  %v2397_v27 = vrot.slane %v2321_v19, 1  ;;  %v6792_v7 = vld [vmem:[%s9740_s0 + $0xf0] sm:$0xff] }
  0xfa   :  { %6928 = vrot.lane.b32.xlu0 %v6927_v21, %s7183_s28  ;;  %v7528_v52 = vsel %vm2483_vm12, %v2493_v33, %v2494_v22  ;;  %5943 = vmatmul.msk.bf16.gmra.mxu2 %vm274_vm2, %v6792_v7 }
  0xfb   :  { %v717_v28 = vrot.slane %v561_v25, 2  ;;  %v718_v29 = vrot.slane %v561_v25, 4  ;;  %v719_v47 = vrot.slane %v561_v25, 6  ;;  %v1083_v30 = vmax.f32 %v559_v6, %v561_v25  ;;  %v6778_v6 = vld [vmem:[%s9740_s0 + $0x80] sm:$0xff] }
  0xfc   :  { %v7534_v34 = vsel %vm2386_vm13, %v2396_v24, %v2397_v27  ;;  %v2936_v41 = vpack.c.bf16 %v7528_v52, %v7474_v4  ;;  %v6967_v44 = vpack.i.bf16 %v7528_v52, %v7474_v4  ;;  %v6782_v4 = vld [vmem:[%s9740_s0 + $0xa0] sm:$0xff] }
  0xfd   :  { %v1084_v36 = vmax.f32 %v711_v14, %v717_v28  ;;  %v1085_v37 = vmax.f32 %v712_v15, %v718_v29  ;;  %v1086_v38 = vmax.f32 %v713_v23, %v719_v47  ;;  %v5969_v39 = vrot.slane %v1083_v30, 9 }
  0xfe   :  { %v7542_v42 = vpack.i.bf16 %v7534_v34, %v7531_v31  ;;  %v424_v43 = vpop.f32.mrf.mxu0  ;;  %6145 = vmatmul.msk.bf16.vlgmr.msra.gmra.mxu3 %vm1864_vm3, %v2936_v41 }
  0xff   :  { %v5970_v45 = vrot.slane %v1084_v36, 9  ;;  %v5971_v32 = vrot.slane %v1085_v37, 9  ;;  %v1723_v46 = vmax.f32 %v1083_v30, %v5969_v39  ;;  %v425_v48 = vadd.f32 %v7298_v18, %v424_v43  ;;  %v6779_v39 = vld [vmem:[%s9740_s0 + $0x88] sm:$0xff] }
 0x100   :  { %6933 = vrot.lane.b32.xlu1 %v7542_v42, %s7184_s24  ;;  %v5972_v49 = vrot.slane %v1086_v38, 9 }
 0x101   :  { %v1724_v50 = vmax.f32 %v1084_v36, %v5970_v45  ;;  %v1725_v51 = vmax.f32 %v1085_v37, %v5971_v32  ;;  %v562_v55 = vmax.f32 %v425_v48, 0.0  ;;  %v2058_v60 = vperm.slane %v1723_v46, 0 }
 0x102   :  { %v1726_v2 = vmax.f32 %v1086_v38, %v5972_v49  ;;  %v6793_v38 = vld [vmem:[%s9740_s0 + $0xf8] sm:$0xff] }
 0x103   :  { %v2059_v61 = vperm.slane %v1724_v50, 0  ;;  %v720_v62 = vrot.slane %v562_v55, 2  ;;  %v721_v63 = vrot.slane %v562_v55, 4  ;;  %v722_v0 = vrot.slane %v562_v55, 6 }
 0x104   :  { %v1087_v1 = vmax.f32 %v560_v40, %v562_v55  ;;  %v2060_v3 = vperm.slane %v1725_v51, 0  ;;  %v2061_v21 = vperm.slane %v1726_v2, 0 }
 0x105   :  { %v2190_v8 = vsel %vm2162_vm5, %v2059_v61, %v2058_v60  ;;  %v1088_v9 = vmax.f32 %v714_v54, %v720_v62  ;;  %v1089_v10 = vmax.f32 %v715_v58, %v721_v63  ;;  %v1090_v11 = vmax.f32 %v716_v59, %v722_v0 }
 0x106   :  { %v427_v12 = vpop.f32.mrf.mxu0  ;;  %v5973_v13 = vrot.slane %v1087_v1, 9  ;;  %v2191_v20 = vsel %vm2164_vm6, %v2060_v3, %v2190_v8 }
 0x107   :  { %v5974_v14 = vrot.slane %v1088_v9, 9  ;;  %v5975_v15 = vrot.slane %v1089_v10, 9  ;;  %v5976_v19 = vrot.slane %v1090_v11, 9  ;;  %v2192_v24 = vsel %vm2166_vm7, %v2061_v21, %v2191_v20 }
 0x108   :  { %6938 = vrot.lane.b32.xlu1 %v6937_v5, %s7185_s26  ;;  %v1727_v25 = vmax.f32 %v1087_v1, %v5973_v13  ;;  %v428_v37 = vadd.f32 %v7298_v18, %v427_v12 }
 0x109   :  { %5929 = vmatmul.msk.bf16.gmra.mxu0 %vm274_vm2, %v6778_v6  ;;  %v1728_v33 = vmax.f32 %v1088_v9, %v5974_v14  ;;  %v1729_v22 = vmax.f32 %v1089_v10, %v5975_v15  ;;  %v1730_v23 = vmax.f32 %v1090_v11, %v5976_v19 }
 0x10a   :  { %v2062_v26 = vperm.slane %v1727_v25, 0  ;;  %v563_v40 = vmax.f32 %v428_v37, 0.0  ;;  %5944 = vmatmul.msk.bf16.gmra.mxu2 %vm274_vm2, %v6793_v38 }
 0x10b   :  { %v2063_v27 = vperm.slane %v1728_v33, 0  ;;  %v2064_v28 = vperm.slane %v1729_v22, 0  ;;  %v2065_v47 = vperm.slane %v1730_v23, 0 }
 0x10c   :  { %v2193_v29 = vsel %vm2168_vm8, %v2062_v26, %v2192_v24  ;;  %v723_v50 = vrot.slane %v563_v40, 2  ;;  %v724_v51 = vrot.slane %v563_v40, 4  ;;  %v725_v54 = vrot.slane %v563_v40, 6 }
 0x10d   :  { %v2194_v30 = vsel %vm2170_vm9, %v2063_v27, %v2193_v29  ;;  %v6780_v27 = vld [vmem:[%s9740_s0 + $0x90] sm:$0xff] }
 0x10e   :  { %v429_v53 = vpop.f32.mrf.mxu0  ;;  %v2195_v35 = vsel %vm2172_vm10, %v2064_v28, %v2194_v30 }
 0x10f   :  { %v2196_v36 = vsel %vm2174_vm11, %v2065_v47, %v2195_v35  ;;  %v430_v55 = vadd.f32 %v7298_v18, %v429_v53 }
 0x110   :  { %2301 = vst.msk [vmem:[#allocation2 + $0x41] sm:$0xff] %vm1864_vm3, %v2196_v36 }
 0x111   :  { %v564_v2 = vmax.f32 %v430_v55, 0.0 }
 0x113   :  { %v726_v13 = vrot.slane %v564_v2, 2  ;;  %v727_v15 = vrot.slane %v564_v2, 4  ;;  %v728_v19 = vrot.slane %v564_v2, 6 }
 0x116   :  { %v432_v41 = vpop.f32.mrf.mxu0 }
 0x117   :  { %v433_v43 = vadd.f32 %v7298_v18, %v432_v41  ;;  %v7581_v45 = vld [vmem:[#allocation2 + $0x40] sm:$0xff]  ;;  %v7583_v32 = vld [vmem:[#allocation2 + $0x48] sm:$0x3] }
 0x118   :  { %v2496_v48 = vrot.slane %v7581_v45, 2  ;;  %v2497_v49 = vrot.slane %v7583_v32, 2 }
 0x119   :  { %v565_v46 = vmax.f32 %v433_v43, 0.0  ;;  %5930 = vmatmul.msk.bf16.gmra.mxu0 %vm274_vm2, %v6779_v39 }
 0x11a   :  { %v7590_v61 = vsel %vm2483_vm12, %v2496_v48, %v2497_v49 }
 0x11b   :  { %v729_v56 = vrot.slane %v565_v46, 2  ;;  %v730_v58 = vrot.slane %v565_v46, 4  ;;  %v731_v59 = vrot.slane %v565_v46, 6  ;;  %v1091_v60 = vmax.f32 %v563_v40, %v565_v46 }
 0x11c   :  { %v6952_v3 = vpack.i.bf16 %v7590_v61, %v7528_v52 }
 0x11d   :  { %v1092_v62 = vmax.f32 %v723_v50, %v729_v56  ;;  %v1093_v63 = vmax.f32 %v724_v51, %v730_v58  ;;  %v1094_v0 = vmax.f32 %v725_v54, %v731_v59  ;;  %v5977_v1 = vrot.slane %v1091_v60, 9 }
 0x11e   :  { %v434_v5 = vpop.f32.mrf.mxu0  ;;  %6953 = vrot.lane.b32.xlu0 %v6952_v3, %s7185_s26  ;;  %v2399_v3 = vrot.slane %v7581_v45, 1 }
 0x11f   :  { %v5978_v6 = vrot.slane %v1092_v62, 9  ;;  %v5979_v7 = vrot.slane %v1093_v63, 9  ;;  %v1731_v8 = vmax.f32 %v1091_v60, %v5977_v1  ;;  %v435_v9 = vadd.f32 %v7298_v18, %v434_v5 }
 0x120   :  { %v5980_v10 = vrot.slane %v1094_v0, 9  ;;  %v2400_v5 = vrot.slane %v7583_v32, 1 }
 0x121   :  { %v1732_v11 = vmax.f32 %v1092_v62, %v5978_v6  ;;  %v1733_v12 = vmax.f32 %v1093_v63, %v5979_v7  ;;  %v566_v14 = vmax.f32 %v435_v9, 0.0  ;;  %v2066_v20 = vperm.slane %v1731_v8, 0 }
 0x122   :  { %v1734_v26 = vmax.f32 %v1094_v0, %v5980_v10  ;;  %v6781_v0 = vld [vmem:[%s9740_s0 + $0x98] sm:$0xff] }
 0x123   :  { %v2067_v25 = vperm.slane %v1732_v11, 0  ;;  %v732_v21 = vrot.slane %v566_v14, 2  ;;  %v733_v33 = vrot.slane %v566_v14, 4  ;;  %v734_v22 = vrot.slane %v566_v14, 6  ;;  %v6810_v10 = vld [vmem:[%s9741_s3 + $0x78] sm:$0xff] }
 0x124   :  { %v1095_v23 = vmax.f32 %v564_v2, %v566_v14  ;;  %v2068_v24 = vperm.slane %v1733_v12, 0  ;;  %v2069_v41 = vperm.slane %v1734_v26, 0  ;;  %3142 = vmatpush.bf16.msrb.mxu2 %v6810_v10 }
 0x125   :  { %v2197_v28 = vsel %vm2162_vm5, %v2067_v25, %v2066_v20  ;;  %v1096_v29 = vmax.f32 %v726_v13, %v732_v21  ;;  %v1097_v47 = vmax.f32 %v727_v15, %v733_v33  ;;  %v1098_v30 = vmax.f32 %v728_v19, %v734_v22  ;;  %v7628_v25 = vpop.f32.mrf.mxu1 }
 0x126   :  { %v437_v53 = vpop.f32.mrf.mxu0  ;;  %v5981_v35 = vrot.slane %v1095_v23, 9  ;;  %6958 = vrot.lane.b32.xlu0 %v7542_v42, %s7185_s26  ;;  %v2198_v39 = vsel %vm2164_vm6, %v2068_v24, %v2197_v28  ;;  %v7635_v24 = vsel %vm2386_vm13, %v2399_v3, %v2400_v5  ;;  %v6807_v3 = vld [vmem:[%s9741_s3 + $0x60] sm:$0xff] }
 0x127   :  { %v5982_v36 = vrot.slane %v1096_v29, 9  ;;  %v5983_v37 = vrot.slane %v1097_v47, 9  ;;  %v5984_v38 = vrot.slane %v1098_v30, 9  ;;  %v2199_v50 = vsel %vm2166_vm7, %v2069_v41, %v2198_v39 }
 0x128   :  { %v1735_v40 = vmax.f32 %v1095_v23, %v5981_v35  ;;  %v438_v62 = vadd.f32 %v7298_v18, %v437_v53 }
 0x129   :  { %5931 = vmatmul.msk.bf16.gmra.mxu0 %vm274_vm2, %v6780_v27  ;;  %v1736_v43 = vmax.f32 %v1096_v29, %v5982_v36  ;;  %v1737_v46 = vmax.f32 %v1097_v47, %v5983_v37  ;;  %v1738_v48 = vmax.f32 %v1098_v30, %v5984_v38  ;;  %v6809_v27 = vld [vmem:[%s9741_s3 + $0x70] sm:$0xff] }
 0x12a   :  { %v2070_v49 = vperm.slane %v1735_v40, 0  ;;  %v567_v63 = vmax.f32 %v438_v62, 0.0  ;;  %3143 = vmatpush.bf16.msrb.mxu2 %v6809_v27  ;;  %v6800_v27 = vld [vmem:[%s9741_s3 + $0x28] sm:$0xff] }
 0x12b   :  { %v2071_v51 = vperm.slane %v1736_v43, 0  ;;  %v2072_v54 = vperm.slane %v1737_v46, 0  ;;  %v2073_v56 = vperm.slane %v1738_v48, 0  ;;  %v7657_v43 = vld [vmem:[%s9739_s2] ss:$0 sm:$0xff]  ;;  %v6808_v48 = vld [vmem:[%s9741_s3 + $0x68] sm:$0xff] }
 0x12c   :  { %v2200_v55 = vsel %vm2168_vm8, %v2070_v49, %v2199_v50  ;;  %v735_v6 = vrot.slane %v567_v63, 2  ;;  %v736_v7 = vrot.slane %v567_v63, 4  ;;  %v737_v15 = vrot.slane %v567_v63, 6 }
 0x12d   :  { %v2201_v58 = vsel %vm2170_vm9, %v2071_v51, %v2200_v55  ;;  %v494_v62 = vpop.f32.mrf.mxu1 }
 0x12e   :  { %v439_v42 = vpop.f32.mrf.mxu0  ;;  %v2202_v59 = vsel %vm2172_vm10, %v2072_v54, %v2201_v58  ;;  %3144 = vmatpush.bf16.msrb.mxu2 %v6808_v48 }
 0x12f   :  { %v2203_v60 = vsel %vm2174_vm11, %v2073_v56, %v2202_v59  ;;  %v440_v32 = vadd.f32 %v7298_v18, %v439_v42  ;;  %v6802_v56 = vld [vmem:[%s9741_s3 + $0x38] sm:$0xff] }
 0x130   :  { %2302 = vst.msk [vmem:[#allocation2 + $0x51] sm:$0xff] %vm1864_vm3, %v2203_v60  ;;  %3093 = vmatpush.bf16.msrb.mxu1 %v6802_v56 }
 0x131   :  { %v568_v53 = vmax.f32 %v440_v32, 0.0  ;;  %v6806_v32 = vld [vmem:[%s9741_s3 + $0x58] sm:$0xff] }
 0x132   :  { %3145 = vmatpush.bf16.msrb.mxu2 %v6807_v3 }
 0x133   :  { %v738_v54 = vrot.slane %v568_v53, 2  ;;  %v739_v58 = vrot.slane %v568_v53, 4  ;;  %v740_v42 = vrot.slane %v568_v53, 6 }
 0x136   :  { %v442_v1 = vpop.f32.mrf.mxu0  ;;  %3146 = vmatpush.bf16.msrb.mxu2 %v6806_v32 }
 0x137   :  { %v443_v2 = vadd.f32 %v7298_v18, %v442_v1  ;;  %v7617_v8 = vld [vmem:[#allocation2 + $0x50] sm:$0xff]  ;;  %v2325_v9 = vld [vmem:[#allocation2 + $0x58] sm:$0x3] }
 0x138   :  { %v6962_v12 = vpack.i.bf16 %v7617_v8, %v7581_v45  ;;  %v2499_v13 = vrot.slane %v7617_v8, 2  ;;  %v2500_v14 = vrot.slane %v2325_v9, 2  ;;  %v2402_v19 = vrot.slane %v7617_v8, 1 }
 0x139   :  { %v569_v11 = vmax.f32 %v443_v2, 0.0  ;;  %5932 = vmatmul.msk.bf16.gmra.mxu0 %vm274_vm2, %v6781_v0  ;;  %v2403_v20 = vrot.slane %v2325_v9, 1 }
 0x13a   :  { %6963 = vrot.lane.b32.xlu1 %v6962_v12, %s7183_s28  ;;  %v7632_v26 = vsel %vm2483_vm12, %v2499_v13, %v2500_v14  ;;  %v6801_v12 = vld [vmem:[%s9741_s3 + $0x30] sm:$0xff]  ;;  %v7682_v14 = vpop.permute.xlu2 %6943 }
 0x13b   :  { %v741_v21 = vrot.slane %v569_v11, 2  ;;  %v742_v33 = vrot.slane %v569_v11, 4  ;;  %v743_v22 = vrot.slane %v569_v11, 6  ;;  %v1099_v23 = vmax.f32 %v567_v63, %v569_v11  ;;  %3094 = vmatpush.bf16.msrb.mxu1 %v6801_v12 }
 0x13c   :  { %v7638_v18 = vsel %vm2386_vm13, %v2402_v19, %v2403_v20  ;;  %v2939_v35 = vpack.c.bf16 %v7632_v26, %v7590_v61  ;;  %v6997_v38 = vpack.i.bf16 %v7632_v26, %v7590_v61 }
 0x13d   :  { %v1100_v28 = vmax.f32 %v735_v6, %v741_v21  ;;  %v1101_v29 = vmax.f32 %v736_v7, %v742_v33  ;;  %v1102_v47 = vmax.f32 %v737_v15, %v743_v22  ;;  %v5985_v30 = vrot.slane %v1099_v23, 9 }
 0x13e   :  { %v7647_v36 = vpack.i.bf16 %v7638_v18, %v7635_v24  ;;  %v444_v37 = vpop.f32.mrf.mxu0  ;;  %6146 = vmatmul.msk.bf16.gmra.mxu3 %vm1864_vm3, %v2939_v35  ;;  %v6977_v7 = vpack.i.bf16 %v7581_v45, %v7514_v16 }
 0x13f   :  { %v5986_v39 = vrot.slane %v1100_v28, 9  ;;  %v5987_v40 = vrot.slane %v1101_v29, 9  ;;  %v1739_v41 = vmax.f32 %v1099_v23, %v5985_v30  ;;  %v445_v46 = vadd.f32 %v7657_v43, %v444_v37  ;;  %3095 = vmatpush.bf16.msrb.mxu1 %v6800_v27 }
 0x140   :  { %6973 = vrot.lane.b32.xlu2 %v7647_v36, %s7184_s24  ;;  %v5988_v49 = vrot.slane %v1102_v47, 9 }
 0x141   :  { %v1740_v50 = vmax.f32 %v1100_v28, %v5986_v39  ;;  %v1741_v51 = vmax.f32 %v1101_v29, %v5987_v40  ;;  %v570_v55 = vmax.f32 %v445_v46, 0.0  ;;  %v2074_v59 = vperm.slane %v1739_v41, 0  ;;  %v497_v40 = vpop.f32.mrf.mxu1 }
 0x142   :  { %6968 = vrot.lane.b32.xlu1 %v6967_v44, %s7183_s28  ;;  %v1742_v5 = vmax.f32 %v1102_v47, %v5988_v49  ;;  %v493_v39 = vadd.f32 %v7657_v43, %v7628_v25  ;;  %v517_v49 = vpop.f32.mrf.mxu2  ;;  %v6804_v25 = vld [vmem:[%s9741_s3 + $0x48] sm:$0xff] }
 0x143   :  { %v2075_v60 = vperm.slane %v1740_v50, 0  ;;  %v744_v63 = vrot.slane %v570_v55, 2  ;;  %v745_v0 = vrot.slane %v570_v55, 4  ;;  %v746_v1 = vrot.slane %v570_v55, 6  ;;  %v6799_v50 = vld [vmem:[%s9741_s3 + $0x20] sm:$0xff] }
 0x144   :  { %v1103_v2 = vmax.f32 %v568_v53, %v570_v55  ;;  %v2076_v6 = vperm.slane %v1741_v51, 0  ;;  %v2077_v21 = vperm.slane %v1742_v5, 0  ;;  %v6805_v53 = vld [vmem:[%s9741_s3 + $0x50] sm:$0xff]  ;;  %v7707_v55 = vpop.permute.xlu2 %6948  ;;  %3096 = vmatpush.bf16.msrb.mxu1 %v6799_v50 }
 0x145   :  { %v2204_v52 = vsel %vm2162_vm5, %v2075_v60, %v2074_v59  ;;  %v1104_v44 = vmax.f32 %v738_v54, %v744_v63  ;;  %v1105_v9 = vmax.f32 %v739_v58, %v745_v0  ;;  %v1106_v10 = vmax.f32 %v740_v42, %v746_v1  ;;  %3147 = vmatpush.bf16.msrb.mxu2 %v6805_v53  ;;  %v6798_v0 = vld [vmem:[%s9741_s3 + $0x18] sm:$0xff] }
 0x146   :  { %v447_v11 = vpop.f32.mrf.mxu0  ;;  %v5989_v13 = vrot.slane %v1103_v2, 9  ;;  %v2205_v19 = vsel %vm2164_vm6, %v2076_v6, %v2204_v52  ;;  %v7714_v42 = vmax.f32 %v493_v39, 0.0  ;;  %v495_v60 = vadd.f32 %v7657_v43, %v494_v62  ;;  %v6797_v52 = vld [vmem:[%s9741_s3 + $0x10] sm:$0xff] }
 0x147   :  { %v5990_v15 = vrot.slane %v1104_v44, 9  ;;  %v5991_v16 = vrot.slane %v1105_v9, 9  ;;  %v5992_v45 = vrot.slane %v1106_v10, 9  ;;  %v2206_v29 = vsel %vm2166_vm7, %v2077_v21, %v2205_v19 }
 0x148   :  { %6978 = vrot.lane.b32.xlu2 %v6977_v7, %s7184_s24  ;;  %v1743_v20 = vmax.f32 %v1103_v2, %v5989_v13  ;;  %v448_v37 = vadd.f32 %v7657_v43, %v447_v11  ;;  %v498_v63 = vadd.f32 %v7657_v43, %v497_v40  ;;  %v6946_v1 = vunpack.i.h.bf16 %v7682_v14  ;;  %3097 = vmatpush.bf16.msrb.mxu1 %v6798_v0 }
 0x149   :  { %5933 = vmatmul.msk.bf16.gmra.mxu0 %vm274_vm2, %v6782_v4  ;;  %v1744_v33 = vmax.f32 %v1104_v44, %v5990_v15  ;;  %v1745_v22 = vmax.f32 %v1105_v9, %v5991_v16  ;;  %v1746_v23 = vmax.f32 %v1106_v10, %v5992_v45  ;;  %3148 = vmatpush.bf16.msrb.mxu2 %v6804_v25  ;;  %v6945_v2 = vunpack.i.l.bf16 %v7682_v14  ;;  %v6803_v4 = vld [vmem:[%s9741_s3 + $0x40] sm:$0xff] }
 0x14a   :  { %v2078_v28 = vperm.slane %v1743_v20, 0  ;;  %v571_v58 = vmax.f32 %v448_v37, 0.0  ;;  %v518_v62 = vadd.f32 %v7657_v43, %v517_v49  ;;  %v7736_v16 = vmax.f32 %v495_v60, 0.0 }
 0x14b   :  { %v2079_v47 = vperm.slane %v1744_v33, 0  ;;  %v2080_v30 = vperm.slane %v1745_v22, 0  ;;  %v2081_v41 = vperm.slane %v1746_v23, 0  ;;  %v7738_v45 = vmax.f32 %v498_v63, 0.0  ;;  %v499_v33 = vpop.f32.mrf.mxu1 }
 0x14c   :  { %v2207_v35 = vsel %vm2168_vm8, %v2078_v28, %v2206_v29  ;;  %v747_v44 = vrot.slane %v571_v58, 2  ;;  %v748_v9 = vrot.slane %v571_v58, 4  ;;  %v749_v10 = vrot.slane %v571_v58, 6  ;;  %3098 = vmatpush.bf16.msrb.mxu1 %v6797_v52 }
 0x14d   :  { %v2208_v46 = vsel %vm2170_vm9, %v2079_v47, %v2207_v35  ;;  %3149 = vmatpush.bf16.msrb.mxu2 %v6803_v4  ;;  %v7753_v29 = vmax.f32 %v518_v62, 0.0  ;;  %v500_v47 = vadd.f32 %v7657_v43, %v499_v33  ;;  %v809_v25 = vrot.slane %v7738_v45, 6 }
 0x14e   :  { %v449_v48 = vpop.f32.mrf.mxu0  ;;  %v2209_v51 = vsel %vm2172_vm10, %v2080_v30, %v2208_v46  ;;  %v519_v30 = vpop.f32.mrf.mxu2  ;;  %v807_v46 = vrot.slane %v7738_v45, 2  ;;  %vm3709_vm2 = vcmask 257024  }
 0x14f   :  { %v450_v54 = vadd.f32 %v7657_v43, %v449_v48  ;;  %v2210_v56 = vsel %vm2174_vm11, %v2081_v41, %v2209_v51  ;;  %v520_v39 = vadd.f32 %v7657_v43, %v519_v30  ;;  %v831_v4 = vrot.slane %v7753_v29, 2 }
 0x150   :  { %2303 = vst.msk [vmem:[#allocation2 + $0x61] sm:$0xff] %vm1864_vm3, %v2210_v56  ;;  %v6924_v59 = vpop.permute.xlu0 %6923  ;;  %v808_v56 = vrot.slane %v7738_v45, 4  ;;  %v833_v33 = vrot.slane %v7753_v29, 6 }
 0x151   :  { %v7724_v5 = vmax.f32 %v450_v54, 0.0  ;;  %v6926_v7 = vunpack.i.h.bf16 %v6924_v59  ;;  %v6925_v12 = vunpack.i.l.bf16 %v6924_v59  ;;  %v7771_v59 = vmax.f32 %v500_v47, 0.0 }
 0x152   :  { %v7777_v52 = vmax.f32 %v520_v39, 0.0 }
 0x153   :  { %v750_v32 = vrot.slane %v7724_v5, 2  ;;  %v751_v19 = vrot.slane %v7724_v5, 4  ;;  %v752_v22 = vrot.slane %v7724_v5, 6  ;;  %v7747_v23 = vsel %vm1864_vm3, %v7531_v31, %v6926_v7 }
 0x154   :  { %v7761_v31 = vsel %vm1864_vm3, %v7552_v57, %v6925_v12  ;;  %v6796_v12 = vld [vmem:[%s9741_s3 + $0x8] sm:$0xff] }
 0x155   :  { %3099 = vmatpush.bf16.msrb.mxu1 %v6796_v12 }
 0x156   :  { %v452_v13 = vpop.f32.mrf.mxu0 }
 0x157   :  { %v453_v20 = vadd.f32 %v7657_v43, %v452_v13  ;;  %v7749_v27 = vld [vmem:[#allocation2 + $0x60] sm:$0xff]  ;;  %v7751_v28 = vld [vmem:[#allocation2 + $0x68] sm:$0x3] }
 0x158   :  { %v2502_v35 = vrot.slane %v7749_v27, 2  ;;  %v2503_v37 = vrot.slane %v7751_v28, 2  ;;  %v2405_v47 = vrot.slane %v7749_v27, 1  ;;  %v2406_v30 = vrot.slane %v7751_v28, 1 }
 0x159   :  { %v573_v53 = vmax.f32 %v453_v20, 0.0  ;;  %v7007_v39 = vpack.i.bf16 %v7749_v27, %v7617_v8 }
 0x15a   :  { %v7767_v54 = vsel %vm2483_vm12, %v2502_v35, %v2503_v37  ;;  %v810_v37 = vrot.slane %v7771_v59, 2  ;;  %v7801_v40 = vsel %vm2386_vm13, %v2405_v47, %v2406_v30  ;;  %v522_v30 = vpop.f32.mrf.mxu2 }
 0x15b   :  { %v753_v48 = vrot.slane %v573_v53, 2  ;;  %v754_v49 = vrot.slane %v573_v53, 4  ;;  %v755_v50 = vrot.slane %v573_v53, 6  ;;  %v1107_v51 = vmax.f32 %v571_v58, %v573_v53 }
 0x15c   :  { %v6982_v7 = vpack.i.bf16 %v7767_v54, %v7632_v26  ;;  %v832_v58 = vrot.slane %v7753_v29, 4 }
 0x15d   :  { %v1108_v57 = vmax.f32 %v747_v44, %v753_v48  ;;  %v1109_v60 = vmax.f32 %v748_v9, %v754_v49  ;;  %v1110_v63 = vmax.f32 %v749_v10, %v755_v50  ;;  %v5993_v0 = vrot.slane %v1107_v51, 9 }
 0x15e   :  { %v454_v62 = vpop.f32.mrf.mxu0  ;;  %6983 = vrot.lane.b32.xlu0 %v6982_v7, %s7185_s26  ;;  %v811_v49 = vrot.slane %v7771_v59, 4  ;;  %v812_v50 = vrot.slane %v7771_v59, 6 }
 0x15f   :  { %v5994_v13 = vrot.slane %v1108_v57, 9  ;;  %v5995_v20 = vrot.slane %v1109_v60, 9  ;;  %v5996_v44 = vrot.slane %v1110_v63, 9  ;;  %v1747_v9 = vmax.f32 %v1107_v51, %v5993_v0  ;;  %v6795_v0 = vld [vmem:[%s9741_s3] sm:$0xff] }
 0x160   :  { %v455_v10 = vadd.f32 %v7657_v43, %v454_v62  ;;  %3100 = vmatpush.bf16.msrb.mxu1 %v6795_v0 }
 0x161   :  { %v1748_v53 = vmax.f32 %v1108_v57, %v5994_v13  ;;  %v1749_v35 = vmax.f32 %v1109_v60, %v5995_v20  ;;  %v1750_v7 = vmax.f32 %v1110_v63, %v5996_v44  ;;  %v2082_v28 = vperm.slane %v1747_v9, 0 }
 0x162   :  { %v574_v48 = vmax.f32 %v455_v10, 0.0 }
 0x163   :  { %v2083_v57 = vperm.slane %v1748_v53, 0  ;;  %v2084_v60 = vperm.slane %v1749_v35, 0  ;;  %v2085_v0 = vperm.slane %v1750_v7, 0 }
 0x164   :  { %v756_v62 = vrot.slane %v574_v48, 2  ;;  %v757_v12 = vrot.slane %v574_v48, 4  ;;  %v758_v13 = vrot.slane %v574_v48, 6  ;;  %v1111_v20 = vmax.f32 %v7724_v5, %v574_v48  ;;  %v502_v48 = vpop.f32.mrf.mxu1 }
 0x165   :  { %v2211_v10 = vsel %vm2162_vm5, %v2083_v57, %v2082_v28  ;;  %v503_v47 = vadd.f32 %v7657_v43, %v502_v48 }
 0x166   :  { %v2212_v63 = vsel %vm2164_vm6, %v2084_v60, %v2211_v10  ;;  %v1112_v44 = vmax.f32 %v750_v32, %v756_v62  ;;  %v1113_v9 = vmax.f32 %v751_v19, %v757_v12  ;;  %v1114_v53 = vmax.f32 %v752_v22, %v758_v13  ;;  %v457_v35 = vpop.f32.mrf.mxu0  ;;  %6988 = vrot.lane.b32.xlu0 %v7647_v36, %s7185_s26 }
 0x167   :  { %v5997_v28 = vrot.slane %v1111_v20, 9  ;;  %v458_v57 = vadd.f32 %v7657_v43, %v457_v35  ;;  %v523_v32 = vadd.f32 %v7657_v43, %v522_v30  ;;  %v2213_v5 = vsel %vm2166_vm7, %v2085_v0, %v2212_v63 }
 0x168   :  { %v5998_v21 = vrot.slane %v1112_v44, 9  ;;  %v5999_v60 = vrot.slane %v1113_v9, 9  ;;  %v6000_v10 = vrot.slane %v1114_v53, 9  ;;  %v593_v7 = vmax.f32 %v503_v47, 0.0 }
 0x169   :  { %v1751_v19 = vmax.f32 %v1111_v20, %v5997_v28  ;;  %v7816_v22 = vmax.f32 %v458_v57, 0.0  ;;  %v601_v35 = vmax.f32 %v523_v32, 0.0 }
 0x16a   :  { %v1752_v62 = vmax.f32 %v1112_v44, %v5998_v21  ;;  %v1753_v12 = vmax.f32 %v1113_v9, %v5999_v60  ;;  %v1754_v13 = vmax.f32 %v1114_v53, %v6000_v10  ;;  %v813_v63 = vrot.slane %v593_v7, 2 }
 0x16b   :  { %v2086_v48 = vperm.slane %v1751_v19, 0  ;;  %v759_v15 = vrot.slane %v7816_v22, 2  ;;  %v760_v11 = vrot.slane %v7816_v22, 4  ;;  %v761_v36 = vrot.slane %v7816_v22, 6 }
 0x16c   :  { %v2087_v41 = vperm.slane %v1752_v62, 0  ;;  %v2088_v30 = vperm.slane %v1753_v12, 0  ;;  %v2089_v17 = vperm.slane %v1754_v13, 0  ;;  %v6929_v0 = vpop.permute.xlu0 %6928  ;;  %v814_v28 = vrot.slane %v593_v7, 4 }
 0x16d   :  { %v2214_v20 = vsel %vm2168_vm8, %v2086_v48, %v2213_v5  ;;  %v815_v21 = vrot.slane %v593_v7, 6  ;;  %v1147_v44 = vmax.f32 %v7738_v45, %v593_v7  ;;  %v6931_v53 = vunpack.i.h.bf16 %v6929_v0 }
 0x16e   :  { %v2215_v9 = vsel %vm2170_vm9, %v2087_v41, %v2214_v20  ;;  %v6930_v57 = vunpack.i.l.bf16 %v6929_v0  ;;  %v459_v47 = vpop.f32.mrf.mxu0  ;;  %v1148_v60 = vmax.f32 %v807_v46, %v813_v63  ;;  %v1149_v5 = vmax.f32 %v808_v56, %v814_v28 }
 0x16f   :  { %v2216_v10 = vsel %vm2172_vm10, %v2088_v30, %v2215_v9  ;;  %v460_v32 = vadd.f32 %v7657_v43, %v459_v47  ;;  %v1150_v19 = vmax.f32 %v809_v25, %v815_v21  ;;  %v2903_v62 = vsel %vm2852_vm14, %v7747_v23, %v6931_v53 }
 0x170   :  { %v2217_v7 = vsel %vm2174_vm11, %v2089_v17, %v2216_v10  ;;  %v2902_v41 = vsel %vm2852_vm14, %v7761_v31, %v6930_v57  ;;  %v6033_v12 = vrot.slane %v1147_v44, 9  ;;  %v6034_v13 = vrot.slane %v1148_v60, 9 }
 0x171   :  { %2304 = vst.msk [vmem:[#allocation2 + $0x71] sm:$0xff] %vm1864_vm3, %v2217_v7  ;;  %v7838_v46 = vmax.f32 %v460_v32, 0.0  ;;  %v6035_v48 = vrot.slane %v1149_v5, 9  ;;  %v6036_v30 = vrot.slane %v1150_v19, 9  ;;  %v837_v45 = vrot.slane %v601_v35, 2 }
 0x172   :  { %v6934_v56 = vpop.permute.xlu1 %6933  ;;  %v1787_v63 = vmax.f32 %v1147_v44, %v6033_v12  ;;  %v838_v25 = vrot.slane %v601_v35, 4  ;;  %v839_v20 = vrot.slane %v601_v35, 6  ;;  %v1788_v21 = vmax.f32 %v1148_v60, %v6034_v13 }
 0x173   :  { %v762_v17 = vrot.slane %v7838_v46, 2  ;;  %v763_v31 = vrot.slane %v7838_v46, 4  ;;  %v764_v0 = vrot.slane %v7838_v46, 6  ;;  %v6936_v23 = vunpack.i.h.bf16 %v6934_v56 }
 0x174   :  { %v6935_v28 = vunpack.i.l.bf16 %v6934_v56  ;;  %v1789_v9 = vmax.f32 %v1149_v5, %v6035_v48  ;;  %v1790_v53 = vmax.f32 %v1150_v19, %v6036_v30  ;;  %v2122_v47 = vperm.slane %v1787_v63, 0  ;;  %v504_v19 = vpop.f32.mrf.mxu1 }
 0x175   :  { %v2919_v57 = vsel %vm2869_vm15, %v2903_v62, %v6936_v23  ;;  %v1163_v10 = vmax.f32 %v7753_v29, %v601_v35  ;;  %v1164_v44 = vmax.f32 %v831_v4, %v837_v45  ;;  %v2123_v12 = vperm.slane %v1788_v21, 0 }
 0x176   :  { %v2918_v32 = vsel %vm2869_vm15, %v2902_v41, %v6935_v28  ;;  %v462_v7 = vpop.f32.mrf.mxu0  ;;  %v2124_v51 = vperm.slane %v1789_v9, 0  ;;  %v2125_v3 = vperm.slane %v1790_v53, 0  ;;  %v1165_v60 = vmax.f32 %v832_v58, %v838_v25 }
 0x177   :  { %v2935_v6 = vpack.c.bf16 %v2919_v57, %v2918_v32  ;;  %v463_v56 = vadd.f32 %v7657_v43, %v462_v7  ;;  %v1166_v5 = vmax.f32 %v833_v33, %v839_v20  ;;  %v2246_v35 = vsel %vm2162_vm5, %v2123_v12, %v2122_v47 }
 0x178   :  { %v6049_v62 = vrot.slane %v1163_v10, 9  ;;  %v6050_v4 = vrot.slane %v1164_v44, 9  ;;  %v7854_v13 = vld [vmem:[#allocation2 + $0x70] sm:$0xff]  ;;  %v505_v41 = vadd.f32 %v7657_v43, %v504_v19  ;;  %v2247_v30 = vsel %vm2164_vm6, %v2124_v51, %v2246_v35 }
 0x179   :  { %3150 = vmatmul.bf16.vlgmr.msrb.gmra.mxu2 %v2935_v6  ;;  %v577_v48 = vmax.f32 %v463_v56, 0.0  ;;  %v6051_v63 = vrot.slane %v1165_v60, 9  ;;  %v6052_v45 = vrot.slane %v1166_v5, 9  ;;  %v7859_v58 = vsel %vm2166_vm7, %v2125_v3, %v2247_v30 }
 0x17a   :  { %v1803_v29 = vmax.f32 %v1163_v10, %v6049_v62  ;;  %v1804_v33 = vmax.f32 %v1164_v44, %v6050_v4  ;;  %v6992_v25 = vpack.i.bf16 %v7854_v13, %v7749_v27  ;;  %v6939_v9 = vpop.permute.xlu1 %6938  ;;  %v2329_v4 = vld [vmem:[#allocation2 + $0x78] sm:$0x3] }
 0x17b   :  { %v765_v20 = vrot.slane %v577_v48, 2  ;;  %v766_v23 = vrot.slane %v577_v48, 4  ;;  %v767_v28 = vrot.slane %v577_v48, 6  ;;  %v1115_v21 = vmax.f32 %v7816_v22, %v577_v48  ;;  %v7171_v48 = vld [vmem:[#allocation2 + $0x10] sm:$0xff] }
 0x17c   :  { %v1805_v6 = vmax.f32 %v1165_v60, %v6051_v63  ;;  %v1806_v53 = vmax.f32 %v1166_v5, %v6052_v45  ;;  %v2138_v57 = vperm.slane %v1803_v29, 0  ;;  %v2139_v51 = vperm.slane %v1804_v33, 0  ;;  %6993 = vrot.lane.b32.xlu1 %v6992_v25, %s7183_s28  ;;  %v524_v33 = vpop.f32.mrf.mxu2 }
 0x17d   :  { %v1116_v3 = vmax.f32 %v759_v15, %v765_v20  ;;  %v1117_v47 = vmax.f32 %v760_v11, %v766_v23  ;;  %v1118_v10 = vmax.f32 %v761_v36, %v767_v28  ;;  %v6001_v44 = vrot.slane %v1115_v21, 9  ;;  %v7172_v20 = vld [vmem:[#allocation2] sm:$0xff] }
 0x17e   :  { %v2140_v32 = vperm.slane %v1805_v6, 0  ;;  %v2141_v7 = vperm.slane %v1806_v53, 0  ;;  %v2260_v12 = vsel %vm2162_vm5, %v2139_v51, %v2138_v57  ;;  %v6941_v56 = vunpack.i.h.bf16 %v6939_v9  ;;  %v464_v60 = vpop.f32.mrf.mxu0 }
 0x17f   :  { %v6002_v5 = vrot.slane %v1116_v3, 9  ;;  %v6003_v19 = vrot.slane %v1117_v47, 9  ;;  %v6004_v35 = vrot.slane %v1118_v10, 9  ;;  %v1755_v62 = vmax.f32 %v1115_v21, %v6001_v44 }
 0x180   :  { %v2261_v15 = vsel %vm2164_vm6, %v2140_v32, %v2260_v12  ;;  %v7874_v11 = vsel %vm1864_vm3, %v7171_v48, %v6941_v56  ;;  %v6940_v22 = vunpack.i.l.bf16 %v6939_v9  ;;  %v2505_v36 = vrot.slane %v7854_v13, 2 }
 0x181   :  { %v1756_v30 = vmax.f32 %v1116_v3, %v6002_v5  ;;  %v1757_v63 = vmax.f32 %v1117_v47, %v6003_v19  ;;  %v1758_v45 = vmax.f32 %v1118_v10, %v6004_v35  ;;  %v2090_v29 = vperm.slane %v1755_v62, 0 }
 0x182   :  { %v7878_v25 = vsel %vm2166_vm7, %v2141_v7, %v2261_v15  ;;  %v2836_v23 = vsel %vm1864_vm3, %v7172_v20, %v6940_v22  ;;  %v2506_v28 = vrot.slane %v2329_v4, 2  ;;  %v2408_v21 = vrot.slane %v7854_v13, 1  ;;  %v507_v20 = vpop.f32.mrf.mxu1 }
 0x183   :  { %v2091_v6 = vperm.slane %v1756_v30, 0  ;;  %v2092_v53 = vperm.slane %v1757_v63, 0  ;;  %v2093_v57 = vperm.slane %v1758_v45, 0  ;;  %v2409_v9 = vrot.slane %v2329_v4, 1 }
 0x184   :  { %v7883_v51 = vsel %vm2483_vm12, %v2505_v36, %v2506_v28  ;;  %v465_v3 = vadd.f32 %v7657_v43, %v464_v60  ;;  %v594_v47 = vmax.f32 %v505_v41, 0.0  ;;  %v525_v10 = vadd.f32 %v7657_v43, %v524_v33  ;;  %6998 = vrot.lane.b32.xlu1 %v6997_v38, %s7183_s28 }
 0x185   :  { %v2218_v44 = vsel %vm2162_vm5, %v2091_v6, %v2090_v29  ;;  %v2942_v32 = vpack.c.bf16 %v7883_v51, %v7767_v54  ;;  %v7895_v7 = vsel %vm2386_vm13, %v2408_v21, %v2409_v9  ;;  %v2853_v12 = vsel %vm2852_vm14, %v2836_v23, %v6945_v2 }
 0x186   :  { %v2219_v41 = vsel %vm2164_vm6, %v2092_v53, %v2218_v44  ;;  %v7903_v56 = vpack.i.bf16 %v7895_v7, %v7801_v40  ;;  %v578_v61 = vmax.f32 %v465_v3, 0.0  ;;  %v816_v26 = vrot.slane %v594_v47, 2  ;;  %v467_v15 = vpop.f32.mrf.mxu0 }
 0x187   :  { %v2220_v38 = vsel %vm2166_vm7, %v2093_v57, %v2219_v41  ;;  %6147 = vmatmul.msk.bf16.gmra.mxu3 %vm1864_vm3, %v2942_v32  ;;  %v817_v60 = vrot.slane %v594_v47, 4  ;;  %v818_v5 = vrot.slane %v594_v47, 6  ;;  %v1151_v19 = vmax.f32 %v7771_v59, %v594_v47 }
 0x188   :  { %7003 = vrot.lane.b32.xlu2 %v7903_v56, %s7184_s24  ;;  %v768_v2 = vrot.slane %v578_v61, 2  ;;  %v769_v35 = vrot.slane %v578_v61, 4  ;;  %v770_v62 = vrot.slane %v578_v61, 6  ;;  %v1119_v4 = vmax.f32 %v7838_v46, %v578_v61 }
 0x189   :  { %v1152_v48 = vmax.f32 %v810_v37, %v816_v26  ;;  %v1153_v22 = vmax.f32 %v811_v49, %v817_v60  ;;  %v1154_v36 = vmax.f32 %v812_v50, %v818_v5  ;;  %v6037_v30 = vrot.slane %v1151_v19, 9  ;;  %v527_v49 = vpop.f32.mrf.mxu2 }
 0x18a   :  { %v1120_v63 = vmax.f32 %v762_v17, %v768_v2  ;;  %v1121_v45 = vmax.f32 %v763_v31, %v769_v35  ;;  %v1122_v29 = vmax.f32 %v764_v0, %v770_v62  ;;  %v6005_v33 = vrot.slane %v1119_v4, 9 }
 0x18b   :  { %v6038_v23 = vrot.slane %v1152_v48, 9  ;;  %v6039_v37 = vrot.slane %v1153_v22, 9  ;;  %v6040_v28 = vrot.slane %v1154_v36, 9  ;;  %v1791_v21 = vmax.f32 %v1151_v19, %v6037_v30 }
 0x18c   :  { %v6006_v6 = vrot.slane %v1120_v63, 9  ;;  %v6007_v59 = vrot.slane %v1121_v45, 9  ;;  %v6008_v50 = vrot.slane %v1122_v29, 9  ;;  %v1759_v53 = vmax.f32 %v1119_v4, %v6005_v33 }
 0x18d   :  { %v1792_v57 = vmax.f32 %v1152_v48, %v6038_v23  ;;  %v1793_v9 = vmax.f32 %v1153_v22, %v6039_v37  ;;  %v1794_v17 = vmax.f32 %v1154_v36, %v6040_v28  ;;  %v2126_v3 = vperm.slane %v1791_v21, 0 }
 0x18e   :  { %v1760_v47 = vmax.f32 %v1120_v63, %v6006_v6  ;;  %v1761_v31 = vmax.f32 %v1121_v45, %v6007_v59  ;;  %v1762_v44 = vmax.f32 %v1122_v29, %v6008_v50  ;;  %v2094_v46 = vperm.slane %v1759_v53, 0 }
 0x18f   :  { %v2127_v0 = vperm.slane %v1792_v57, 0  ;;  %v2128_v32 = vperm.slane %v1793_v9, 0  ;;  %v2129_v41 = vperm.slane %v1794_v17, 0  ;;  %v2249_v61 = vsel %vm2168_vm8, %v2126_v3, %v7859_v58 }
 0x190   :  { %v2095_v26 = vperm.slane %v1760_v47, 0  ;;  %v2096_v60 = vperm.slane %v1761_v31, 0  ;;  %v2097_v5 = vperm.slane %v1762_v44, 0  ;;  %v2221_v19 = vsel %vm2168_vm8, %v2094_v46, %v2220_v38  ;;  %7008 = vrot.lane.b32.xlu2 %v7007_v39, %s7184_s24  ;;  %v469_v39 = vpop.f32.mrf.mxu0  ;;  %v7957_v21 = vpop.permute.xlu0 %6953 }
 0x191   :  { %v2250_v2 = vsel %vm2170_vm9, %v2127_v0, %v2249_v61  ;;  %v602_v35 = vmax.f32 %v525_v10, 0.0  ;;  %v2854_v62 = vsel %vm2852_vm14, %v7874_v11, %v6946_v1  ;;  %v9752_v58 = vunpack.i.l.bf16 %v7707_v55  ;;  %v529_v28 = vpop.f32.mrf.mxu2 }
 0x192   :  { %v2222_v48 = vsel %vm2170_vm9, %v2095_v26, %v2221_v19  ;;  %v2251_v38 = vsel %vm2172_vm10, %v2128_v32, %v2250_v2  ;;  %v9753_v22 = vunpack.i.h.bf16 %v7707_v55  ;;  %v468_v27 = vadd.f32 %v7657_v43, %v467_v15  ;;  %v509_v55 = vpop.f32.mrf.mxu1 }
 0x193   :  { %v2870_v4 = vsel %vm2869_vm15, %v2853_v12, %v9752_v58  ;;  %v2223_v14 = vsel %vm2172_vm10, %v2096_v60, %v2222_v48  ;;  %v2252_v10 = vsel %vm2174_vm11, %v2129_v41, %v2251_v38  ;;  %v840_v1 = vrot.slane %v602_v35, 2 }
 0x194   :  { %v2871_v8 = vsel %vm2869_vm15, %v2854_v62, %v9753_v22  ;;  %v841_v11 = vrot.slane %v602_v35, 4  ;;  %v2224_v36 = vsel %vm2174_vm11, %v2097_v5, %v2223_v14  ;;  %2309 = vst.msk [vmem:[#allocation2 + $0xe1] sm:$0xff] %vm1864_vm3, %v2252_v10  ;;  %v842_v12 = vrot.slane %v602_v35, 6 }
 0x195   :  { %v1167_v30 = vmax.f32 %v7777_v52, %v602_v35  ;;  %v2934_v63 = vpack.c.bf16 %v2871_v8, %v2870_v4  ;;  %2305 = vst.msk [vmem:[#allocation2 + $0x81] sm:$0xff] %vm1864_vm3, %v2224_v36  ;;  %v9754_v15 = vrot.slane %v7777_v52, 2  ;;  %v9755_v29 = vrot.slane %v7777_v52, 4 }
 0x196   :  { %v7954_v23 = vmax.f32 %v468_v27, 0.0  ;;  %v508_v37 = vadd.f32 %v7657_v43, %v507_v20  ;;  %v9756_v6 = vrot.slane %v7777_v52, 6  ;;  %v528_v53 = vadd.f32 %v7657_v43, %v527_v49 }
 0x197   :  { %v1168_v45 = vmax.f32 %v9754_v15, %v840_v1  ;;  %v1169_v33 = vmax.f32 %v9755_v29, %v841_v11  ;;  %v6053_v50 = vrot.slane %v1167_v30, 9  ;;  %3101 = vmatmul.bf16.vlgmr.msrb.gmra.mxu1 %v2934_v63  ;;  %v470_v57 = vadd.f32 %v7657_v43, %v469_v39 }
 0x198   :  { %v1170_v59 = vmax.f32 %v9756_v6, %v842_v12  ;;  %v771_v3 = vrot.slane %v7954_v23, 2  ;;  %v772_v47 = vrot.slane %v7954_v23, 4  ;;  %v773_v44 = vrot.slane %v7954_v23, 6  ;;  %v472_v38 = vpop.f32.mrf.mxu0 }
 0x199   :  { %v6054_v9 = vrot.slane %v1168_v45, 9  ;;  %v6055_v17 = vrot.slane %v1169_v33, 9  ;;  %v1807_v20 = vmax.f32 %v1167_v30, %v6053_v50  ;;  %v7966_v46 = vmax.f32 %v508_v37, 0.0  ;;  %v532_v15 = vpop.f32.mrf.mxu2 }
 0x19a   :  { %v6056_v31 = vrot.slane %v1170_v59, 9  ;;  %v7968_v32 = vmax.f32 %v528_v53, 0.0  ;;  %v7970_v41 = vmax.f32 %v470_v57, 0.0  ;;  %v510_v10 = vadd.f32 %v7657_v43, %v509_v55  ;;  %v7987_v11 = vpop.permute.xlu2 %6973 }
 0x19b   :  { %v1808_v52 = vmax.f32 %v1168_v45, %v6054_v9  ;;  %v1809_v0 = vmax.f32 %v1169_v33, %v6055_v17  ;;  %v2142_v61 = vperm.slane %v1807_v20, 0  ;;  %v819_v26 = vrot.slane %v7966_v46, 2  ;;  %v7993_v45 = vpop.permute.xlu0 %6958 }
 0x19c   :  { %v1810_v49 = vmax.f32 %v1170_v59, %v6056_v31  ;;  %v820_v60 = vrot.slane %v7966_v46, 4  ;;  %v821_v2 = vrot.slane %v7966_v46, 6  ;;  %v843_v35 = vrot.slane %v7968_v32, 2 }
 0x19d   :  { %v2143_v5 = vperm.slane %v1808_v52, 0  ;;  %v2144_v19 = vperm.slane %v1809_v0, 0  ;;  %v2263_v58 = vsel %vm2168_vm8, %v2142_v61, %v7878_v25  ;;  %v844_v4 = vrot.slane %v7968_v32, 4  ;;  %v512_v25 = vpop.f32.mrf.mxu1 }
 0x19e   :  { %v2145_v62 = vperm.slane %v1810_v49, 0  ;;  %v845_v48 = vrot.slane %v7968_v32, 6  ;;  %v774_v8 = vrot.slane %v7970_v41, 2  ;;  %v775_v27 = vrot.slane %v7970_v41, 4 }
 0x19f   :  { %v2264_v22 = vsel %vm2170_vm9, %v2143_v5, %v2263_v58  ;;  %v776_v39 = vrot.slane %v7970_v41, 6  ;;  %v530_v1 = vadd.f32 %v7657_v43, %v529_v28  ;;  %v473_v30 = vadd.f32 %v7657_v43, %v472_v38 }
 0x1a0   :  { %v2265_v14 = vsel %vm2172_vm10, %v2144_v19, %v2264_v22  ;;  %v513_v63 = vadd.f32 %v7657_v43, %v512_v25  ;;  %v7996_v29 = vmax.f32 %v510_v10, 0.0  ;;  %v6955_v33 = vunpack.i.l.bf16 %v7957_v21 }
 0x1a1   :  { %v2266_v36 = vsel %vm2174_vm11, %v2145_v62, %v2265_v14  ;;  %v7998_v55 = vmax.f32 %v530_v1, 0.0  ;;  %v533_v37 = vadd.f32 %v7657_v43, %v532_v15  ;;  %v581_v28 = vmax.f32 %v473_v30, 0.0 }
 0x1a2   :  { %2311 = vst.msk [vmem:[#allocation2 + $0x101] sm:$0xff] %vm1864_vm3, %v2266_v36  ;;  %v597_v6 = vmax.f32 %v513_v63, 0.0  ;;  %v822_v53 = vrot.slane %v7996_v29, 2  ;;  %v823_v57 = vrot.slane %v7996_v29, 4  ;;  %v824_v9 = vrot.slane %v7996_v29, 6 }
 0x1a3   :  { %v846_v31 = vrot.slane %v7998_v55, 2  ;;  %v847_v20 = vrot.slane %v7998_v55, 4  ;;  %v777_v52 = vrot.slane %v581_v28, 2  ;;  %v778_v43 = vrot.slane %v581_v28, 4 }
 0x1a4   :  { %v779_v0 = vrot.slane %v581_v28, 6  ;;  %v1123_v49 = vmax.f32 %v7954_v23, %v581_v28  ;;  %v825_v61 = vrot.slane %v597_v6, 2  ;;  %v826_v5 = vrot.slane %v597_v6, 4  ;;  %v8012_v23 = vpop.f32.mrf.mxu0 }
 0x1a5   :  { %v1124_v19 = vmax.f32 %v771_v3, %v777_v52  ;;  %v1125_v62 = vmax.f32 %v772_v47, %v778_v43  ;;  %v827_v58 = vrot.slane %v597_v6, 6  ;;  %v1155_v38 = vmax.f32 %v7966_v46, %v597_v6 }
 0x1a6   :  { %v1126_v22 = vmax.f32 %v773_v44, %v779_v0  ;;  %v6009_v14 = vrot.slane %v1123_v49, 9  ;;  %v1156_v10 = vmax.f32 %v819_v26, %v825_v61  ;;  %v1157_v1 = vmax.f32 %v820_v60, %v826_v5 }
 0x1a7   :  { %v6010_v25 = vrot.slane %v1124_v19, 9  ;;  %v6011_v36 = vrot.slane %v1125_v62, 9  ;;  %v1158_v30 = vmax.f32 %v821_v2, %v827_v58  ;;  %v6041_v63 = vrot.slane %v1155_v38, 9 }
 0x1a8   :  { %v6012_v15 = vrot.slane %v1126_v22, 9  ;;  %v1763_v17 = vmax.f32 %v1123_v49, %v6009_v14  ;;  %v6042_v59 = vrot.slane %v1156_v10, 9  ;;  %v6043_v50 = vrot.slane %v1157_v1, 9  ;;  %v2332_v14 = vld [vmem:[#allocation2 + $0x90] sm:$0xff] }
 0x1a9   :  { %v1764_v28 = vmax.f32 %v1124_v19, %v6010_v25  ;;  %v1765_v3 = vmax.f32 %v1125_v62, %v6011_v36  ;;  %v6044_v47 = vrot.slane %v1158_v30, 9  ;;  %v1795_v52 = vmax.f32 %v1155_v38, %v6041_v63  ;;  %v2333_v63 = vld [vmem:[#allocation2 + $0x98] sm:$0x3] }
 0x1aa   :  { %v1766_v43 = vmax.f32 %v1126_v22, %v6012_v15  ;;  %v2098_v46 = vperm.slane %v1763_v17, 0  ;;  %v1796_v44 = vmax.f32 %v1156_v10, %v6042_v59  ;;  %v1797_v6 = vmax.f32 %v1157_v1, %v6043_v50  ;;  %v8019_v10 = vld [vmem:[#allocation2 + $0x80] sm:$0xff] }
 0x1ab   :  { %v2099_v26 = vperm.slane %v1764_v28, 0  ;;  %v2100_v60 = vperm.slane %v1765_v3, 0  ;;  %v1798_v0 = vmax.f32 %v1158_v30, %v6044_v47  ;;  %v2130_v61 = vperm.slane %v1795_v52, 0  ;;  %v2331_v30 = vld [vmem:[#allocation2 + $0x88] sm:$0x3] }
 0x1ac   :  { %v848_v2 = vrot.slane %v7998_v55, 6  ;;  %v2131_v5 = vperm.slane %v1796_v44, 0  ;;  %v2132_v49 = vperm.slane %v1797_v6, 0  ;;  %v605_v58 = vmax.f32 %v533_v37, 0.0 }
 0x1ad   :  { %v2101_v12 = vperm.slane %v1766_v43, 0  ;;  %v2225_v19 = vsel %vm2162_vm5, %v2099_v26, %v2098_v46  ;;  %v2133_v62 = vperm.slane %v1798_v0, 0  ;;  %v6960_v38 = vunpack.i.l.bf16 %v7993_v45  ;;  %v534_v0 = vpop.f32.mrf.mxu2 }
 0x1ae   :  { %v2226_v17 = vsel %vm2164_vm6, %v2100_v60, %v2225_v19  ;;  %v2253_v59 = vsel %vm2162_vm5, %v2131_v5, %v2130_v61  ;;  %v849_v50 = vrot.slane %v605_v58, 2  ;;  %v850_v22 = vrot.slane %v605_v58, 4  ;;  %v8034_v61 = vpop.f32.mrf.mxu0  ;;  %v514_v19 = vpop.f32.mrf.mxu1 }
 0x1af   :  { %v8022_v1 = vsel %vm2166_vm7, %v2101_v12, %v2226_v17  ;;  %v851_v25 = vrot.slane %v605_v58, 6  ;;  %v1171_v37 = vmax.f32 %v7968_v32, %v605_v58  ;;  %v2760_v36 = vrot.slane %v2332_v14, 1 }
 0x1b0   :  { %v2254_v15 = vsel %vm2164_vm6, %v2132_v49, %v2253_v59  ;;  %v1172_v28 = vmax.f32 %v843_v35, %v849_v50  ;;  %v1173_v3 = vmax.f32 %v844_v4, %v850_v22  ;;  %v2814_v47 = vrot.slane %v2332_v14, 2 }
 0x1b1   :  { %v1174_v52 = vmax.f32 %v845_v48, %v851_v25  ;;  %v6057_v12 = vrot.slane %v1171_v37, 9  ;;  %v7012_v43 = vpack.i.bf16 %v2332_v14, %v8019_v10  ;;  %v2654_v46 = vrot.slane %v8019_v10, 2  ;;  %v8045_v25 = vpop.permute.xlu2 %6978 }
 0x1b2   :  { %v6058_v44 = vrot.slane %v1172_v28, 9  ;;  %v6059_v6 = vrot.slane %v1173_v3, 9  ;;  %v2655_v26 = vrot.slane %v2331_v30, 2  ;;  %v2815_v60 = vrot.slane %v2333_v63, 2 }
 0x1b3   :  { %v6060_v35 = vrot.slane %v1174_v52, 9  ;;  %v1811_v5 = vmax.f32 %v1171_v37, %v6057_v12  ;;  %7013 = vrot.lane.b32.xlu1 %v7012_v43, %s7183_s28  ;;  %v2632_v4 = vrot.slane %v8019_v10, 1  ;;  %v2633_v32 = vrot.slane %v2331_v30, 1 }
 0x1b4   :  { %v1812_v48 = vmax.f32 %v1172_v28, %v6058_v44  ;;  %v1813_v49 = vmax.f32 %v1173_v3, %v6059_v6  ;;  %v2656_v58 = vsel %vm2483_vm12, %v2654_v46, %v2655_v26  ;;  %v2816_v14 = vsel %vm2483_vm12, %v2814_v47, %v2815_v60  ;;  %v8055_v3 = vld [vmem:[%s9739_s2] ss:$0 sm:$0xff] }
 0x1b5   :  { %v8040_v17 = vmax.f32 %v1174_v52, %v6060_v35  ;;  %v2146_v59 = vperm.slane %v1811_v5, 0  ;;  %v2945_v50 = vpack.c.bf16 %v2816_v14, %v2656_v58  ;;  %v8043_v22 = vsel %vm2386_vm13, %v2632_v4, %v2633_v32 }
 0x1b6   :  { %v2147_v37 = vperm.slane %v1812_v48, 0  ;;  %v2148_v12 = vperm.slane %v1813_v49, 0  ;;  %v2761_v43 = vrot.slane %v2333_v63, 1  ;;  %v7017_v30 = vpack.i.bf16 %v2656_v58, %v7883_v51  ;;  %v8077_v4 = vpop.f32.mrf.mxu0 }
 0x1b7   :  { %v8049_v28 = vsel %vm2166_vm7, %v2133_v62, %v2254_v15  ;;  %6148 = vmatmul.msk.bf16.gmra.mxu3 %vm1864_vm3, %v2945_v50  ;;  %v475_v47 = vadd.f32 %v8055_v3, %v8012_v23  ;;  %v515_v52 = vadd.f32 %v8055_v3, %v514_v19  ;;  %v535_v46 = vadd.f32 %v8055_v3, %v534_v0 }
 0x1b8   :  { %v2149_v63 = vperm.slane %v8040_v17, 0  ;;  %v2267_v44 = vsel %vm2162_vm5, %v2147_v37, %v2146_v59  ;;  %v2762_v62 = vsel %vm2386_vm13, %v2760_v36, %v2761_v43  ;;  %7018 = vrot.lane.b32.xlu0 %v7017_v30, %s7185_s26  ;;  %v6981_v15 = vunpack.i.h.bf16 %v8045_v25 }
 0x1b9   :  { %v7032_v6 = vpack.i.bf16 %v2762_v62, %v8043_v22  ;;  %v582_v26 = vmax.f32 %v475_v47, 0.0  ;;  %v598_v60 = vmax.f32 %v515_v52, 0.0  ;;  %v6980_v23 = vunpack.i.l.bf16 %v8045_v25 }
 0x1ba   :  { %v8069_v35 = vsel %vm2164_vm6, %v2148_v12, %v2267_v44  ;;  %v8071_v0 = vmax.f32 %v535_v46, 0.0  ;;  %v7027_v5 = vpack.i.bf16 %v7883_v51, %v7767_v54  ;;  %v7037_v36 = vpack.i.bf16 %v8019_v10, %v7854_v13  ;;  %v537_v54 = vpop.f32.mrf.mxu2 }
 0x1bb   :  { %7033 = vrot.lane.b32.xlu2 %v7032_v6, %s7184_s24  ;;  %v780_v32 = vrot.slane %v582_v26, 2  ;;  %v781_v48 = vrot.slane %v582_v26, 4  ;;  %v782_v49 = vrot.slane %v582_v26, 6  ;;  %v1127_v58 = vmax.f32 %v7970_v41, %v582_v26 }
 0x1bc   :  { %v828_v14 = vrot.slane %v598_v60, 2  ;;  %v829_v19 = vrot.slane %v598_v60, 4  ;;  %v830_v59 = vrot.slane %v598_v60, 6  ;;  %v1159_v50 = vmax.f32 %v7996_v29, %v598_v60  ;;  %7028 = vrot.lane.b32.xlu1 %v7027_v5, %s7183_s28 }
 0x1bd   :  { %v1128_v13 = vmax.f32 %v774_v8, %v780_v32  ;;  %v1129_v51 = vmax.f32 %v775_v27, %v781_v48  ;;  %v1130_v10 = vmax.f32 %v776_v39, %v782_v49  ;;  %v6013_v37 = vrot.slane %v1127_v58, 9 }
 0x1be   :  { %v1160_v12 = vmax.f32 %v822_v53, %v828_v14  ;;  %v1161_v43 = vmax.f32 %v823_v57, %v829_v19  ;;  %v1162_v30 = vmax.f32 %v824_v9, %v830_v59  ;;  %v6045_v47 = vrot.slane %v1159_v50, 9  ;;  %v8095_v49 = vpop.f32.mrf.mxu0 }
 0x1bf   :  { %v6014_v52 = vrot.slane %v1128_v13, 9  ;;  %v6015_v46 = vrot.slane %v1129_v51, 9  ;;  %v6016_v8 = vrot.slane %v1130_v10, 9  ;;  %v1767_v44 = vmax.f32 %v1127_v58, %v6013_v37 }
 0x1c0   :  { %v6046_v62 = vrot.slane %v1160_v12, 9  ;;  %v6047_v27 = vrot.slane %v1161_v43, 9  ;;  %v6048_v6 = vrot.slane %v1162_v30, 9  ;;  %v1799_v41 = vmax.f32 %v1159_v50, %v6045_v47  ;;  %7023 = vrot.lane.b32.xlu0 %v7903_v56, %s7185_s26 }
 0x1c1   :  { %v1768_v39 = vmax.f32 %v1128_v13, %v6014_v52  ;;  %v1769_v26 = vmax.f32 %v1129_v51, %v6015_v46  ;;  %v1770_v60 = vmax.f32 %v1130_v10, %v6016_v8  ;;  %v2102_v5 = vperm.slane %v1767_v44, 0  ;;  %v8102_v51 = vpop.permute.xlu1 %6963 }
 0x1c2   :  { %v1800_v53 = vmax.f32 %v1160_v12, %v6046_v62  ;;  %v1801_v32 = vmax.f32 %v1161_v43, %v6047_v27  ;;  %v1802_v48 = vmax.f32 %v1162_v30, %v6048_v6  ;;  %v2134_v57 = vperm.slane %v1799_v41, 0  ;;  %v539_v47 = vpop.f32.mrf.mxu2 }
 0x1c3   :  { %v2103_v29 = vperm.slane %v1768_v39, 0  ;;  %v2104_v9 = vperm.slane %v1769_v26, 0  ;;  %v2105_v14 = vperm.slane %v1770_v60, 0  ;;  %v2228_v58 = vsel %vm2168_vm8, %v2102_v5, %v8022_v1  ;;  %7038 = vrot.lane.b32.xlu2 %v7037_v36, %s7184_s24 }
 0x1c4   :  { %v2135_v19 = vperm.slane %v1800_v53, 0  ;;  %v2136_v59 = vperm.slane %v1801_v32, 0  ;;  %v2137_v50 = vperm.slane %v1802_v48, 0  ;;  %v2256_v13 = vsel %vm2168_vm8, %v2134_v57, %v8049_v28 }
 0x1c5   :  { %v2229_v10 = vsel %vm2170_vm9, %v2103_v29, %v2228_v58  ;;  %v852_v37 = vrot.slane %v8071_v0, 2  ;;  %v853_v12 = vrot.slane %v8071_v0, 4  ;;  %v854_v43 = vrot.slane %v8071_v0, 6 }
 0x1c6   :  { %v2230_v1 = vsel %vm2172_vm10, %v2104_v9, %v2229_v10  ;;  %v2257_v36 = vsel %vm2170_vm9, %v2135_v19, %v2256_v13  ;;  %v1175_v30 = vmax.f32 %v7998_v55, %v8071_v0  ;;  %v478_v0 = vadd.f32 %v8055_v3, %v8034_v61 }
 0x1c7   :  { %v2231_v28 = vsel %vm2174_vm11, %v2105_v14, %v2230_v1  ;;  %v2258_v52 = vsel %vm2172_vm10, %v2136_v59, %v2257_v36  ;;  %v1176_v46 = vmax.f32 %v846_v31, %v852_v37  ;;  %v1177_v8 = vmax.f32 %v847_v20, %v853_v12 }
 0x1c8   :  { %2306 = vst.msk [vmem:[#allocation2 + $0xb1] sm:$0xff] %vm1864_vm3, %v2231_v28  ;;  %v2259_v44 = vsel %vm2174_vm11, %v2137_v50, %v2258_v52  ;;  %v1178_v62 = vmax.f32 %v848_v2, %v854_v43  ;;  %v6061_v27 = vrot.slane %v1175_v30, 9  ;;  %v2269_v31 = vsel %vm2166_vm7, %v2149_v63, %v8069_v35  ;;  %v484_v63 = vpop.f32.mrf.mxu0 }
 0x1c9   :  { %2310 = vst.msk [vmem:[#allocation2 + $0xf1] sm:$0xff] %vm1864_vm3, %v2259_v44  ;;  %v6062_v20 = vrot.slane %v1176_v46, 9  ;;  %v6063_v6 = vrot.slane %v1177_v8, 9  ;;  %v538_v41 = vadd.f32 %v8055_v3, %v537_v54  ;;  %v8132_v39 = vmax.f32 %v478_v0, 0.0  ;;  %v6969_v19 = vpop.permute.xlu1 %6968 }
 0x1ca   :  { %v6064_v55 = vrot.slane %v1178_v62, 9  ;;  %v1815_v2 = vmax.f32 %v1175_v30, %v6061_v27  ;;  %v6966_v56 = vunpack.i.h.bf16 %v8102_v51  ;;  %v480_v17 = vadd.f32 %v8055_v3, %v8077_v4  ;;  %v542_v36 = vpop.f32.mrf.mxu2 }
 0x1cb   :  { %v1816_v26 = vmax.f32 %v1176_v46, %v6062_v20  ;;  %v1817_v60 = vmax.f32 %v1177_v8, %v6063_v6  ;;  %v8135_v61 = vmax.f32 %v538_v41, 0.0  ;;  %v783_v53 = vrot.slane %v8132_v39, 2  ;;  %v7174_v41 = vld [vmem:[#allocation2 + $0x20] sm:$0xff] }
 0x1cc   :  { %v1818_v35 = vmax.f32 %v1178_v62, %v6064_v55  ;;  %v2150_v5 = vperm.slane %v1815_v2, 0  ;;  %v6965_v54 = vunpack.i.l.bf16 %v8102_v51  ;;  %v784_v57 = vrot.slane %v8132_v39, 4 }
 0x1cd   :  { %v2151_v32 = vperm.slane %v1816_v26, 0  ;;  %v2152_v48 = vperm.slane %v1817_v60, 0  ;;  %v785_v29 = vrot.slane %v8132_v39, 6  ;;  %v855_v58 = vrot.slane %v8135_v61, 2 }
 0x1ce   :  { %v2153_v9 = vperm.slane %v1818_v35, 0  ;;  %v2270_v14 = vsel %vm2168_vm8, %v2150_v5, %v2269_v31  ;;  %v856_v4 = vrot.slane %v8135_v61, 4  ;;  %v8147_v50 = vmax.f32 %v480_v17, 0.0 }
 0x1cf   :  { %v2271_v59 = vsel %vm2170_vm9, %v2151_v32, %v2270_v14  ;;  %v540_v13 = vadd.f32 %v8055_v3, %v539_v47  ;;  %v2888_v51 = vsel %vm1864_vm3, %v7534_v34, %v6955_v33  ;;  %v857_v37 = vrot.slane %v8135_v61, 6 }
 0x1d0   :  { %v2272_v10 = vsel %vm2172_vm10, %v2152_v48, %v2271_v59  ;;  %v9757_v12 = vunpack.i.h.bf16 %v7957_v21  ;;  %v2904_v1 = vsel %vm2852_vm14, %v2888_v51, %v6965_v54  ;;  %v786_v47 = vrot.slane %v8147_v50, 2  ;;  %v487_v17 = vpop.f32.mrf.mxu0 }
 0x1d1   :  { %v2273_v30 = vsel %vm2174_vm11, %v2153_v9, %v2272_v10  ;;  %v787_v28 = vrot.slane %v8147_v50, 4  ;;  %v6971_v52 = vunpack.i.h.bf16 %v6969_v19  ;;  %v8165_v34 = vmax.f32 %v540_v13, 0.0 }
 0x1d2   :  { %v2889_v43 = vsel %vm1864_vm3, %v7635_v24, %v9757_v12  ;;  %2312 = vst.msk [vmem:[#allocation2 + $0x111] sm:$0xff] %vm1864_vm3, %v2273_v30  ;;  %v9758_v21 = vunpack.i.l.bf16 %v7987_v11  ;;  %v6970_v46 = vunpack.i.l.bf16 %v6969_v19  ;;  %v788_v8 = vrot.slane %v8147_v50, 6 }
 0x1d3   :  { %v2905_v33 = vsel %vm2852_vm14, %v2889_v43, %v6966_v56  ;;  %v9759_v44 = vunpack.i.h.bf16 %v7987_v11  ;;  %v483_v27 = vadd.f32 %v8055_v3, %v8095_v49  ;;  %v543_v0 = vadd.f32 %v8055_v3, %v542_v36  ;;  %v7175_v11 = vld [vmem:[#allocation2 + $0x30] sm:$0xff] }
 0x1d4   :  { %v2920_v24 = vsel %vm2869_vm15, %v2904_v1, %v9758_v21  ;;  %v858_v31 = vrot.slane %v8165_v34, 2  ;;  %v859_v20 = vrot.slane %v8165_v34, 4  ;;  %v2838_v55 = vsel %vm1864_vm3, %v7174_v41, %v6960_v38 }
 0x1d5   :  { %v2921_v62 = vsel %vm2869_vm15, %v2905_v33, %v9759_v44  ;;  %v585_v2 = vmax.f32 %v483_v27, 0.0  ;;  %v609_v56 = vmax.f32 %v543_v0, 0.0  ;;  %v9760_v26 = vunpack.i.h.bf16 %v7993_v45 }
 0x1d6   :  { %v2938_v6 = vpack.c.bf16 %v2921_v62, %v2920_v24  ;;  %v2855_v49 = vsel %vm2852_vm14, %v2838_v55, %v6970_v46  ;;  %v860_v35 = vrot.slane %v8165_v34, 6  ;;  %v485_v38 = vadd.f32 %v8055_v3, %v484_v63 }
 0x1d7   :  { %v2839_v60 = vsel %vm1864_vm3, %v7175_v11, %v9760_v26  ;;  %v2872_v54 = vsel %vm2869_vm15, %v2855_v49, %v6980_v23  ;;  %v789_v32 = vrot.slane %v585_v2, 2  ;;  %v790_v48 = vrot.slane %v585_v2, 4 }
 0x1d8   :  { %3155 = vmatmul.bf16.gmra.mxu2 %v2938_v6  ;;  %v2856_v5 = vsel %vm2852_vm14, %v2839_v60, %v6971_v52  ;;  %v791_v9 = vrot.slane %v585_v2, 6  ;;  %v1131_v45 = vmax.f32 %v8132_v39, %v585_v2  ;;  %v861_v14 = vrot.slane %v609_v56, 2  ;;  %v544_v52 = vpop.f32.mrf.mxu2  ;;  %v489_v2 = vpop.f32.mrf.mxu0 }
 0x1d9   :  { %v862_v19 = vrot.slane %v609_v56, 4  ;;  %v863_v59 = vrot.slane %v609_v56, 6  ;;  %v1179_v13 = vmax.f32 %v8135_v61, %v609_v56  ;;  %v1132_v51 = vmax.f32 %v783_v53, %v789_v32 }
 0x1da   :  { %v1133_v10 = vmax.f32 %v784_v57, %v790_v48  ;;  %v1134_v12 = vmax.f32 %v785_v29, %v791_v9  ;;  %v6017_v43 = vrot.slane %v1131_v45, 9  ;;  %v1180_v1 = vmax.f32 %v855_v58, %v861_v14 }
 0x1db   :  { %v1181_v36 = vmax.f32 %v856_v4, %v862_v19  ;;  %v1182_v30 = vmax.f32 %v857_v37, %v863_v59  ;;  %v6065_v23 = vrot.slane %v1179_v13, 9  ;;  %v6018_v63 = vrot.slane %v1132_v51, 9 }
 0x1dc   :  { %v6019_v33 = vrot.slane %v1133_v10, 9  ;;  %v6020_v21 = vrot.slane %v1134_v12, 9  ;;  %v1771_v24 = vmax.f32 %v1131_v45, %v6017_v43  ;;  %v6066_v46 = vrot.slane %v1180_v1, 9 }
 0x1dd   :  { %v6067_v39 = vrot.slane %v1181_v36, 9  ;;  %v6068_v44 = vrot.slane %v1182_v30, 9  ;;  %v1819_v62 = vmax.f32 %v1179_v13, %v6065_v23  ;;  %v1772_v27 = vmax.f32 %v1132_v51, %v6018_v63 }
 0x1de   :  { %v1773_v0 = vmax.f32 %v1133_v10, %v6019_v33  ;;  %v1774_v61 = vmax.f32 %v1134_v12, %v6020_v21  ;;  %v545_v53 = vadd.f32 %v8055_v3, %v544_v52  ;;  %v1820_v57 = vmax.f32 %v1180_v1, %v6066_v46 }
 0x1df   :  { %v1821_v29 = vmax.f32 %v1181_v36, %v6067_v39  ;;  %v1822_v58 = vmax.f32 %v1182_v30, %v6068_v44  ;;  %v2154_v4 = vperm.slane %v1819_v62, 0  ;;  %v2106_v37 = vperm.slane %v1771_v24, 0 }
 0x1e0   :  { %v2107_v6 = vperm.slane %v1772_v27, 0  ;;  %v2108_v41 = vperm.slane %v1773_v0, 0  ;;  %v2873_v55 = vsel %vm2869_vm15, %v2856_v5, %v6981_v15  ;;  %v2155_v56 = vperm.slane %v1820_v57, 0 }
 0x1e1   :  { %v2156_v11 = vperm.slane %v1821_v29, 0  ;;  %v2157_v26 = vperm.slane %v1822_v58, 0  ;;  %v2937_v60 = vpack.c.bf16 %v2873_v55, %v2872_v54  ;;  %v2109_v49 = vperm.slane %v1774_v61, 0 }
 0x1e2   :  { %v2232_v32 = vsel %vm2162_vm5, %v2107_v6, %v2106_v37  ;;  %v586_v48 = vmax.f32 %v485_v38, 0.0  ;;  %v610_v9 = vmax.f32 %v545_v53, 0.0  ;;  %v2274_v14 = vsel %vm2162_vm5, %v2155_v56, %v2154_v4 }
 0x1e3   :  { %v2233_v45 = vsel %vm2164_vm6, %v2108_v41, %v2232_v32  ;;  %3106 = vmatmul.bf16.gmra.mxu1 %v2937_v60  ;;  %v488_v19 = vadd.f32 %v8055_v3, %v487_v17  ;;  %v490_v25 = vadd.f32 %v8055_v3, %v489_v2  ;;  %v2275_v5 = vsel %vm2164_vm6, %v2156_v11, %v2274_v14 }
 0x1e4   :  { %v2234_v15 = vsel %vm2166_vm7, %v2109_v49, %v2233_v45  ;;  %v792_v59 = vrot.slane %v586_v48, 2  ;;  %v793_v54 = vrot.slane %v586_v48, 4  ;;  %v2276_v13 = vsel %vm2166_vm7, %v2157_v26, %v2275_v5 }
 0x1e5   :  { %v794_v51 = vrot.slane %v586_v48, 6  ;;  %v1135_v38 = vmax.f32 %v8147_v50, %v586_v48  ;;  %v864_v10 = vrot.slane %v610_v9, 2  ;;  %v865_v43 = vrot.slane %v610_v9, 4 }
 0x1e6   :  { %v1136_v12 = vmax.f32 %v786_v47, %v792_v59  ;;  %v1137_v17 = vmax.f32 %v787_v28, %v793_v54  ;;  %v866_v3 = vrot.slane %v610_v9, 6  ;;  %v1183_v30 = vmax.f32 %v8165_v34, %v610_v9 }
 0x1e7   :  { %v1138_v1 = vmax.f32 %v788_v8, %v794_v51  ;;  %v6021_v36 = vrot.slane %v1135_v38, 9  ;;  %v1184_v23 = vmax.f32 %v858_v31, %v864_v10  ;;  %v1185_v33 = vmax.f32 %v859_v20, %v865_v43 }
 0x1e8   :  { %v6022_v52 = vrot.slane %v1136_v12, 9  ;;  %v6023_v63 = vrot.slane %v1137_v17, 9  ;;  %v1186_v47 = vmax.f32 %v860_v35, %v866_v3  ;;  %v6069_v24 = vrot.slane %v1183_v30, 9 }
 0x1e9   :  { %v6024_v28 = vrot.slane %v1138_v1, 9  ;;  %v1775_v21 = vmax.f32 %v1135_v38, %v6021_v36  ;;  %v6070_v46 = vrot.slane %v1184_v23, 9  ;;  %v6071_v39 = vrot.slane %v1185_v33, 9 }
 0x1ea   :  { %v1776_v50 = vmax.f32 %v1136_v12, %v6022_v52  ;;  %v1777_v8 = vmax.f32 %v1137_v17, %v6023_v63  ;;  %v6072_v44 = vrot.slane %v1186_v47, 9  ;;  %v1823_v0 = vmax.f32 %v1183_v30, %v6069_v24 }
 0x1eb   :  { %v1778_v62 = vmax.f32 %v1138_v1, %v6024_v28  ;;  %v2110_v27 = vperm.slane %v1775_v21, 0  ;;  %v1824_v31 = vmax.f32 %v1184_v23, %v6070_v46  ;;  %v1825_v57 = vmax.f32 %v1185_v33, %v6071_v39 }
 0x1ec   :  { %v2111_v61 = vperm.slane %v1776_v50, 0  ;;  %v2112_v53 = vperm.slane %v1777_v8, 0  ;;  %v1826_v29 = vmax.f32 %v1186_v47, %v6072_v44  ;;  %v2158_v35 = vperm.slane %v1823_v0, 0  ;;  %v6984_v47 = vpop.permute.xlu0 %6983 }
 0x1ed   :  { %v2113_v20 = vperm.slane %v1778_v62, 0  ;;  %v2235_v34 = vsel %vm2168_vm8, %v2110_v27, %v2234_v15  ;;  %v2159_v58 = vperm.slane %v1824_v31, 0  ;;  %v2160_v37 = vperm.slane %v1825_v57, 0  ;;  %v2337_v57 = vld [vmem:[#allocation2 + $0xb8] sm:$0x3] }
 0x1ee   :  { %v2236_v4 = vsel %vm2170_vm9, %v2111_v61, %v2235_v34  ;;  %v2161_v6 = vperm.slane %v1826_v29, 0  ;;  %v587_v41 = vmax.f32 %v488_v19, 0.0  ;;  %v806_v55 = vrot.slane %v7736_v16, 6  ;;  %v6994_v44 = vpop.permute.xlu1 %6993 }
 0x1ef   :  { %v2237_v2 = vsel %vm2172_vm10, %v2112_v53, %v2236_v4  ;;  %v2277_v56 = vsel %vm2168_vm8, %v2158_v35, %v2276_v13  ;;  %v588_v11 = vmax.f32 %v490_v25, 0.0  ;;  %v9761_v15 = vrot.slane %v7714_v42, 2  ;;  %v8244_v53 = vld [vmem:[#allocation2 + $0xb0] sm:$0xff] }
 0x1f0   :  { %v2238_v26 = vsel %vm2174_vm11, %v2113_v20, %v2237_v2  ;;  %v2278_v60 = vsel %vm2170_vm9, %v2159_v58, %v2277_v56  ;;  %v795_v49 = vrot.slane %v587_v41, 2  ;;  %v796_v32 = vrot.slane %v587_v41, 4 }
 0x1f1   :  { %2307 = vst.msk [vmem:[#allocation2 + $0xc1] sm:$0xff] %vm1864_vm3, %v2238_v26  ;;  %v2279_v48 = vsel %vm2172_vm10, %v2160_v37, %v2278_v60  ;;  %v797_v9 = vrot.slane %v587_v41, 6  ;;  %v1139_v45 = vmax.f32 %v587_v41, %v7714_v42  ;;  %v798_v14 = vrot.slane %v588_v11, 2  ;;  %v8252_v41 = vld [vmem:[#allocation2 + $0xa0] sm:$0xff]  ;;  %v8257_v26 = vld [vmem:[#allocation2 + $0xa8] sm:$0x3] }
 0x1f2   :  { %v2280_v19 = vsel %vm2174_vm11, %v2161_v6, %v2279_v48  ;;  %v1140_v5 = vmax.f32 %v795_v49, %v9761_v15  ;;  %v9762_v25 = vrot.slane %v7714_v42, 4  ;;  %v799_v54 = vrot.slane %v588_v11, 4 }
 0x1f3   :  { %2313 = vst.msk [vmem:[#allocation2 + $0x121] sm:$0xff] %vm1864_vm3, %v2280_v19  ;;  %v9763_v13 = vrot.slane %v7714_v42, 6  ;;  %v6025_v38 = vrot.slane %v1139_v45, 9  ;;  %v800_v10 = vrot.slane %v588_v11, 6  ;;  %v1143_v12 = vmax.f32 %v588_v11, %v7736_v16 }
 0x1f4   :  { %v1141_v59 = vmax.f32 %v796_v32, %v9762_v25  ;;  %v6026_v17 = vrot.slane %v1140_v5, 9  ;;  %v9764_v3 = vrot.slane %v7736_v16, 2  ;;  %v9765_v36 = vrot.slane %v7736_v16, 4  ;;  %v7004_v16 = vpop.permute.xlu2 %7003 }
 0x1f5   :  { %v1142_v51 = vmax.f32 %v797_v9, %v9763_v13  ;;  %v1779_v52 = vmax.f32 %v1139_v45, %v6025_v38  ;;  %v1146_v63 = vmax.f32 %v800_v10, %v806_v55  ;;  %v6029_v33 = vrot.slane %v1143_v12, 9 }
 0x1f6   :  { %v6027_v43 = vrot.slane %v1141_v59, 9  ;;  %v1144_v1 = vmax.f32 %v798_v14, %v9764_v3  ;;  %v1145_v30 = vmax.f32 %v799_v54, %v9765_v36  ;;  %v1780_v28 = vmax.f32 %v1140_v5, %v6026_v17  ;;  %v6989_v5 = vpop.permute.xlu0 %6988  ;;  %v6999_v17 = vpop.permute.xlu1 %6998 }
 0x1f7   :  { %v6028_v23 = vrot.slane %v1142_v51, 9  ;;  %v2114_v50 = vperm.slane %v1779_v52, 0  ;;  %v6032_v8 = vrot.slane %v1146_v63, 9  ;;  %v1783_v39 = vmax.f32 %v1143_v12, %v6029_v33 }
 0x1f8   :  { %v1781_v42 = vmax.f32 %v1141_v59, %v6027_v43  ;;  %v6030_v21 = vrot.slane %v1144_v1, 9  ;;  %v6031_v24 = vrot.slane %v1145_v30, 9  ;;  %v2115_v62 = vperm.slane %v1780_v28, 0  ;;  %v8246_v29 = vld [vmem:[#allocation2 + $0xc0] sm:$0xff]  ;;  %v8249_v4 = vld [vmem:[#allocation2 + $0xc8] sm:$0x3] }
 0x1f9   :  { %v1782_v46 = vmax.f32 %v1142_v51, %v6028_v23  ;;  %v2118_v61 = vperm.slane %v1783_v39, 0  ;;  %v1786_v35 = vmax.f32 %v1146_v63, %v6032_v8  ;;  %v2511_v2 = vrot.slane %v8244_v53, 2 }
 0x1fa   :  { %v2116_v27 = vperm.slane %v1781_v42, 0  ;;  %v1784_v0 = vmax.f32 %v1144_v1, %v6030_v21  ;;  %v1785_v31 = vmax.f32 %v1145_v30, %v6031_v24  ;;  %v2239_v34 = vsel %vm2162_vm5, %v2115_v62, %v2114_v50 }
 0x1fb   :  { %v2117_v20 = vperm.slane %v1782_v46, 0  ;;  %v2512_v56 = vrot.slane %v2337_v57, 2  ;;  %v2514_v11 = vrot.slane %v8246_v29, 2  ;;  %v6986_v49 = vunpack.i.h.bf16 %v6984_v47  ;;  %v8289_v46 = vld [vmem:[#allocation2 + $0xe8] sm:$0x3] }
 0x1fc   :  { %v2119_v58 = vperm.slane %v1784_v0, 0  ;;  %v2240_v37 = vsel %vm2164_vm6, %v2116_v27, %v2239_v34  ;;  %v2120_v6 = vperm.slane %v1785_v31, 0  ;;  %v6985_v32 = vunpack.i.l.bf16 %v6984_v47  ;;  %v7009_v36 = vpop.permute.xlu2 %7008  ;;  %v8285_v47 = vld [vmem:[#allocation2 + $0xe0] sm:$0xff] }
 0x1fd   :  { %v2241_v55 = vsel %vm2166_vm7, %v2117_v20, %v2240_v37  ;;  %v2515_v48 = vrot.slane %v8249_v4, 2  ;;  %v2121_v9 = vperm.slane %v1786_v35, 0  ;;  %v8263_v14 = vsel %vm2483_vm12, %v2511_v2, %v2512_v56  ;;  %v7176_v31 = vld [vmem:[#allocation2 + $0x40] sm:$0xff] }
 0x1fe   :  { %v2242_v60 = vsel %vm2168_vm8, %v2118_v61, %v2241_v55  ;;  %v2411_v19 = vrot.slane %v8252_v41, 1  ;;  %v2412_v59 = vrot.slane %v8257_v26, 1  ;;  %v2414_v54 = vrot.slane %v8244_v53, 1  ;;  %v7177_v61 = vld [vmem:[#allocation2 + $0x50] sm:$0xff] }
 0x1ff   :  { %v2243_v45 = vsel %vm2170_vm9, %v2119_v58, %v2242_v60  ;;  %v8268_v25 = vsel %vm2483_vm12, %v2514_v11, %v2515_v48  ;;  %v2415_v38 = vrot.slane %v2337_v57, 1  ;;  %v6996_v10 = vunpack.i.h.bf16 %v6994_v44 }
 0x200   :  { %v2244_v15 = vsel %vm2172_vm10, %v2120_v6, %v2243_v45  ;;  %v7042_v51 = vpack.i.bf16 %v8268_v25, %v8263_v14  ;;  %v6995_v12 = vunpack.i.l.bf16 %v6994_v44  ;;  %v7006_v43 = vunpack.i.h.bf16 %v7004_v16 }
 0x201   :  { %v2245_v13 = vsel %vm2174_vm11, %v2121_v9, %v2244_v15  ;;  %v7005_v3 = vunpack.i.l.bf16 %v7004_v16  ;;  %v6991_v1 = vunpack.i.h.bf16 %v6989_v5  ;;  %v6990_v30 = vunpack.i.l.bf16 %v6989_v5 }
 0x202   :  { %2308 = vst.msk [vmem:[#allocation2 + $0xd1] sm:$0xff] %vm1864_vm3, %v2245_v13  ;;  %7043 = vrot.lane.b32.xlu0 %v7042_v51, %s7185_s26  ;;  %v2413_v23 = vsel %vm2386_vm13, %v2411_v19, %v2412_v59  ;;  %v2890_v52 = vsel %vm1864_vm3, %v7638_v18, %v6985_v32  ;;  %v2891_v63 = vsel %vm1864_vm3, %v7801_v40, %v6986_v49  ;;  %v7001_v21 = vunpack.i.h.bf16 %v6999_v17 }
 0x203   :  { %v8283_v33 = vsel %vm2386_vm13, %v2414_v54, %v2415_v38  ;;  %v2906_v28 = vsel %vm2852_vm14, %v2890_v52, %v6995_v12  ;;  %v2907_v42 = vsel %vm2852_vm14, %v2891_v63, %v6996_v10  ;;  %v7011_v24 = vunpack.i.h.bf16 %v7009_v36  ;;  %v8343_v38 = vld [vmem:[%s9742_s4] ss:$0 sm:$0xff]  ;;  %v3151_v10 = vpop.f32.mrf.mxu2 }
 0x204   :  { %v2922_v50 = vsel %vm2869_vm15, %v2906_v28, %v7005_v3  ;;  %v2923_v18 = vsel %vm2869_vm15, %v2907_v42, %v7006_v43  ;;  %v7000_v8 = vunpack.i.l.bf16 %v6999_v17  ;;  %v7010_v39 = vunpack.i.l.bf16 %v7009_v36  ;;  %v2345_v17 = vld [vmem:[#allocation2 + $0xf8] sm:$0x3]  ;;  %v8362_v36 = vld [vmem:[#allocation2 + $0x108] sm:$0x3] }
 0x205   :  { %v2417_v40 = vrot.slane %v8246_v29, 1  ;;  %v2418_v44 = vrot.slane %v8249_v4, 1  ;;  %v2941_v62 = vpack.c.bf16 %v2923_v18, %v2922_v50  ;;  %v7047_v27 = vpack.i.bf16 %v8283_v33, %v2413_v23 }
 0x206   :  { %v2520_v0 = vrot.slane %v8285_v47, 2  ;;  %v2840_v16 = vsel %vm1864_vm3, %v7176_v31, %v6990_v30  ;;  %v2841_v57 = vsel %vm1864_vm3, %v7177_v61, %v6991_v1  ;;  %v2521_v35 = vrot.slane %v8289_v46, 2  ;;  %v8360_v1 = vld [vmem:[#allocation2 + $0x100] sm:$0xff]  ;;  %v3200_v30 = vpop.f32.mrf.mxu3 }
 0x207   :  { %v2508_v58 = vrot.slane %v8252_v41, 2  ;;  %3160 = vmatmul.bf16.gmra.mxu2 %v2941_v62  ;;  %v2857_v4 = vsel %vm2852_vm14, %v2840_v16, %v7000_v8  ;;  %v2858_v37 = vsel %vm2852_vm14, %v2841_v57, %v7001_v21  ;;  %v2509_v60 = vrot.slane %v8257_v26, 2 }
 0x208   :  { %v2874_v49 = vsel %vm2869_vm15, %v2857_v4, %v7010_v39  ;;  %v2875_v32 = vsel %vm2869_vm15, %v2858_v37, %v7011_v24  ;;  %v8320_v19 = vsel %vm2386_vm13, %v2417_v40, %v2418_v44  ;;  %v8328_v5 = vsel %vm2483_vm12, %v2520_v0, %v2521_v35  ;;  %v2349_v35 = vld [vmem:[#allocation2 + $0x118] sm:$0x3] }
 0x209   :  { %v8299_v20 = vld [vmem:[#allocation2 + $0xd0] sm:$0xff]  ;;  %v2341_v34 = vld [vmem:[#allocation2 + $0xd8] sm:$0x3]  ;;  %v2940_v9 = vpack.c.bf16 %v2875_v32, %v2874_v49  ;;  %v2510_v54 = vsel %vm2483_vm12, %v2508_v58, %v2509_v60  ;;  %v9766_v13 = vmov 0.0   ;;  %v7067_v43 = vpack.i.bf16 %v8246_v29, %v8244_v53 }
 0x20a   :  { %v7052_v6 = vpack.i.bf16 %v8299_v20, %v8246_v29  ;;  %v2517_v55 = vrot.slane %v8299_v20, 2  ;;  %v2518_v2 = vrot.slane %v2341_v34, 2  ;;  %v2420_v56 = vrot.slane %v8299_v20, 1  ;;  %7048 = vrot.lane.b32.xlu0 %v7047_v27, %s7185_s26  ;;  %3601 = vst.msk [vmem:[#allocation3 + $0x8] sm:$0x3f] %vm3599_vm1, %v9766_v13 }
 0x20b   :  { %v2421_v11 = vrot.slane %v2341_v34, 1  ;;  %3111 = vmatmul.bf16.gmra.mxu1 %v2940_v9  ;;  %3600 = vst.msk [vmem:[#allocation3] sm:$0x3f] %vm3599_vm1, %v9766_v13  ;;  %v7057_v51 = vpack.i.bf16 %v8263_v14, %v2510_v54  ;;  %v8353_v14 = vld [vmem:[#allocation2 + $0xf0] sm:$0xff]  ;;  %v2423_v23 = vrot.slane %v8285_v47, 1  ;;  %v2424_v52 = vrot.slane %v8289_v46, 1  ;;  %v3153_v61 = vpop.f32.mrf.mxu2 }
 0x20c   :  { %7053 = vrot.lane.b32.xlu1 %v7052_v6, %s7183_s28  ;;  %v8315_v48 = vsel %vm2483_vm12, %v2517_v55, %v2518_v2  ;;  %3602 = vst.msk [vmem:[#allocation3 + $0x10] sm:$0x3f] %vm3599_vm1, %v9766_v13  ;;  %v2426_v63 = vrot.slane %v8353_v14, 1  ;;  %v2427_v28 = vrot.slane %v2345_v17, 1  ;;  %v2523_v42 = vrot.slane %v8353_v14, 2  ;;  %v8416_v34 = vld [vmem:[#allocation2 + $0x110] sm:$0xff] }
 0x20d   :  { %v2948_v45 = vpack.c.bf16 %v8315_v48, %v8268_v25  ;;  %v8323_v15 = vsel %vm2386_vm13, %v2420_v56, %v2421_v11  ;;  %v7087_v59 = vpack.i.bf16 %v8328_v5, %v8315_v48  ;;  %3603 = vst.msk [vmem:[#allocation3 + $0x18] sm:$0x3f] %vm3599_vm1, %v9766_v13  ;;  %v2524_v21 = vrot.slane %v2345_v17, 2 }
 0x20e   :  { %v7062_v26 = vpack.i.bf16 %v8323_v15, %v8320_v19  ;;  %3604 = vst.msk [vmem:[#allocation3 + $0x20] sm:$0x3f] %vm3599_vm1, %v9766_v13  ;;  %v7072_v46 = vpack.i.bf16 %v8353_v14, %v8285_v47  ;;  %v2526_v50 = vrot.slane %v8360_v1, 2  ;;  %v2527_v18 = vrot.slane %v8362_v36, 2  ;;  %v3202_v58 = vpop.f32.mrf.mxu3 }
 0x20f   :  { %6149 = vmatmul.msk.bf16.gmra.mxu3 %vm1864_vm3, %v2948_v45  ;;  %3605 = vst.msk [vmem:[#allocation3 + $0x28] sm:$0x3f] %vm3599_vm1, %v9766_v13  ;;  %v8385_v8 = vsel %vm2386_vm13, %v2423_v23, %v2424_v52  ;;  %v8388_v39 = vsel %vm2386_vm13, %v2426_v63, %v2427_v28  ;;  %v8394_v40 = vsel %vm2483_vm12, %v2523_v42, %v2524_v21  ;;  %v2529_v11 = vrot.slane %v8416_v34, 2 }
 0x210   :  { %7063 = vrot.lane.b32.xlu2 %v7062_v26, %s7184_s24  ;;  %3606 = vst.msk [vmem:[#allocation3 + $0x30] sm:$0x3f] %vm3599_vm1, %v9766_v13  ;;  %v2951_v62 = vpack.c.bf16 %v8394_v40, %v8328_v5  ;;  %v7077_v0 = vpack.i.bf16 %v8388_v39, %v8385_v8  ;;  %v8405_v31 = vsel %vm2483_vm12, %v2526_v50, %v2527_v18  ;;  %v2530_v60 = vrot.slane %v2349_v35, 2 }
 0x211   :  { %3607 = vst.msk [vmem:[#allocation3 + $0x38] sm:$0x3f] %vm3599_vm1, %v9766_v13  ;;  %v7097_v37 = vpack.i.bf16 %v8405_v31, %v8394_v40  ;;  %v7102_v55 = vpack.i.bf16 %v8315_v48, %v8268_v25  ;;  %v2429_v49 = vrot.slane %v8360_v1, 1  ;;  %v7082_v25 = vpack.i.bf16 %v8285_v47, %v8299_v20 }
 0x212   :  { %7088 = vrot.lane.b32.xlu0 %v7087_v59, %s7185_s26  ;;  %3608 = vst.msk [vmem:[#allocation3 + $0x40] sm:$0x3f] %vm3599_vm1, %v9766_v13  ;;  %v2430_v48 = vrot.slane %v8362_v36, 1  ;;  %v2432_v9 = vrot.slane %v8416_v34, 1  ;;  %v2433_v54 = vrot.slane %v2349_v35, 1  ;;  %v8446_v36 = vsel %vm2483_vm12, %v2529_v11, %v2530_v60 }
 0x213   :  { %3609 = vst.msk [vmem:[#allocation3 + $0x48] sm:$0x3f] %vm3599_vm1, %v9766_v13 }
 0x214   :  { %7058 = vrot.lane.b32.xlu1 %v7057_v51, %s7183_s28  ;;  %v3102_v12 = vpop.f32.mrf.mxu1  ;;  %3610 = vst.msk [vmem:[#allocation3 + $0x50] sm:$0x3f] %vm3599_vm1, %v9766_v13  ;;  %v8450_v42 = vsel %vm2386_vm13, %v2429_v49, %v2430_v48  ;;  %v8453_v21 = vsel %vm2386_vm13, %v2432_v9, %v2433_v54 }
 0x215   :  { %v3103_v3 = vadd.f32 %v8343_v38, %v3102_v12  ;;  %3611 = vst.msk [vmem:[#allocation3 + $0x58] sm:$0x3f] %vm3599_vm1, %v9766_v13 }
 0x216   :  { %4344 = vst.msk [vmem:[#allocation4] sm:$0xf] %vm3709_vm2, %v9766_v13  ;;  %v8422_v6 = vld [vmem:[#allocation3 + $0x28] sm:$0x3f] }
 0x217   :  { %v3152_v24 = vadd.f32 %v3151_v10, %v3103_v3  ;;  %4345 = vst.msk [vmem:[#allocation4 + $0x4] sm:$0xf] %vm3709_vm2, %v9766_v13  ;;  %v3916_v56 = vrot.slane %v8422_v6, 2  ;;  %v8441_v3 = vld [vmem:[#allocation2 + $0x128] sm:$0x3] }
 0x218   :  { %7068 = vrot.lane.b32.xlu2 %v7067_v43, %s7184_s24  ;;  %4346 = vst.msk [vmem:[#allocation4 + $0x8] sm:$0xf] %vm3709_vm2, %v9766_v13  ;;  %v8439_v43 = vld [vmem:[#allocation2 + $0x120] sm:$0xff] }
 0x219   :  { %v3201_v44 = vadd.f32 %v3200_v30, %v3152_v24  ;;  %4347 = vst.msk [vmem:[#allocation4 + $0xc] sm:$0xf] %vm3709_vm2, %v9766_v13  ;;  %v7107_v30 = vpack.i.bf16 %v8416_v34, %v8360_v1  ;;  %v2657_v24 = vrot.slane %v8439_v43, 2 }
 0x21a   :  { %7093 = vrot.lane.b32.xlu0 %v7062_v26, %s7185_s26  ;;  %4348 = vst.msk [vmem:[#allocation4 + $0x10] sm:$0xf] %vm3709_vm2, %v9766_v13 }
 0x21b   :  { %v3240_v4 = vmax.f32 %v3201_v44, 0.0  ;;  %4349 = vst.msk [vmem:[#allocation4 + $0x14] sm:$0xf] %vm3709_vm2, %v9766_v13 }
 0x21c   :  { %7073 = vrot.lane.b32.xlu1 %v7072_v46, %s7183_s28  ;;  %v3104_v27 = vpop.f32.mrf.mxu1  ;;  %4350 = vst.msk [vmem:[#allocation4 + $0x18] sm:$0xf] %vm3709_vm2, %v9766_v13  ;;  %v2658_v46 = vrot.slane %v8441_v3, 2 }
 0x21d   :  { %v3105_v16 = vadd.f32 %v8343_v38, %v3104_v27  ;;  %4351 = vst.msk [vmem:[#allocation4 + $0x1c] sm:$0xf] %vm3709_vm2, %v9766_v13  ;;  %v3272_v45 = vrot.slane %v3240_v4, 2  ;;  %v3273_v26 = vrot.slane %v3240_v4, 4  ;;  %v3274_v59 = vrot.slane %v3240_v4, 6 }
 0x21e   :  { %4012 = vst [vmem:[#allocation1 + $0x31] ss:$2 sm:$0xff] %v3916_v56 }
 0x21f   :  { %6150 = vmatmul.msk.bf16.gmra.mxu3 %vm1864_vm3, %v2951_v62  ;;  %v3154_v57 = vadd.f32 %v3153_v61, %v3105_v16  ;;  %v2954_v16 = vpack.c.bf16 %v8446_v36, %v8405_v31  ;;  %v7034_v61 = vpop.permute.xlu2 %7033 }
 0x220   :  { %7078 = vrot.lane.b32.xlu2 %v7077_v0, %s7184_s24  ;;  %v7035_v48 = vunpack.i.l.bf16 %v7034_v61 }
 0x221   :  { %v3203_v2 = vadd.f32 %v3202_v58, %v3154_v57 }
 0x222   :  { %7098 = vrot.lane.b32.xlu0 %v7097_v37, %s7185_s26 }
 0x223   :  { %v3241_v32 = vmax.f32 %v3203_v2, 0.0  ;;  %v2659_v2 = vsel %vm2483_vm12, %v2657_v24, %v2658_v46 }
 0x224   :  { %7103 = vrot.lane.b32.xlu1 %v7102_v55, %s7183_s28 }
 0x225   :  { %v3275_v51 = vrot.slane %v3241_v32, 2  ;;  %v3276_v10 = vrot.slane %v3241_v32, 4  ;;  %v3277_v12 = vrot.slane %v3241_v32, 6  ;;  %v3368_v17 = vmax.f32 %v3240_v4, %v3241_v32  ;;  %v7014_v27 = vpop.permute.xlu1 %7013 }
 0x226   :  { %v7112_v4 = vpack.i.bf16 %v8453_v21, %v8450_v42  ;;  %v7016_v55 = vunpack.i.h.bf16 %v7014_v27  ;;  %v7015_v32 = vunpack.i.l.bf16 %v7014_v27 }
 0x227   :  { %v3369_v23 = vmax.f32 %v3272_v45, %v3275_v51  ;;  %v3370_v52 = vmax.f32 %v3273_v26, %v3276_v10  ;;  %v3371_v63 = vmax.f32 %v3274_v59, %v3277_v12  ;;  %v6153_v28 = vrot.slane %v3368_v17, 9  ;;  %v7039_v27 = vpop.permute.xlu2 %7038 }
 0x228   :  { %7083 = vrot.lane.b32.xlu2 %v7082_v25, %s7184_s24  ;;  %v7036_v25 = vunpack.i.h.bf16 %v7034_v61  ;;  %v7132_v12 = vpack.i.bf16 %v2659_v2, %v8446_v36 }
 0x229   :  { %v6154_v50 = vrot.slane %v3369_v23, 9  ;;  %v6155_v18 = vrot.slane %v3370_v52, 9  ;;  %v6156_v44 = vrot.slane %v3371_v63, 9  ;;  %v3528_v62 = vmax.f32 %v3368_v17, %v6153_v28 }
 0x22a   :  { %7118 = vrot.lane.b32.xlu0 %v7077_v0, %s7185_s26  ;;  %v7019_v37 = vpop.permute.xlu0 %7018  ;;  %v7127_v28 = vpack.i.bf16 %v8360_v1, %v8353_v14 }
 0x22b   :  { %v3529_v57 = vmax.f32 %v3369_v23, %v6154_v50  ;;  %v3530_v35 = vmax.f32 %v3370_v52, %v6155_v18  ;;  %v3531_v58 = vmax.f32 %v3371_v63, %v6156_v44  ;;  %v7021_v56 = vunpack.i.h.bf16 %v7019_v37  ;;  %v2352_v52 = vld [vmem:[#allocation2 + $0x130] sm:$0xff]  ;;  %v2353_v63 = vld [vmem:[#allocation2 + $0x138] sm:$0x3] }
 0x22c   :  { %7108 = vrot.lane.b32.xlu1 %v7107_v30, %s7183_s28  ;;  %v7020_v11 = vunpack.i.l.bf16 %v7019_v37  ;;  %v3644_v60 = vperm.slane %v3528_v62, 0  ;;  %v2817_v24 = vrot.slane %v2352_v52, 2  ;;  %v2818_v46 = vrot.slane %v2353_v63, 2 }
 0x22d   :  { %v3645_v0 = vperm.slane %v3529_v57, 0  ;;  %v3646_v49 = vperm.slane %v3530_v35, 0  ;;  %v2893_v45 = vsel %vm1864_vm3, %v8043_v22, %v7021_v56  ;;  %v3647_v26 = vperm.slane %v3531_v58, 0 }
 0x22e   :  { %v2892_v9 = vsel %vm1864_vm3, %v7895_v7, %v7020_v11  ;;  %v2909_v51 = vsel %vm2852_vm14, %v2893_v45, %v7016_v55  ;;  %v7122_v22 = vpack.i.bf16 %v8394_v40, %v8328_v5  ;;  %v2763_v50 = vrot.slane %v2352_v52, 1 }
 0x22f   :  { %6151 = vmatmul.msk.bf16.gmra.mxu3 %vm1864_vm3, %v2954_v16  ;;  %v3676_v59 = vsel %vm2162_vm5, %v3645_v0, %v3644_v60  ;;  %v2908_v54 = vsel %vm2852_vm14, %v2892_v9, %v7015_v32  ;;  %v2925_v30 = vsel %vm2869_vm15, %v2909_v51, %v7036_v25  ;;  %v2635_v5 = vrot.slane %v8439_v43, 1  ;;  %v7029_v16 = vpop.permute.xlu1 %7028  ;;  %v7179_v32 = vld [vmem:[#allocation2 + $0x60] sm:$0xff]  ;;  %v8510_v51 = vld [vmem:[#allocation3 + $0x58] sm:$0x3f] }
 0x230   :  { %7113 = vrot.lane.b32.xlu2 %v7112_v4, %s7184_s24  ;;  %v3677_v10 = vsel %vm2164_vm6, %v3646_v49, %v3676_v59  ;;  %v2924_v17 = vsel %vm2869_vm15, %v2908_v54, %v7035_v48  ;;  %v2636_v40 = vrot.slane %v8441_v3, 1  ;;  %v2764_v18 = vrot.slane %v2353_v63, 1  ;;  %v7178_v49 = vld [vmem:[#allocation2 + $0x70] sm:$0xff] }
 0x231   :  { %v3678_v7 = vsel %vm2166_vm7, %v3647_v26, %v3677_v10  ;;  %v2944_v23 = vpack.c.bf16 %v2925_v30, %v2924_v17  ;;  %v7137_v44 = vpack.i.bf16 %v2352_v52, %v8439_v43  ;;  %v2819_v62 = vsel %vm2483_vm12, %v2817_v24, %v2818_v46  ;;  %v8516_v17 = vld [vmem:[#allocation3] sm:$0x3f]  ;;  %v3205_v24 = vpop.f32.mrf.mxu3 }
 0x232   :  { %3710 = vst.msk [vmem:[#allocation3 + $0x9] sm:$0xf] %vm3709_vm2, %v3678_v7  ;;  %7133 = vrot.lane.b32.xlu0 %v7132_v12, %s7185_s26  ;;  %v8492_v61 = vsel %vm2386_vm13, %v2635_v5, %v2636_v40  ;;  %v2765_v57 = vsel %vm2386_vm13, %v2763_v50, %v2764_v18  ;;  %v7024_v35 = vpop.permute.xlu0 %7023  ;;  %v2957_v37 = vpack.c.bf16 %v2819_v62, %v2659_v2  ;;  %v7041_v55 = vunpack.i.h.bf16 %v7039_v27 }
 0x233   :  { %3165 = vmatmul.bf16.gmra.mxu2 %v2944_v23  ;;  %v7026_v3 = vunpack.i.h.bf16 %v7024_v35  ;;  %v7025_v58 = vunpack.i.l.bf16 %v7024_v35  ;;  %v7031_v56 = vunpack.i.h.bf16 %v7029_v16  ;;  %v7030_v11 = vunpack.i.l.bf16 %v7029_v16 }
 0x234   :  { %7123 = vrot.lane.b32.xlu1 %v7122_v22, %s7183_s28  ;;  %v7142_v60 = vpack.i.bf16 %v2765_v57, %v8492_v61  ;;  %v7040_v0 = vunpack.i.l.bf16 %v7039_v27  ;;  %v3890_v48 = vrot.slane %v8422_v6, 1  ;;  %v7152_v54 = vpack.i.bf16 %v8446_v36, %v8405_v31  ;;  %v8527_v22 = vld [vmem:[#allocation3 + $0x30] sm:$0x3f] }
 0x235   :  { %v2842_v25 = vsel %vm1864_vm3, %v7179_v32, %v7025_v58  ;;  %v7157_v10 = vpack.i.bf16 %v8439_v43, %v8416_v34  ;;  %v3891_v12 = vrot.slane %v8510_v51, 1  ;;  %v3738_v31 = vrot.slane %v8516_v17, 1 }
 0x236   :  { %v2859_v2 = vsel %vm2852_vm14, %v2842_v25, %v7030_v11  ;;  %v3770_v7 = vrot.slane %v8516_v17, 2  ;;  %v3742_v30 = vrot.slane %v8527_v22, 1  ;;  %v3774_v23 = vrot.slane %v8527_v22, 2 }
 0x237   :  { %v2876_v45 = vsel %vm2869_vm15, %v2859_v2, %v7040_v0 }
 0x238   :  { %7128 = vrot.lane.b32.xlu2 %v7127_v28, %s7184_s24 }
 0x239   :  { %v8522_v36 = vld [vmem:[#allocation3 + $0x8] sm:$0x3f]  ;;  %v3207_v62 = vpop.f32.mrf.mxu3 }
 0x23a   :  { %7148 = vrot.lane.b32.xlu0 %v7112_v4, %s7185_s26  ;;  %v2843_v4 = vsel %vm1864_vm3, %v7178_v49, %v7026_v3  ;;  %v3771_v43 = vrot.slane %v8522_v36, 2 }
 0x23b   :  { %v2860_v9 = vsel %vm2852_vm14, %v2843_v4, %v7031_v56 }
 0x23c   :  { %7138 = vrot.lane.b32.xlu1 %v7137_v44, %s7183_s28  ;;  %v2877_v26 = vsel %vm2869_vm15, %v2860_v9, %v7041_v55 }
 0x23d   :  { %v2943_v59 = vpack.c.bf16 %v2877_v26, %v2876_v45 }
 0x23f   :  { %6152 = vmatmul.msk.bf16.gmra.mxu3 %vm1864_vm3, %v2957_v37  ;;  %3116 = vmatmul.bf16.gmra.mxu1 %v2943_v59 }
 0x240   :  { %7143 = vrot.lane.b32.xlu2 %v7142_v60, %s7184_s24 }
 0x242   :  { %3898 = vrot.lane.b32.xlu0 %v3890_v48, %s7184_s24 }
 0x244   :  { %7153 = vrot.lane.b32.xlu1 %v7152_v54, %s7183_s28 }
 0x248   :  { %7158 = vrot.lane.b32.xlu2 %v7157_v10, %s7184_s24 }
 0x24a   :  { %3906 = vrot.lane.b32.xlu0 %v3891_v12, %s7184_s24 }
 0x24c   :  { %3872 = vrot.lane.b32.xlu1 %v8422_v6, %s7183_s28  ;;  %v3739_v6 = vrot.slane %v8522_v36, 1 }
 0x250   :  { %3746 = vrot.lane.b32.xlu2 %v3738_v31, %s7185_s26 }
 0x252   :  { %3840 = vrot.lane.b32.xlu0 %v3771_v43, %s7185_s26 }
 0x254   :  { %3778 = vrot.lane.b32.xlu1 %v3770_v7, %s7183_s28 }
 0x258   :  { %3754 = vrot.lane.b32.xlu2 %v3742_v30, %s7185_s26 }
 0x25a   :  { %3748 = vrot.lane.b32.xlu0 %v3739_v6, %s7185_s26 }
 0x25b   :  { %v3156_v52 = vpop.f32.mrf.mxu2 }
 0x25c   :  { %3880 = vrot.lane.b32.xlu1 %v8510_v51, %s7183_s28 }
 0x260   :  { %3804 = vrot.lane.b32.xlu2 %v8522_v36, %s7184_s24  ;;  %v3107_v63 = vpop.f32.mrf.mxu1 }
 0x261   :  { %v3108_v28 = vadd.f32 %v8343_v38, %v3107_v63 }
 0x263   :  { %v3157_v46 = vadd.f32 %v3156_v52, %v3108_v28  ;;  %v3158_v18 = vpop.f32.mrf.mxu2 }
 0x264   :  { %3786 = vrot.lane.b32.xlu1 %v3774_v23, %s7183_s28 }
 0x265   :  { %v3206_v50 = vadd.f32 %v3205_v24, %v3157_v46 }
 0x267   :  { %v3242_v27 = vmax.f32 %v3206_v50, 0.0 }
 0x268   :  { %3780 = vrot.lane.b32.xlu2 %v3771_v43, %s7183_s28  ;;  %v3109_v5 = vpop.f32.mrf.mxu1 }
 0x269   :  { %v3110_v40 = vadd.f32 %v8343_v38, %v3109_v5  ;;  %v3278_v3 = vrot.slane %v3242_v27, 2  ;;  %v3279_v58 = vrot.slane %v3242_v27, 4  ;;  %v3280_v37 = vrot.slane %v3242_v27, 6 }
 0x26a   :  { %v7064_v57 = vpop.permute.xlu2 %7063 }
 0x26b   :  { %v3159_v44 = vadd.f32 %v3158_v18, %v3110_v40  ;;  %v7066_v40 = vunpack.i.h.bf16 %v7064_v57  ;;  %v7065_v18 = vunpack.i.l.bf16 %v7064_v57 }
 0x26d   :  { %v3208_v16 = vadd.f32 %v3207_v62, %v3159_v44 }
 0x26f   :  { %v3243_v35 = vmax.f32 %v3208_v16, 0.0 }
 0x271   :  { %v3281_v55 = vrot.slane %v3243_v35, 2  ;;  %v3282_v56 = vrot.slane %v3243_v35, 4  ;;  %v3283_v11 = vrot.slane %v3243_v35, 6  ;;  %v3372_v60 = vmax.f32 %v3242_v27, %v3243_v35 }
 0x272   :  { %v7069_v10 = vpop.permute.xlu2 %7068 }
 0x273   :  { %v3373_v0 = vmax.f32 %v3278_v3, %v3281_v55  ;;  %v3374_v49 = vmax.f32 %v3279_v58, %v3282_v56  ;;  %v3375_v4 = vmax.f32 %v3280_v37, %v3283_v11  ;;  %v6157_v32 = vrot.slane %v3372_v60, 9 }
 0x274   :  { %v7044_v25 = vpop.permute.xlu0 %7043 }
 0x275   :  { %v6158_v48 = vrot.slane %v3373_v0, 9  ;;  %v6159_v2 = vrot.slane %v3374_v49, 9  ;;  %v6160_v9 = vrot.slane %v3375_v4, 9  ;;  %v3532_v45 = vmax.f32 %v3372_v60, %v6157_v32 }
 0x276   :  { %v7046_v23 = vunpack.i.h.bf16 %v7044_v25  ;;  %v7045_v52 = vunpack.i.l.bf16 %v7044_v25 }
 0x277   :  { %v3533_v26 = vmax.f32 %v3373_v0, %v6158_v48  ;;  %v3534_v59 = vmax.f32 %v3374_v49, %v6159_v2  ;;  %v3535_v54 = vmax.f32 %v3375_v4, %v6160_v9  ;;  %v3648_v12 = vperm.slane %v3532_v45, 0 }
 0x278   :  { %v2895_v44 = vsel %vm1864_vm3, %v8320_v19, %v7046_v23  ;;  %v2894_v62 = vsel %vm1864_vm3, %v8283_v33, %v7045_v52  ;;  %v7071_v49 = vunpack.i.h.bf16 %v7069_v10  ;;  %v7070_v4 = vunpack.i.l.bf16 %v7069_v10 }
 0x279   :  { %v3649_v31 = vperm.slane %v3533_v26, 0  ;;  %v3650_v7 = vperm.slane %v3534_v59, 0  ;;  %v3651_v43 = vperm.slane %v3535_v54, 0  ;;  %v3210_v54 = vpop.f32.mrf.mxu3 }
 0x27a   :  { %v7079_v58 = vpop.permute.xlu2 %7078 }
 0x27b   :  { %v3679_v30 = vsel %vm2162_vm5, %v3649_v31, %v3648_v12 }
 0x27c   :  { %v3680_v63 = vsel %vm2164_vm6, %v3650_v7, %v3679_v30  ;;  %v7049_v28 = vpop.permute.xlu0 %7048 }
 0x27d   :  { %v3681_v24 = vsel %vm2166_vm7, %v3651_v43, %v3680_v63  ;;  %v7051_v55 = vunpack.i.h.bf16 %v7049_v28  ;;  %v7050_v56 = vunpack.i.l.bf16 %v7049_v28  ;;  %v7081_v28 = vunpack.i.h.bf16 %v7079_v58 }
 0x27e   :  { %v7054_v46 = vpop.permute.xlu1 %7053  ;;  %3711 = vst.msk [vmem:[#allocation3 + $0x11] sm:$0xf] %vm3709_vm2, %v3681_v24  ;;  %v7080_v24 = vunpack.i.l.bf16 %v7079_v58 }
 0x27f   :  { %v7056_v50 = vunpack.i.h.bf16 %v7054_v46  ;;  %v7055_v5 = vunpack.i.l.bf16 %v7054_v46  ;;  %v2845_v32 = vsel %vm1864_vm3, %v8244_v53, %v7051_v55  ;;  %v2844_v25 = vsel %vm1864_vm3, %v8252_v41, %v7050_v56 }
 0x281   :  { %v2910_v27 = vsel %vm2852_vm14, %v2894_v62, %v7055_v5  ;;  %v2911_v16 = vsel %vm2852_vm14, %v2895_v44, %v7056_v50 }
 0x282   :  { %v2926_v35 = vsel %vm2869_vm15, %v2910_v27, %v7065_v18  ;;  %v2927_v3 = vsel %vm2869_vm15, %v2911_v16, %v7066_v40  ;;  %v7084_v7 = vpop.permute.xlu2 %7083 }
 0x283   :  { %v2947_v37 = vpack.c.bf16 %v2927_v3, %v2926_v35 }
 0x284   :  { %v7089_v11 = vpop.permute.xlu0 %7088 }
 0x285   :  { %3170 = vmatmul.bf16.gmra.mxu2 %v2947_v37  ;;  %v8558_v57 = vld [vmem:[#allocation3 + $0x10] sm:$0x3f]  ;;  %v7091_v12 = vunpack.i.h.bf16 %v7089_v11  ;;  %v7090_v10 = vunpack.i.l.bf16 %v7089_v11  ;;  %v3212_v11 = vpop.f32.mrf.mxu3 }
 0x286   :  { %v7059_v19 = vpop.permute.xlu1 %7058  ;;  %3866 = vrot.lane.b32.xlu1 %v8558_v57, %s7183_s28  ;;  %3806 = vrot.lane.b32.xlu0 %v8558_v57, %s7184_s24  ;;  %v3772_v0 = vrot.slane %v8558_v57, 2  ;;  %v8575_v41 = vrot.slane %v8558_v57, 1 }
 0x287   :  { %v7061_v33 = vunpack.i.h.bf16 %v7059_v19  ;;  %v7060_v60 = vunpack.i.l.bf16 %v7059_v19  ;;  %v2897_v46 = vsel %vm1864_vm3, %v8385_v8, %v7091_v12  ;;  %v2896_v50 = vsel %vm1864_vm3, %v8323_v15, %v7090_v10 }
 0x288   :  { %4002 = vst [vmem:[#allocation1 + $0x10] ss:$2 sm:$0xff] %v3772_v0  ;;  %v3112_v59 = vpop.f32.mrf.mxu1  ;;  %v7086_v19 = vunpack.i.h.bf16 %v7084_v7 }
 0x289   :  { %v2861_v48 = vsel %vm2852_vm14, %v2844_v25, %v7060_v60  ;;  %v2862_v2 = vsel %vm2852_vm14, %v2845_v32, %v7061_v33  ;;  %v3113_v53 = vadd.f32 %v8343_v38, %v3112_v59 }
 0x28a   :  { %v2878_v9 = vsel %vm2869_vm15, %v2861_v48, %v7070_v4  ;;  %v2879_v45 = vsel %vm2869_vm15, %v2862_v2, %v7071_v49  ;;  %v3161_v31 = vpop.f32.mrf.mxu2  ;;  %v7114_v33 = vpop.permute.xlu2 %7113  ;;  %v7085_v4 = vunpack.i.l.bf16 %v7084_v7 }
 0x28b   :  { %v2946_v26 = vpack.c.bf16 %v2879_v45, %v2878_v9  ;;  %v3162_v23 = vadd.f32 %v3161_v31, %v3113_v53 }
 0x28c   :  { %v7094_v43 = vpop.permute.xlu0 %7093 }
 0x28d   :  { %3121 = vmatmul.bf16.gmra.mxu1 %v2946_v26  ;;  %v3211_v62 = vadd.f32 %v3210_v54, %v3162_v23  ;;  %v7096_v35 = vunpack.i.h.bf16 %v7094_v43  ;;  %v7095_v3 = vunpack.i.l.bf16 %v7094_v43  ;;  %v7116_v23 = vunpack.i.h.bf16 %v7114_v33 }
 0x28e   :  { %v7074_v30 = vpop.permute.xlu1 %7073  ;;  %3842 = vrot.lane.b32.xlu1 %v3772_v0, %s7185_s26  ;;  %3892 = vrot.lane.b32.xlu0 %v8575_v41, %s7184_s24 }
 0x28f   :  { %v7076_v52 = vunpack.i.h.bf16 %v7074_v30  ;;  %v7075_v63 = vunpack.i.l.bf16 %v7074_v30  ;;  %v3244_v15 = vmax.f32 %v3211_v62, 0.0  ;;  %v2847_v32 = vsel %vm1864_vm3, %v8299_v20, %v7096_v35 }
 0x290   :  { %v3114_v16 = vpop.f32.mrf.mxu1  ;;  %v2846_v25 = vsel %vm1864_vm3, %v8246_v29, %v7095_v3 }
 0x291   :  { %v2912_v5 = vsel %vm2852_vm14, %v2896_v50, %v7075_v63  ;;  %v2913_v40 = vsel %vm2852_vm14, %v2897_v46, %v7076_v52  ;;  %v3115_v58 = vadd.f32 %v8343_v38, %v3114_v16  ;;  %v3284_v45 = vrot.slane %v3244_v15, 2 }
 0x292   :  { %v2928_v18 = vsel %vm2869_vm15, %v2912_v5, %v7080_v24  ;;  %v2929_v44 = vsel %vm2869_vm15, %v2913_v40, %v7081_v28  ;;  %v3163_v8 = vpop.f32.mrf.mxu2  ;;  %v3285_v10 = vrot.slane %v3244_v15, 4  ;;  %v3286_v30 = vrot.slane %v3244_v15, 6  ;;  %v7129_v16 = vpop.permute.xlu2 %7128 }
 0x293   :  { %v2950_v27 = vpack.c.bf16 %v2929_v44, %v2928_v18  ;;  %v3164_v56 = vadd.f32 %v3163_v8, %v3115_v58  ;;  %v7115_v52 = vunpack.i.l.bf16 %v7114_v33 }
 0x294   :  { %v7099_v37 = vpop.permute.xlu0 %7098 }
 0x295   :  { %3175 = vmatmul.bf16.gmra.mxu2 %v2950_v27  ;;  %v3213_v48 = vadd.f32 %v3212_v11, %v3164_v56  ;;  %v7101_v54 = vunpack.i.h.bf16 %v7099_v37  ;;  %v7100_v12 = vunpack.i.l.bf16 %v7099_v37 }
 0x296   :  { %v7104_v55 = vpop.permute.xlu1 %7103  ;;  %3750 = vrot.lane.b32.xlu1 %v8575_v41, %s7185_s26  ;;  %3782 = vrot.lane.b32.xlu0 %v3772_v0, %s7183_s28 }
 0x297   :  { %v7106_v60 = vunpack.i.h.bf16 %v7104_v55  ;;  %v7105_v49 = vunpack.i.l.bf16 %v7104_v55  ;;  %v3245_v0 = vmax.f32 %v3213_v48, 0.0  ;;  %v2899_v18 = vsel %vm1864_vm3, %v8450_v42, %v7101_v54 }
 0x298   :  { %v2898_v44 = vsel %vm1864_vm3, %v8388_v39, %v7100_v12  ;;  %v7131_v48 = vunpack.i.h.bf16 %v7129_v16 }
 0x299   :  { %v2863_v2 = vsel %vm2852_vm14, %v2846_v25, %v7105_v49  ;;  %v2864_v9 = vsel %vm2852_vm14, %v2847_v32, %v7106_v60  ;;  %v3287_v53 = vrot.slane %v3245_v0, 2  ;;  %v3288_v20 = vrot.slane %v3245_v0, 4 }
 0x29a   :  { %v2880_v26 = vsel %vm2869_vm15, %v2863_v2, %v7085_v4  ;;  %v2881_v59 = vsel %vm2869_vm15, %v2864_v9, %v7086_v19  ;;  %v3289_v7 = vrot.slane %v3245_v0, 6  ;;  %v3376_v43 = vmax.f32 %v3244_v15, %v3245_v0 }
 0x29b   :  { %v2949_v31 = vpack.c.bf16 %v2881_v59, %v2880_v26  ;;  %v3377_v28 = vmax.f32 %v3284_v45, %v3287_v53  ;;  %v3378_v24 = vmax.f32 %v3285_v10, %v3288_v20  ;;  %v7130_v59 = vunpack.i.l.bf16 %v7129_v16 }
 0x29c   :  { %v7119_v29 = vpop.permute.xlu0 %7118  ;;  %v3379_v5 = vmax.f32 %v3286_v30, %v3289_v7  ;;  %v6161_v40 = vrot.slane %v3376_v43, 9  ;;  %v7144_v7 = vpop.permute.xlu2 %7143 }
 0x29d   :  { %3126 = vmatmul.bf16.gmra.mxu1 %v2949_v31  ;;  %v6162_v62 = vrot.slane %v3377_v28, 9  ;;  %v6163_v27 = vrot.slane %v3378_v24, 9  ;;  %v7121_v11 = vunpack.i.h.bf16 %v7119_v29  ;;  %v7120_v42 = vunpack.i.l.bf16 %v7119_v29 }
 0x29e   :  { %v7109_v63 = vpop.permute.xlu1 %7108  ;;  %v6164_v58 = vrot.slane %v3379_v5, 9  ;;  %v3536_v37 = vmax.f32 %v3376_v43, %v6161_v40 }
 0x29f   :  { %v7111_v46 = vunpack.i.h.bf16 %v7109_v63  ;;  %v7110_v50 = vunpack.i.l.bf16 %v7109_v63  ;;  %v3537_v8 = vmax.f32 %v3377_v28, %v6162_v62  ;;  %v3538_v55 = vmax.f32 %v3378_v24, %v6163_v27 }
 0x2a0   :  { %v3539_v19 = vmax.f32 %v3379_v5, %v6164_v58  ;;  %v3652_v33 = vperm.slane %v3536_v37, 0  ;;  %v2849_v0 = vsel %vm1864_vm3, %v8353_v14, %v7121_v11  ;;  %v2848_v54 = vsel %vm1864_vm3, %v8285_v47, %v7120_v42 }
 0x2a1   :  { %v2915_v35 = vsel %vm2852_vm14, %v2899_v18, %v7111_v46  ;;  %v2914_v3 = vsel %vm2852_vm14, %v2898_v44, %v7110_v50  ;;  %v3653_v39 = vperm.slane %v3537_v8, 0  ;;  %v3654_v60 = vperm.slane %v3538_v55, 0 }
 0x2a2   :  { %v2930_v15 = vsel %vm2869_vm15, %v2914_v3, %v7115_v52  ;;  %v2931_v56 = vsel %vm2869_vm15, %v2915_v35, %v7116_v23  ;;  %v3655_v4 = vperm.slane %v3539_v19, 0  ;;  %v7146_v52 = vunpack.i.h.bf16 %v7144_v7 }
 0x2a3   :  { %v2953_v49 = vpack.c.bf16 %v2931_v56, %v2930_v15  ;;  %v3682_v32 = vsel %vm2162_vm5, %v3653_v39, %v3652_v33  ;;  %v7145_v63 = vunpack.i.l.bf16 %v7144_v7 }
 0x2a4   :  { %v7134_v2 = vpop.permute.xlu0 %7133  ;;  %v3683_v9 = vsel %vm2164_vm6, %v3654_v60, %v3682_v32  ;;  %v7159_v27 = vpop.permute.xlu2 %7158 }
 0x2a5   :  { %3180 = vmatmul.bf16.gmra.mxu2 %v2953_v49  ;;  %v3684_v12 = vsel %vm2166_vm7, %v3655_v4, %v3683_v9  ;;  %v7136_v29 = vunpack.i.h.bf16 %v7134_v2  ;;  %v7135_v30 = vunpack.i.l.bf16 %v7134_v2  ;;  %v7161_v58 = vunpack.i.h.bf16 %v7159_v27  ;;  %v3215_v4 = vpop.f32.mrf.mxu3 }
 0x2a6   :  { %v7124_v25 = vpop.permute.xlu1 %7123  ;;  %3712 = vst.msk [vmem:[#allocation3 + $0x19] sm:$0xf] %vm3709_vm2, %v3684_v12  ;;  %v7160_v37 = vunpack.i.l.bf16 %v7159_v27 }
 0x2a7   :  { %v7126_v45 = vunpack.i.h.bf16 %v7124_v25  ;;  %v7125_v26 = vunpack.i.l.bf16 %v7124_v25  ;;  %v2901_v28 = vsel %vm1864_vm3, %v8492_v61, %v7136_v29  ;;  %v2900_v24 = vsel %vm1864_vm3, %v8453_v21, %v7135_v30 }
 0x2a9   :  { %v2865_v10 = vsel %vm2852_vm14, %v2848_v54, %v7125_v26  ;;  %v2866_v31 = vsel %vm2852_vm14, %v2849_v0, %v7126_v45 }
 0x2aa   :  { %v2882_v53 = vsel %vm2869_vm15, %v2865_v10, %v7130_v59  ;;  %v2883_v20 = vsel %vm2869_vm15, %v2866_v31, %v7131_v48 }
 0x2ab   :  { %v2952_v43 = vpack.c.bf16 %v2883_v20, %v2882_v53 }
 0x2ac   :  { %v7149_v50 = vpop.permute.xlu0 %7148  ;;  %v3747_v48 = vpop.permute.xlu2 %3746 }
 0x2ad   :  { %3131 = vmatmul.bf16.gmra.mxu1 %v2952_v43  ;;  %v8624_v46 = vld [vmem:[#allocation3 + $0x18] sm:$0x3f]  ;;  %v7151_v62 = vunpack.i.h.bf16 %v7149_v50  ;;  %v7150_v21 = vunpack.i.l.bf16 %v7149_v50  ;;  %v3217_v0 = vpop.f32.mrf.mxu3 }
 0x2ae   :  { %v7139_v14 = vpop.permute.xlu1 %7138  ;;  %3808 = vrot.lane.b32.xlu1 %v8624_v46, %s7184_s24  ;;  %3868 = vrot.lane.b32.xlu2 %v8624_v46, %s7183_s28  ;;  %v8645_v39 = vrot.slane %v8624_v46, 1 }
 0x2af   :  { %v7141_v23 = vunpack.i.h.bf16 %v7139_v14  ;;  %v7140_v47 = vunpack.i.l.bf16 %v7139_v14  ;;  %v2851_v8 = vsel %vm1864_vm3, %v8416_v34, %v7151_v62  ;;  %v2850_v55 = vsel %vm1864_vm3, %v8360_v1, %v7150_v21 }
 0x2b0   :  { %v3773_v34 = vrot.slane %v8624_v46, 2 }
 0x2b1   :  { %v2917_v5 = vsel %vm2852_vm14, %v2901_v28, %v7141_v23  ;;  %v2916_v40 = vsel %vm2852_vm14, %v2900_v24, %v7140_v47 }
 0x2b2   :  { %v2932_v18 = vsel %vm2869_vm15, %v2916_v40, %v7145_v63  ;;  %v2933_v61 = vsel %vm2869_vm15, %v2917_v5, %v7146_v52  ;;  %4004 = vst [vmem:[#allocation1 + $0x11] ss:$2 sm:$0xff] %v3773_v34 }
 0x2b3   :  { %v2956_v44 = vpack.c.bf16 %v2933_v61, %v2932_v18 }
 0x2b4   :  { %v3755_v43 = vpop.permute.xlu2 %3754 }
 0x2b5   :  { %3185 = vmatmul.bf16.gmra.mxu2 %v2956_v44  ;;  %v3922_v47 = vsel %vm1864_vm3, %v8527_v22, %v3755_v43 }
 0x2b6   :  { %v7154_v16 = vpop.permute.xlu1 %7153  ;;  %v3166_v60 = vpop.f32.mrf.mxu2  ;;  %3894 = vrot.lane.b32.xlu1 %v8645_v39, %s7184_s24  ;;  %3844 = vrot.lane.b32.xlu2 %v3773_v34, %s7185_s26 }
 0x2b7   :  { %v7156_v35 = vunpack.i.h.bf16 %v7154_v16  ;;  %v7155_v3 = vunpack.i.l.bf16 %v7154_v16 }
 0x2b9   :  { %v2868_v15 = vsel %vm2852_vm14, %v2851_v8, %v7156_v35  ;;  %v2867_v56 = vsel %vm2852_vm14, %v2850_v55, %v7155_v3 }
 0x2ba   :  { %v2884_v11 = vsel %vm2869_vm15, %v2867_v56, %v7160_v37  ;;  %v2885_v42 = vsel %vm2869_vm15, %v2868_v15, %v7161_v58 }
 0x2bb   :  { %v2955_v19 = vpack.c.bf16 %v2885_v42, %v2884_v11 }
 0x2bc   :  { %v3117_v49 = vpop.f32.mrf.mxu1 }
 0x2bd   :  { %3136 = vmatmul.bf16.gmra.mxu1 %v2955_v19  ;;  %v3118_v1 = vadd.f32 %v8343_v38, %v3117_v49 }
 0x2be   :  { %v8642_v33 = vpop.permute.xlu1 %3872  ;;  %3784 = vrot.lane.b32.xlu1 %v3773_v34, %s7183_s28  ;;  %3752 = vrot.lane.b32.xlu2 %v8645_v39, %s7185_s26  ;;  %v3168_v26 = vpop.f32.mrf.mxu2 }
 0x2bf   :  { %v3167_v32 = vadd.f32 %v3166_v60, %v3118_v1  ;;  %v3918_v60 = vsel %vm1864_vm3, %v8516_v17, %v3747_v48  ;;  %v3220_v1 = vpop.f32.mrf.mxu3 }
 0x2c1   :  { %v3216_v2 = vadd.f32 %v3215_v4, %v3167_v32 }
 0x2c3   :  { %v3246_v54 = vmax.f32 %v3216_v2, 0.0 }
 0x2c4   :  { %v3119_v9 = vpop.f32.mrf.mxu1 }
 0x2c5   :  { %v3120_v45 = vadd.f32 %v8343_v38, %v3119_v9  ;;  %v3290_v53 = vrot.slane %v3246_v54, 2  ;;  %v3291_v20 = vrot.slane %v3246_v54, 4  ;;  %v3292_v7 = vrot.slane %v3246_v54, 6  ;;  %v8660_v38 = vpop.permute.xlu0 %3898 }
 0x2c6   :  { %v3779_v25 = vpop.permute.xlu1 %3778 }
 0x2c7   :  { %v3169_v59 = vadd.f32 %v3168_v26, %v3120_v45  ;;  %v3926_v32 = vsel %vm2852_vm14, %v3918_v60, %v3779_v25  ;;  %v3805_v26 = vpop.permute.xlu2 %3804 }
 0x2c9   :  { %v3218_v12 = vadd.f32 %v3217_v0, %v3169_v59  ;;  %v3917_v0 = vrot.slane %v8510_v51, 2 }
 0x2cb   :  { %v3247_v31 = vmax.f32 %v3218_v12, 0.0 }
 0x2cd   :  { %v3293_v29 = vrot.slane %v3247_v31, 2  ;;  %v3294_v30 = vrot.slane %v3247_v31, 4  ;;  %v3295_v14 = vrot.slane %v3247_v31, 6  ;;  %v3380_v23 = vmax.f32 %v3246_v54, %v3247_v31  ;;  %v8666_v37 = vpop.permute.xlu0 %3906  ;;  %v8703_v31 = vld [vmem:[%s9742_s4] ss:$0 sm:$0xff] }
 0x2ce   :  { %v8656_v10 = vpop.permute.xlu1 %3880  ;;  %v3934_v54 = vsel %vm2869_vm15, %v3926_v32, %v3805_v26 }
 0x2cf   :  { %v3381_v52 = vmax.f32 %v3290_v53, %v3293_v29  ;;  %v3382_v63 = vmax.f32 %v3291_v20, %v3294_v30  ;;  %v3383_v28 = vmax.f32 %v3292_v7, %v3295_v14  ;;  %v6165_v24 = vrot.slane %v3380_v23, 9 }
 0x2d1   :  { %v6166_v50 = vrot.slane %v3381_v52, 9  ;;  %v6167_v5 = vrot.slane %v3382_v63, 9  ;;  %v6168_v40 = vrot.slane %v3383_v28, 9  ;;  %v3540_v18 = vmax.f32 %v3380_v23, %v6165_v24 }
 0x2d3   :  { %v3541_v62 = vmax.f32 %v3381_v52, %v6166_v50  ;;  %v3542_v21 = vmax.f32 %v3382_v63, %v6167_v5  ;;  %v3543_v27 = vmax.f32 %v3383_v28, %v6168_v40  ;;  %v3656_v16 = vperm.slane %v3540_v18, 0 }
 0x2d5   :  { %v3657_v35 = vperm.slane %v3541_v62, 0  ;;  %v3658_v22 = vperm.slane %v3542_v21, 0  ;;  %v3659_v3 = vperm.slane %v3543_v27, 0  ;;  %v3841_v56 = vpop.permute.xlu0 %3840 }
 0x2d6   :  { %v3787_v61 = vpop.permute.xlu1 %3786  ;;  %v3942_v4 = vsel %vm1864_vm3, %v3739_v6, %v3841_v56  ;;  %v3222_v6 = vpop.f32.mrf.mxu3 }
 0x2d7   :  { %v8663_v44 = vsel %vm2852_vm14, %v3922_v47, %v3787_v61  ;;  %v3685_v58 = vsel %vm2162_vm5, %v3657_v35, %v3656_v16 }
 0x2d8   :  { %v3686_v8 = vsel %vm2164_vm6, %v3658_v22, %v3685_v58 }
 0x2d9   :  { %v3687_v55 = vsel %vm2166_vm7, %v3659_v3, %v3686_v8 }
 0x2da   :  { %3713 = vst.msk [vmem:[#allocation3 + $0x21] sm:$0xf] %vm3709_vm2, %v3687_v55 }
 0x2dd   :  { %v8683_v19 = vpop.permute.xlu0 %3748 }
 0x2de   :  { %v3225_v30 = vpop.f32.mrf.mxu3 }
 0x2e1   :  { %v8671_v15 = vld [vmem:[#allocation3 + $0x20] sm:$0x3f] }
 0x2e2   :  { %3810 = vrot.lane.b32.xlu2 %v8671_v15, %s7184_s24  ;;  %3870 = vrot.lane.b32.xlu0 %v8671_v15, %s7183_s28  ;;  %v3838_v11 = vrot.slane %v8671_v15, 2  ;;  %v3828_v42 = vrot.slane %v8671_v15, 1 }
 0x2e4   :  { %4010 = vst [vmem:[#allocation1 + $0x30] ss:$2 sm:$0xff] %v3838_v11 }
 0x2e6   :  { %v3227_v58 = vpop.f32.mrf.mxu3 }
 0x2ea   :  { %3896 = vrot.lane.b32.xlu2 %v3828_v42, %s7184_s24  ;;  %3846 = vrot.lane.b32.xlu0 %v3838_v11, %s7185_s26 }
 0x2eb   :  { %v8698_v48 = vld.sshfl [vmem:[#allocation1 + $0x30] sm:$0xff pattern:$0x75316420] }
 0x2ec   :  { %4026 = vst [vmem:[#allocation1 + $0x31] ss:$2 sm:$0xff] %v3917_v0 }
 0x2f8   :  { %v8685_v34 = vpop.permute.xlu0 %3806  ;;  %v3867_v49 = vpop.permute.xlu1 %3866 }
 0x2f9   :  { %v3950_v2 = vsel %vm2852_vm14, %v3942_v4, %v3867_v49 }
 0x300   :  { %v3893_v9 = vpop.permute.xlu0 %3892  ;;  %v8707_v47 = vpop.permute.xlu1 %3842 }
 0x301   :  { %v3958_v45 = vsel %vm2869_vm15, %v3950_v2, %v3893_v9 }
 0x302   :  { %v3982_v59 = vrot.slane %v3958_v45, 4 }
 0x304   :  { %v3990_v17 = vsel %vm371_vm0, %v3934_v54, %v3982_v59 }
 0x305   :  { %3998 = vst [vmem:[#allocation1] ss:$2 sm:$0xff] %v3990_v17 }
 0x308   :  { %v3171_v12 = vpop.f32.mrf.mxu2 }
 0x30a   :  { %v3122_v25 = vpop.f32.mrf.mxu1 }
 0x30b   :  { %v3123_v53 = vadd.f32 %v8703_v31, %v3122_v25 }
 0x30d   :  { %v3172_v20 = vadd.f32 %v3171_v12, %v3123_v53 }
 0x30f   :  { %v3221_v7 = vadd.f32 %v3220_v1, %v3172_v20  ;;  %v8710_v1 = vpop.permute.xlu1 %3750  ;;  %v3781_v20 = vpop.permute.xlu2 %3780 }
 0x310   :  { %v3173_v51 = vpop.f32.mrf.mxu2 }
 0x311   :  { %v3248_v23 = vmax.f32 %v3221_v7, 0.0 }
 0x312   :  { %v3124_v43 = vpop.f32.mrf.mxu1 }
 0x313   :  { %v3125_v29 = vadd.f32 %v8703_v31, %v3124_v43  ;;  %v3296_v24 = vrot.slane %v3248_v23, 2  ;;  %v3297_v50 = vrot.slane %v3248_v23, 4  ;;  %v3298_v5 = vrot.slane %v3248_v23, 6  ;;  %v3230_v43 = vpop.f32.mrf.mxu3 }
 0x315   :  { %v3174_v14 = vadd.f32 %v3173_v51, %v3125_v29 }
 0x317   :  { %v3223_v52 = vadd.f32 %v3222_v6, %v3174_v14 }
 0x318   :  { %v3176_v63 = vpop.f32.mrf.mxu2 }
 0x319   :  { %v3249_v28 = vmax.f32 %v3223_v52, 0.0 }
 0x31a   :  { %v3127_v40 = vpop.f32.mrf.mxu1 }
 0x31b   :  { %v3299_v18 = vrot.slane %v3249_v28, 2  ;;  %v3300_v61 = vrot.slane %v3249_v28, 4  ;;  %v3301_v62 = vrot.slane %v3249_v28, 6  ;;  %v3384_v21 = vmax.f32 %v3248_v23, %v3249_v28 }
 0x31c   :  { %v3128_v27 = vadd.f32 %v8703_v31, %v3127_v40 }
 0x31d   :  { %v3385_v16 = vmax.f32 %v3296_v24, %v3299_v18  ;;  %v3386_v35 = vmax.f32 %v3297_v50, %v3300_v61  ;;  %v3387_v22 = vmax.f32 %v3298_v5, %v3301_v62  ;;  %v6169_v3 = vrot.slane %v3384_v21, 9 }
 0x31e   :  { %v3177_v8 = vadd.f32 %v3176_v63, %v3128_v27 }
 0x31f   :  { %v6170_v55 = vrot.slane %v3385_v16, 9  ;;  %v6171_v56 = vrot.slane %v3386_v35, 9  ;;  %v6172_v11 = vrot.slane %v3387_v22, 9  ;;  %v3544_v60 = vmax.f32 %v3384_v21, %v6169_v3 }
 0x320   :  { %v3178_v49 = vpop.f32.mrf.mxu2  ;;  %v3226_v9 = vadd.f32 %v3225_v30, %v3177_v8  ;;  %v8717_v14 = vpop.permute.xlu1 %3808 }
 0x321   :  { %v3545_v4 = vmax.f32 %v3385_v16, %v6170_v55  ;;  %v3546_v32 = vmax.f32 %v3386_v35, %v6171_v56  ;;  %v3547_v2 = vmax.f32 %v3387_v22, %v6172_v11  ;;  %v3660_v26 = vperm.slane %v3544_v60, 0  ;;  %v3869_v35 = vpop.permute.xlu2 %3868 }
 0x322   :  { %v3129_v45 = vpop.f32.mrf.mxu1  ;;  %v3250_v53 = vmax.f32 %v3226_v9, 0.0  ;;  %v3919_v56 = vsel %vm1864_vm3, %v8522_v36, %v8683_v19  ;;  %v3943_v60 = vsel %vm1864_vm3, %v8575_v41, %v8707_v47  ;;  %v3232_v9 = vpop.f32.mrf.mxu3 }
 0x323   :  { %v3661_v59 = vperm.slane %v3545_v4, 0  ;;  %v3662_v0 = vperm.slane %v3546_v32, 0  ;;  %v3130_v54 = vadd.f32 %v8703_v31, %v3129_v45  ;;  %v3663_v17 = vperm.slane %v3547_v2, 0 }
 0x324   :  { %v3302_v23 = vrot.slane %v3250_v53, 2  ;;  %v3303_v52 = vrot.slane %v3250_v53, 4  ;;  %v3304_v63 = vrot.slane %v3250_v53, 6  ;;  %v3951_v45 = vsel %vm2852_vm14, %v3943_v60, %v3869_v35 }
 0x325   :  { %v3688_v12 = vsel %vm2162_vm5, %v3661_v59, %v3660_v26  ;;  %v3179_v6 = vadd.f32 %v3178_v49, %v3130_v54 }
 0x326   :  { %v3689_v25 = vsel %vm2164_vm6, %v3662_v0, %v3688_v12  ;;  %v3927_v12 = vsel %vm2852_vm14, %v3919_v56, %v3781_v20 }
 0x327   :  { %v3690_v51 = vsel %vm2166_vm7, %v3663_v17, %v3689_v25  ;;  %v3228_v7 = vadd.f32 %v3227_v58, %v3179_v6 }
 0x328   :  { %3714 = vst.msk [vmem:[#allocation3 + $0x39] sm:$0xf] %vm3709_vm2, %v3690_v51  ;;  %v3181_v30 = vpop.f32.mrf.mxu2  ;;  %v3895_v17 = vpop.permute.xlu1 %3894  ;;  %v3935_v51 = vsel %vm2869_vm15, %v3927_v12, %v8685_v34  ;;  %v6828_v34 = vld [vmem:[%s9741_s3 + $0x108] sm:$0xff] }
 0x329   :  { %v3251_v29 = vmax.f32 %v3228_v7, 0.0  ;;  %v3959_v41 = vsel %vm2869_vm15, %v3951_v45, %v3895_v17  ;;  %4187 = vmatpush.bf16.msra.mxu1 %v6828_v34  ;;  %v6818_v45 = vld [vmem:[%s9741_s3 + $0xb8] sm:$0xff] }
 0x32a   :  { %v3132_v28 = vpop.f32.mrf.mxu1  ;;  %v3235_v35 = vpop.f32.mrf.mxu3 }
 0x32b   :  { %v3305_v24 = vrot.slane %v3251_v29, 2  ;;  %v3306_v50 = vrot.slane %v3251_v29, 4  ;;  %v3307_v5 = vrot.slane %v3251_v29, 6  ;;  %v3388_v40 = vmax.f32 %v3250_v53, %v3251_v29 }
 0x32c   :  { %v3133_v18 = vadd.f32 %v8703_v31, %v3132_v28  ;;  %v3983_v53 = vrot.slane %v3959_v41, 4 }
 0x32d   :  { %v3389_v61 = vmax.f32 %v3302_v23, %v3305_v24  ;;  %v3390_v62 = vmax.f32 %v3303_v52, %v3306_v50  ;;  %v3391_v21 = vmax.f32 %v3304_v63, %v3307_v5  ;;  %v6173_v27 = vrot.slane %v3388_v40, 9  ;;  %v6820_v52 = vld [vmem:[%s9741_s3 + $0xc8] sm:$0xff] }
 0x32e   :  { %v3182_v16 = vadd.f32 %v3181_v30, %v3133_v18  ;;  %v3991_v23 = vsel %vm371_vm0, %v3935_v51, %v3983_v53  ;;  %4168 = vmatpush.bf16.msrb.mxu3 %v6820_v52  ;;  %v6819_v18 = vld [vmem:[%s9741_s3 + $0xc0] sm:$0xff] }
 0x32f   :  { %v6174_v22 = vrot.slane %v3389_v61, 9  ;;  %v6175_v3 = vrot.slane %v3390_v62, 9  ;;  %v6176_v58 = vrot.slane %v3391_v21, 9  ;;  %v3548_v8 = vmax.f32 %v3388_v40, %v6173_v27  ;;  %v8720_v55 = vld [vmem:[#allocation3 + $0x38] sm:$0x3f] }
 0x330   :  { %3812 = vrot.lane.b32.xlu2 %v8720_v55, %s7184_s24  ;;  %v3775_v11 = vrot.slane %v8720_v55, 2  ;;  %v3183_v2 = vpop.f32.mrf.mxu2  ;;  %v3231_v26 = vadd.f32 %v3230_v43, %v3182_v16  ;;  %v3743_v20 = vrot.slane %v8720_v55, 1  ;;  %4000 = vst [vmem:[#allocation1 + $0x1] ss:$2 sm:$0xff] %v3991_v23  ;;  %v6827_v16 = vld [vmem:[%s9741_s3 + $0x100] sm:$0xff] }
 0x331   :  { %v3549_v49 = vmax.f32 %v3389_v61, %v6174_v22  ;;  %v3550_v4 = vmax.f32 %v3390_v62, %v6175_v3  ;;  %v3551_v32 = vmax.f32 %v3391_v21, %v6176_v58  ;;  %v3664_v36 = vperm.slane %v3548_v8, 0  ;;  %4188 = vmatpush.bf16.msra.mxu1 %v6827_v16 }
 0x332   :  { %v3134_v59 = vpop.f32.mrf.mxu1  ;;  %3848 = vrot.lane.b32.xlu0 %v3775_v11, %s7185_s26  ;;  %v3252_v43 = vmax.f32 %v3231_v26, 0.0  ;;  %4169 = vmatpush.bf16.msrb.mxu3 %v6819_v18  ;;  %v3237_v52 = vpop.f32.mrf.mxu3 }
 0x333   :  { %v3665_v19 = vperm.slane %v3549_v49, 0  ;;  %v3666_v0 = vperm.slane %v3550_v4, 0  ;;  %v3135_v54 = vadd.f32 %v8703_v31, %v3134_v59  ;;  %v3667_v47 = vperm.slane %v3551_v32, 0 }
 0x334   :  { %v3308_v28 = vrot.slane %v3252_v43, 2  ;;  %v3309_v24 = vrot.slane %v3252_v43, 4  ;;  %v3310_v50 = vrot.slane %v3252_v43, 6 }
 0x335   :  { %v3691_v6 = vsel %vm2162_vm5, %v3665_v19, %v3664_v36  ;;  %v3184_v25 = vadd.f32 %v3183_v2, %v3135_v54  ;;  %v6826_v19 = vld [vmem:[%s9741_s3 + $0xf8] sm:$0xff] }
 0x336   :  { %v3692_v7 = vsel %vm2164_vm6, %v3666_v0, %v3691_v6  ;;  %v8773_v0 = vld.sshfl [vmem:[#allocation1 + $0x10] sm:$0xff pattern:$0x75316420]  ;;  %4170 = vmatpush.bf16.msrb.mxu3 %v6818_v45  ;;  %4189 = vmatpush.bf16.msra.mxu1 %v6826_v19 }
 0x337   :  { %v3693_v29 = vsel %vm2166_vm7, %v3667_v47, %v3692_v7  ;;  %v3233_v30 = vadd.f32 %v3232_v9, %v3184_v25  ;;  %v6817_v47 = vld [vmem:[%s9741_s3 + $0xb0] sm:$0xff]  ;;  %v4013_v15 = vld.sshfl [vmem:[#allocation1] sm:$0xff pattern:$0x75316420] }
 0x338   :  { %3715 = vst.msk [vmem:[#allocation3 + $0x41] sm:$0xf] %vm3709_vm2, %v3693_v29  ;;  %3788 = vrot.lane.b32.xlu2 %v3775_v11, %s7183_s28  ;;  %v3186_v5 = vpop.f32.mrf.mxu2  ;;  %v8761_v11 = vpop.permute.xlu2 %3844  ;;  %v6825_v7 = vld [vmem:[%s9741_s3 + $0xf0] sm:$0xff] }
 0x339   :  { %v3253_v63 = vmax.f32 %v3233_v30, 0.0 }
 0x33a   :  { %v3137_v40 = vpop.f32.mrf.mxu1  ;;  %3756 = vrot.lane.b32.xlu0 %v3743_v20, %s7185_s26  ;;  %4171 = vmatpush.bf16.msrb.mxu3 %v6817_v47 }
 0x33b   :  { %v3311_v61 = vrot.slane %v3253_v63, 2  ;;  %v3312_v62 = vrot.slane %v3253_v63, 4  ;;  %v3313_v21 = vrot.slane %v3253_v63, 6  ;;  %v3392_v27 = vmax.f32 %v3252_v43, %v3253_v63  ;;  %4190 = vmatpush.bf16.msra.mxu1 %v6825_v7  ;;  %v6821_v7 = vld [vmem:[%s9741_s3 + $0xd0] sm:$0xff] }
 0x33c   :  { %v3138_v22 = vadd.f32 %v8703_v31, %v3137_v40 }
 0x33d   :  { %v3393_v3 = vmax.f32 %v3308_v28, %v3311_v61  ;;  %v3394_v58 = vmax.f32 %v3309_v24, %v3312_v62  ;;  %v3395_v8 = vmax.f32 %v3310_v50, %v3313_v21  ;;  %v6177_v56 = vrot.slane %v3392_v27, 9  ;;  %v6816_v50 = vld [vmem:[%s9741_s3 + $0xa8] sm:$0xff]  ;;  %v6815_v21 = vld [vmem:[%s9741_s3 + $0xa0] sm:$0xff] }
 0x33e   :  { %v3187_v60 = vadd.f32 %v3186_v5, %v3138_v22  ;;  %v6824_v5 = vld [vmem:[%s9741_s3 + $0xe8] sm:$0xff]  ;;  %4172 = vmatpush.bf16.msrb.mxu3 %v6816_v50 }
 0x33f   :  { %v6178_v49 = vrot.slane %v3393_v3, 9  ;;  %v6179_v4 = vrot.slane %v3394_v58, 9  ;;  %v6180_v32 = vrot.slane %v3395_v8, 9  ;;  %v3552_v2 = vmax.f32 %v3392_v27, %v6177_v56  ;;  %v8763_v9 = vld [vmem:[#allocation3 + $0x40] sm:$0x3f]  ;;  %4191 = vmatpush.bf16.msra.mxu1 %v6824_v5 }
 0x340   :  { %3874 = vrot.lane.b32.xlu1 %v8763_v9, %s7183_s28  ;;  %v3236_v54 = vadd.f32 %v3235_v35, %v3187_v60  ;;  %v8776_v12 = vrot.slane %v8763_v9, 1  ;;  %v3776_v41 = vrot.slane %v8763_v9, 2  ;;  %v3188_v43 = vpop.f32.mrf.mxu2  ;;  %v8791_v24 = vpop.permute.xlu2 %3752 }
 0x341   :  { %v3553_v26 = vmax.f32 %v3393_v3, %v6178_v49  ;;  %v3554_v59 = vmax.f32 %v3394_v58, %v6179_v4  ;;  %v3555_v36 = vmax.f32 %v3395_v8, %v6180_v32  ;;  %v3668_v6 = vperm.slane %v3552_v2, 0  ;;  %v6823_v3 = vld [vmem:[%s9741_s3 + $0xe0] sm:$0xff]  ;;  %v6814_v49 = vld [vmem:[%s9741_s3 + $0x98] sm:$0xff] }
 0x342   :  { %v3139_v17 = vpop.f32.mrf.mxu1  ;;  %3900 = vrot.lane.b32.xlu0 %v8776_v12, %s7184_s24  ;;  %4021 = vst [vmem:[#allocation1 + $0x10] ss:$2 sm:$0xff] %v3776_v41  ;;  %v3254_v63 = vmax.f32 %v3236_v54, 0.0  ;;  %4173 = vmatpush.bf16.msrb.mxu3 %v6815_v21  ;;  %v3783_v54 = vpop.permute.xlu0 %3782 }
 0x343   :  { %v3669_v25 = vperm.slane %v3553_v26, 0  ;;  %v3670_v53 = vperm.slane %v3554_v59, 0  ;;  %v3140_v51 = vadd.f32 %v8703_v31, %v3139_v17  ;;  %v3671_v29 = vperm.slane %v3555_v36, 0  ;;  %4192 = vmatpush.bf16.msra.mxu1 %v6823_v3  ;;  %v6822_v59 = vld [vmem:[%s9741_s3 + $0xd8] sm:$0xff] }
 0x344   :  { %v3314_v18 = vrot.slane %v3254_v63, 2  ;;  %v3315_v61 = vrot.slane %v3254_v63, 4  ;;  %v3316_v62 = vrot.slane %v3254_v63, 6 }
 0x345   :  { %v3694_v30 = vsel %vm2162_vm5, %v3669_v25, %v3668_v6  ;;  %v3189_v23 = vadd.f32 %v3188_v43, %v3140_v51  ;;  %v6813_v6 = vld [vmem:[%s9741_s3 + $0x90] sm:$0xff] }
 0x346   :  { %v3695_v34 = vsel %vm2164_vm6, %v3670_v53, %v3694_v30  ;;  %4174 = vmatpush.bf16.msrb.mxu3 %v6814_v49 }
 0x347   :  { %v3696_v31 = vsel %vm2166_vm7, %v3671_v29, %v3695_v34  ;;  %v3238_v28 = vadd.f32 %v3237_v52, %v3189_v23  ;;  %4193 = vmatpush.bf16.msra.mxu1 %v6822_v59  ;;  %v3920_v34 = vsel %vm1864_vm3, %v8558_v57, %v8710_v1  ;;  %v3785_v1 = vpop.permute.xlu1 %3784 }
 0x348   :  { %3716 = vst.msk [vmem:[#allocation3 + $0x49] sm:$0xf] %vm3709_vm2, %v3696_v31  ;;  %3850 = vrot.lane.b32.xlu1 %v3776_v41, %s7185_s26  ;;  %v3811_v36 = vpop.permute.xlu2 %3810 }
 0x349   :  { %v3255_v40 = vmax.f32 %v3238_v28, 0.0 }
 0x34a   :  { %3790 = vrot.lane.b32.xlu0 %v3776_v41, %s7183_s28  ;;  %4175 = vmatpush.bf16.msrb.mxu3 %v6813_v6 }
 0x34b   :  { %v3317_v27 = vrot.slane %v3255_v40, 2  ;;  %v3318_v16 = vrot.slane %v3255_v40, 4  ;;  %v3319_v35 = vrot.slane %v3255_v40, 6  ;;  %v3396_v22 = vmax.f32 %v3254_v63, %v3255_v40  ;;  %4194 = vmatpush.bf16.msra.mxu1 %v6821_v7 }
 0x34c   :  { %v3944_v63 = vsel %vm1864_vm3, %v8645_v39, %v8761_v11  ;;  %v3928_v40 = vsel %vm2852_vm14, %v3920_v34, %v3783_v54 }
 0x34d   :  { %v3397_v58 = vmax.f32 %v3314_v18, %v3317_v27  ;;  %v3398_v8 = vmax.f32 %v3315_v61, %v3318_v16  ;;  %v3399_v56 = vmax.f32 %v3316_v62, %v3319_v35  ;;  %v6181_v60 = vrot.slane %v3396_v22, 9 }
 0x34e   :  { %v3936_v61 = vsel %vm2869_vm15, %v3928_v40, %v8717_v14  ;;  %v3921_v14 = vsel %vm1864_vm3, %v8624_v46, %v8791_v24 }
 0x34f   :  { %v6182_v4 = vrot.slane %v3397_v58, 9  ;;  %v6183_v32 = vrot.slane %v3398_v8, 9  ;;  %v6184_v2 = vrot.slane %v3399_v56, 9  ;;  %v3556_v45 = vmax.f32 %v3396_v22, %v6181_v60  ;;  %v8811_v26 = vld [vmem:[#allocation3 + $0x48] sm:$0x3f] }
 0x350   :  { %3758 = vrot.lane.b32.xlu1 %v8776_v12, %s7185_s26  ;;  %3876 = vrot.lane.b32.xlu2 %v8811_v26, %s7183_s28  ;;  %v3777_v19 = vrot.slane %v8811_v26, 2  ;;  %v8830_v23 = vrot.slane %v8811_v26, 1  ;;  %v3897_v28 = vpop.permute.xlu2 %3896  ;;  %v3929_v27 = vsel %vm2852_vm14, %v3921_v14, %v3785_v1 }
 0x351   :  { %v3557_v17 = vmax.f32 %v3397_v58, %v6182_v4  ;;  %v3558_v41 = vmax.f32 %v3398_v8, %v6183_v32  ;;  %v3559_v47 = vmax.f32 %v3399_v56, %v6184_v2  ;;  %v3672_v25 = vperm.slane %v3556_v45, 0 }
 0x352   :  { %4022 = vst [vmem:[#allocation1 + $0x11] ss:$2 sm:$0xff] %v3777_v19  ;;  %v3937_v3 = vsel %vm2869_vm15, %v3929_v27, %v3811_v36 }
 0x353   :  { %v3673_v53 = vperm.slane %v3557_v17, 0  ;;  %v3674_v51 = vperm.slane %v3558_v41, 0  ;;  %v3675_v43 = vperm.slane %v3559_v47, 0 }
 0x354   :  { %v3871_v31 = vpop.permute.xlu0 %3870 }
 0x355   :  { %v3697_v29 = vsel %vm2162_vm5, %v3673_v53, %v3672_v25  ;;  %v3952_v50 = vsel %vm2852_vm14, %v3944_v63, %v3871_v31 }
 0x356   :  { %v3698_v30 = vsel %vm2164_vm6, %v3674_v51, %v3697_v29  ;;  %v3960_v5 = vsel %vm2869_vm15, %v3952_v50, %v3897_v28 }
 0x357   :  { %v3699_v52 = vsel %vm2166_vm7, %v3675_v43, %v3698_v30  ;;  %v3984_v18 = vrot.slane %v3960_v5, 4  ;;  %v6829_v43 = vld [vmem:[%s9741_s3 + $0x110] sm:$0xff] }
 0x358   :  { %3717 = vst.msk [vmem:[#allocation3 + $0x51] sm:$0xf] %vm3709_vm2, %v3699_v52  ;;  %3902 = vrot.lane.b32.xlu1 %v8830_v23, %s7184_s24  ;;  %3852 = vrot.lane.b32.xlu2 %v3777_v19, %s7185_s26 }
 0x359   :  { %v3992_v62 = vsel %vm371_vm0, %v3936_v61, %v3984_v18 }
 0x35a   :  { %4006 = vst [vmem:[#allocation1 + $0x20] ss:$2 sm:$0xff] %v3992_v62 }
 0x35c   :  { %v3847_v11 = vpop.permute.xlu0 %3846 }
 0x35d   :  { %v3945_v21 = vsel %vm1864_vm3, %v3828_v42, %v3847_v11 }
 0x35e   :  { %v3953_v16 = vsel %vm2852_vm14, %v3945_v21, %v8642_v33  ;;  %v4014_v33 = vld.sshfl [vmem:[#allocation1 + $0x8] sm:$0xff pattern:$0x75316420] }
 0x35f   :  { %v8849_v57 = vld [vmem:[#allocation3 + $0x50] sm:$0x3f]  ;;  %v3961_v35 = vsel %vm2869_vm15, %v3953_v16, %v8660_v38 }
 0x360   :  { %3792 = vrot.lane.b32.xlu1 %v3777_v19, %s7183_s28  ;;  %3760 = vrot.lane.b32.xlu2 %v8830_v23, %s7185_s26  ;;  %v3839_v39 = vrot.slane %v8849_v57, 2  ;;  %v3985_v22 = vrot.slane %v3961_v35, 4  ;;  %v3829_v58 = vrot.slane %v8849_v57, 1 }
 0x361   :  { %3878 = vrot.lane.b32.xlu0 %v8849_v57, %s7183_s28 }
 0x362   :  { %4025 = vst [vmem:[#allocation1 + $0x30] ss:$2 sm:$0xff] %v3839_v39  ;;  %v3993_v46 = vsel %vm371_vm0, %v3937_v3, %v3985_v22 }
 0x363   :  { %4008 = vst [vmem:[#allocation1 + $0x21] ss:$2 sm:$0xff] %v3993_v46 }
 0x368   :  { %3816 = vrot.lane.b32.xlu1 %v8811_v26, %s7184_s24  ;;  %3904 = vrot.lane.b32.xlu2 %v3829_v58, %s7184_s24 }
 0x369   :  { %3854 = vrot.lane.b32.xlu0 %v3839_v39, %s7185_s26 }
 0x36a   :  { %v4016_v42 = vld.sshfl [vmem:[#allocation1 + $0x20] sm:$0xff pattern:$0x75316420]  ;;  %v4017_v24 = vld.sshfl [vmem:[#allocation1 + $0x28] sm:$0xff pattern:$0x75316420] }
 0x36b   :  { %v4045_v38 = vpack.c.bf16 %v4016_v42, %v4013_v15  ;;  %v4046_v8 = vpack.c.bf16 %v4017_v24, %v4014_v33  ;;  %v8921_v24 = vld [vmem:[#allocation4 + $0x1c] sm:$0xf] }
 0x36c   :  { %4761 = vst.msk [vmem:[#allocation4 + $0x1c] sm:$0xf] %vm3709_vm2, %v9766_v13 }
 0x36d   :  { %4176 = vmatmul.bf16.vlgmr.msrb.gmra.mxu3 %v4045_v38  ;;  %4195 = vmatmul.bf16.vlgmr.msra.gmra.mxu1 %v4046_v8  ;;  %v4047_v38 = vpack.c.bf16 %v8698_v48, %v8773_v0  ;;  %v4032_v8 = vld.sshfl [vmem:[#allocation1 + $0x30] sm:$0xff pattern:$0x75316420]  ;;  %v8945_v0 = vld [vmem:[#allocation4] sm:$0xf] }
 0x36e   :  { %4754 = vst.msk [vmem:[#allocation4] sm:$0xf] %vm3709_vm2, %v9766_v13 }
 0x370   :  { %3818 = vrot.lane.b32.xlu2 %v8849_v57, %s7184_s24  ;;  %4467 = vrot.lane.b32.xlu1 %v8921_v24, %s7183_s28 }
 0x371   :  { %3814 = vrot.lane.b32.xlu0 %v8763_v9, %s7184_s24 }
 0x38a   :  { %v3813_v60 = vpop.permute.xlu2 %3812 }
 0x38b   :  { %v3938_v17 = vsel %vm2869_vm15, %v8663_v44, %v3813_v60 }
 0x392   :  { %v3789_v4 = vpop.permute.xlu2 %3788 }
 0x3a4   :  { %v3849_v56 = vpop.permute.xlu0 %3848 }
 0x3a5   :  { %v3946_v2 = vsel %vm1864_vm3, %v3743_v20, %v3849_v56  ;;  %v6830_v20 = vld [vmem:[%s9741_s3 + $0x118] sm:$0xff]  ;;  %v4029_v56 = vld.sshfl [vmem:[#allocation1 + $0x10] sm:$0xff pattern:$0x75316420] }
 0x3a6   :  { %4212 = vmatpush.bf16.msra.mxu3 %v6830_v20  ;;  %v4050_v60 = vpack.c.bf16 %v4032_v8, %v4029_v56 }
 0x3aa   :  { %v3877_v36 = vpop.permute.xlu2 %3876  ;;  %4213 = vmatpush.bf16.msra.mxu3 %v6829_v43 }
 0x3ac   :  { %v3757_v49 = vpop.permute.xlu0 %3756 }
 0x3b2   :  { %v3875_v32 = vpop.permute.xlu1 %3874  ;;  %v3853_v6 = vpop.permute.xlu2 %3852 }
 0x3b3   :  { %v3954_v45 = vsel %vm2852_vm14, %v3946_v2, %v3875_v32  ;;  %v3948_v44 = vsel %vm1864_vm3, %v8830_v23, %v3853_v6  ;;  %v8937_v32 = vld [vmem:[#allocation4 + $0xc] sm:$0xf]  ;;  %v4409_v2 = vrot.slane %v8945_v0, 2 }
 0x3b4   :  { %v3901_v59 = vpop.permute.xlu0 %3900  ;;  %v4473_v48 = vrot.slane %v8937_v32, 1  ;;  %4757 = vst.msk [vmem:[#allocation4 + $0xc] sm:$0xf] %vm3709_vm2, %v9766_v13  ;;  %4463 = vrot.lane.b32.xlu2 %v8937_v32, %s7183_s28 }
 0x3b5   :  { %v3962_v19 = vsel %vm2869_vm15, %v3954_v45, %v3901_v59 }
 0x3b6   :  { %v3986_v54 = vrot.slane %v3962_v19, 4  ;;  %v7164_v19 = vld [vmem:[%s9742_s4 + $0x1] ss:$0 sm:$0xff] }
 0x3b8   :  { %v3994_v41 = vsel %vm371_vm0, %v3938_v17, %v3986_v54  ;;  %v4474_v17 = vrot.slane %v8921_v24, 1 }
 0x3b9   :  { %4019 = vst [vmem:[#allocation1] ss:$2 sm:$0xff] %v3994_v41  ;;  %v4393_v41 = vrot.slane %v8945_v0, 1 }
 0x3ba   :  { %v3851_v47 = vpop.permute.xlu1 %3850  ;;  %v3761_v51 = vpop.permute.xlu2 %3760  ;;  %4481 = vrot.lane.b32.xlu0 %v4474_v17, %s7184_s24 }
 0x3bb   :  { %v3947_v61 = vsel %vm1864_vm3, %v8776_v12, %v3851_v47  ;;  %v3925_v23 = vsel %vm1864_vm3, %v8811_v26, %v3761_v51  ;;  %v3923_v26 = vsel %vm1864_vm3, %v8720_v55, %v3757_v49  ;;  %v8931_v49 = vld [vmem:[#allocation4 + $0x10] sm:$0xf] }
 0x3bc   :  { %v3791_v7 = vpop.permute.xlu0 %3790  ;;  %v3955_v11 = vsel %vm2852_vm14, %v3947_v61, %v3877_v36  ;;  %4758 = vst.msk [vmem:[#allocation4 + $0x10] sm:$0xf] %vm3709_vm2, %v9766_v13  ;;  %4397 = vrot.lane.b32.xlu2 %v4393_v41, %s7185_s26 }
 0x3c2   :  { %v3759_v25 = vpop.permute.xlu1 %3758  ;;  %v3905_v34 = vpop.permute.xlu2 %3904 }
 0x3c3   :  { %v3924_v63 = vsel %vm1864_vm3, %v8763_v9, %v3759_v25 }
 0x3c4   :  { %v3932_v5 = vsel %vm2852_vm14, %v3924_v63, %v3791_v7 }
 0x3ca   :  { %v3903_v53 = vpop.permute.xlu1 %3902  ;;  %v3819_v14 = vpop.permute.xlu2 %3818 }
 0x3cb   :  { %v3963_v21 = vsel %vm2869_vm15, %v3955_v11, %v3903_v53  ;;  %v4411_v53 = vrot.slane %v8931_v49, 2 }
 0x3cc   :  { %v3987_v35 = vrot.slane %v3963_v21, 4 }
 0x3cd   :  { %4417 = vrot.lane.b32.xlu0 %v4411_v53, %s7183_s28 }
 0x3d2   :  { %v3793_v29 = vpop.permute.xlu1 %3792 }
 0x3d3   :  { %v3879_v30 = vpop.permute.xlu0 %3878  ;;  %v3933_v9 = vsel %vm2852_vm14, %v3925_v23, %v3793_v29 }
 0x3d4   :  { %v3956_v52 = vsel %vm2852_vm14, %v3948_v44, %v3879_v30  ;;  %v3941_v27 = vsel %vm2869_vm15, %v3933_v9, %v3819_v14 }
 0x3d5   :  { %v3964_v31 = vsel %vm2869_vm15, %v3956_v52, %v3905_v34 }
 0x3d6   :  { %v3988_v28 = vrot.slane %v3964_v31, 4 }
 0x3da   :  { %v3817_v50 = vpop.permute.xlu1 %3816 }
 0x3db   :  { %v3940_v40 = vsel %vm2869_vm15, %v3932_v5, %v3817_v50  ;;  %v3855_v18 = vpop.permute.xlu0 %3854 }
 0x3dc   :  { %v3996_v62 = vsel %vm371_vm0, %v3940_v40, %v3988_v28  ;;  %v3949_v57 = vsel %vm1864_vm3, %v3829_v58, %v3855_v18 }
 0x3dd   :  { %4023 = vst [vmem:[#allocation1 + $0x20] ss:$2 sm:$0xff] %v3996_v62  ;;  %v3957_v1 = vsel %vm2852_vm14, %v3949_v57, %v8656_v10  ;;  %v3931_v10 = vsel %vm2852_vm14, %v3923_v26, %v3789_v4  ;;  %v4395_v4 = vrot.slane %v8931_v49, 1 }
 0x3de   :  { %v3965_v39 = vsel %vm2869_vm15, %v3957_v1, %v8666_v37 }
 0x3df   :  { %v3989_v12 = vrot.slane %v3965_v39, 4  ;;  %4401 = vrot.lane.b32.xlu1 %v4395_v4, %s7185_s26 }
 0x3e1   :  { %v3997_v16 = vsel %vm371_vm0, %v3941_v27, %v3989_v12 }
 0x3e2   :  { %4024 = vst [vmem:[#allocation1 + $0x21] ss:$2 sm:$0xff] %v3997_v16 }
 0x3e3   :  { %v3815_v22 = vpop.permute.xlu0 %3814 }
 0x3e4   :  { %v3939_v37 = vsel %vm2869_vm15, %v3931_v10, %v3815_v22 }
 0x3e5   :  { %v3995_v3 = vsel %vm371_vm0, %v3939_v37, %v3987_v35 }
 0x3e6   :  { %4020 = vst [vmem:[#allocation1 + $0x1] ss:$2 sm:$0xff] %v3995_v3 }
 0x3e7   :  { %4477 = vrot.lane.b32.xlu1 %v4473_v48, %s7184_s24 }
 0x3e9   :  { %v4030_v58 = vld.sshfl [vmem:[#allocation1 + $0x20] sm:$0xff pattern:$0x75316420]  ;;  %v4031_v46 = vld.sshfl [vmem:[#allocation1 + $0x28] sm:$0xff pattern:$0x75316420] }
 0x3ea   :  { %v4196_v47 = vpop.f32.mrf.mxu1 }
 0x3ed   :  { %v4027_v15 = vld.sshfl [vmem:[#allocation1] sm:$0xff pattern:$0x75316420]  ;;  %v4028_v55 = vld.sshfl [vmem:[#allocation1 + $0x8] sm:$0xff pattern:$0x75316420] }
 0x3ee   :  { %v4048_v33 = vpack.c.bf16 %v4030_v58, %v4027_v15  ;;  %v4049_v42 = vpack.c.bf16 %v4031_v46, %v4028_v55 }
 0x3ef   :  { %4413 = vrot.lane.b32.xlu1 %v4409_v2, %s7183_s28 }
 0x3f0   :  { %4181 = vmatmul.bf16.gmra.mxu3 %v4048_v33  ;;  %4200 = vmatmul.bf16.gmra.mxu1 %v4049_v42  ;;  %v4177_v45 = vpop.f32.mrf.mxu3 }
 0x3f1   :  { %v4178_v6 = vadd.f32 %v7164_v19, %v4177_v45 }
 0x3f2   :  { %v4198_v29 = vpop.f32.mrf.mxu1 }
 0x3f3   :  { %v4197_v25 = vadd.f32 %v4196_v47, %v4178_v6 }
 0x3f8   :  { %v4179_v59 = vpop.f32.mrf.mxu3 }
 0x3f9   :  { %v4180_v7 = vadd.f32 %v7164_v19, %v4179_v59 }
 0x3fb   :  { %v4199_v31 = vadd.f32 %v4198_v29, %v4180_v7 }
 0x400   :  { %6294 = vmatmul.msk.bf16.vlgmr.msra.gmra.mxu3 %vm1864_vm3, %v4047_v38 }
 0x410   :  { %6295 = vmatmul.msk.bf16.gmra.mxu3 %vm1864_vm3, %v4050_v60 }
 0x46d   :  { %v4201_v57 = vpop.f32.mrf.mxu1 }
 0x473   :  { %v4182_v36 = vpop.f32.mrf.mxu3 }
 0x474   :  { %v4183_v18 = vadd.f32 %v7164_v19, %v4182_v36 }
 0x475   :  { %v4203_v38 = vpop.f32.mrf.mxu1 }
 0x476   :  { %v4202_v21 = vadd.f32 %v4201_v57, %v4183_v18 }
 0x47b   :  { %v4184_v54 = vpop.f32.mrf.mxu3 }
 0x47c   :  { %v4185_v37 = vadd.f32 %v7164_v19, %v4184_v54 }
 0x47e   :  { %v4204_v4 = vadd.f32 %v4203_v38, %v4185_v37  ;;  %v6845_v37 = vld [vmem:[%s9741_s3 + $0x190] sm:$0xff] }
 0x483   :  { %v4215_v20 = vpop.f32.mrf.mxu3 }
 0x484   :  { %v4216_v51 = vadd.f32 %v4215_v20, %v4197_v25 }
 0x486   :  { %v4225_v43 = vmax.f32 %v4216_v51, 0.0 }
 0x488   :  { %v4233_v44 = vrot.slane %v4225_v43, 2  ;;  %v4234_v30 = vrot.slane %v4225_v43, 4  ;;  %v4235_v52 = vrot.slane %v4225_v43, 6 }
 0x48a   :  { %v4257_v34 = vmax.f32 %v4225_v43, %v4234_v30  ;;  %v4258_v63 = vmax.f32 %v4233_v44, %v4235_v52 }
 0x48b   :  { %v4217_v28 = vpop.f32.mrf.mxu3 }
 0x48c   :  { %v6296_v50 = vrot.slane %v4257_v34, 9  ;;  %v6297_v5 = vrot.slane %v4258_v63, 9  ;;  %v4218_v40 = vadd.f32 %v4217_v28, %v4199_v31 }
 0x48e   :  { %v4297_v61 = vmax.f32 %v4257_v34, %v6296_v50  ;;  %v4298_v23 = vmax.f32 %v4258_v63, %v6297_v5  ;;  %v4226_v62 = vmax.f32 %v4218_v40, 0.0 }
 0x490   :  { %v4360_v9 = vperm.slane %v4297_v61, 0  ;;  %v4361_v1 = vperm.slane %v4298_v23, 0  ;;  %v4236_v39 = vrot.slane %v4226_v62, 2  ;;  %v4237_v11 = vrot.slane %v4226_v62, 4 }
 0x491   :  { %v4238_v14 = vrot.slane %v4226_v62, 6 }
 0x492   :  { %v4368_v12 = vsel %vm2162_vm5, %v4361_v1, %v4360_v9  ;;  %v4259_v26 = vmax.f32 %v4226_v62, %v4237_v11  ;;  %v9028_v11 = vpop.permute.xlu1 %4467 }
 0x493   :  { %4377 = vst.msk [vmem:[#allocation4 + $0x5] sm:$0x3] %vm1866_vm4, %v4368_v12  ;;  %v4260_v27 = vmax.f32 %v4236_v39, %v4238_v14  ;;  %v4220_v16 = vpop.f32.mrf.mxu3  ;;  %v9026_v39 = vpop.permute.xlu2 %4463 }
 0x494   :  { %v6298_v35 = vrot.slane %v4259_v26, 9  ;;  %v4221_v10 = vadd.f32 %v4220_v16, %v4202_v21 }
 0x495   :  { %v6299_v22 = vrot.slane %v4260_v27, 9 }
 0x496   :  { %v4299_v3 = vmax.f32 %v4259_v26, %v6298_v35  ;;  %v4227_v58 = vmax.f32 %v4221_v10, 0.0  ;;  %v9032_v26 = vpop.permute.xlu0 %4481  ;;  %v6838_v35 = vld [vmem:[%s9741_s3 + $0x158] sm:$0xff] }
 0x497   :  { %v4300_v46 = vmax.f32 %v4260_v27, %v6299_v22  ;;  %4668 = vmatpush.bf16.msrb.mxu3 %v6838_v35  ;;  %v6846_v10 = vld [vmem:[%s9741_s3 + $0x198] sm:$0xff]  ;;  %v6837_v22 = vld [vmem:[%s9741_s3 + $0x150] sm:$0xff] }
 0x498   :  { %v4362_v15 = vperm.slane %v4299_v3, 0  ;;  %v4239_v55 = vrot.slane %v4227_v58, 2  ;;  %v4240_v33 = vrot.slane %v4227_v58, 4  ;;  %v4241_v42 = vrot.slane %v4227_v58, 6  ;;  %4681 = vmatpush.bf16.msrb.mxu1 %v6846_v10  ;;  %v6836_v3 = vld [vmem:[%s9741_s3 + $0x148] sm:$0xff] }
 0x499   :  { %v4363_v8 = vperm.slane %v4300_v46, 0 }
 0x49a   :  { %v4261_v56 = vmax.f32 %v4227_v58, %v4240_v33  ;;  %v4262_v60 = vmax.f32 %v4239_v55, %v4241_v42  ;;  %v8962_v48 = vld [vmem:[#allocation4 + $0x4] sm:$0xf]  ;;  %v9030_v12 = vpop.permute.xlu1 %4401 }
 0x49b   :  { %v4369_v2 = vsel %vm2162_vm5, %v4363_v8, %v4362_v15  ;;  %v4222_v45 = vpop.f32.mrf.mxu3  ;;  %4427 = vrot.lane.b32.xlu2 %v8962_v48, %s7184_s24  ;;  %4755 = vst.msk [vmem:[#allocation4 + $0x4] sm:$0xf] %vm3709_vm2, %v9766_v13  ;;  %v4410_v59 = vrot.slane %v8962_v48, 2  ;;  %v4394_v30 = vrot.slane %v8962_v48, 1  ;;  %v4398_v14 = vpop.permute.xlu2 %4397  ;;  %4669 = vmatpush.bf16.msrb.mxu3 %v6837_v22  ;;  %v6844_v55 = vld [vmem:[%s9741_s3 + $0x188] sm:$0xff]  ;;  %v6835_v8 = vld [vmem:[%s9741_s3 + $0x140] sm:$0xff] }
 0x49c   :  { %4378 = vst.msk [vmem:[#allocation4 + $0x9] sm:$0x3] %vm1866_vm4, %v4369_v2  ;;  %v6300_v36 = vrot.slane %v4261_v56, 9  ;;  %v6301_v19 = vrot.slane %v4262_v60, 9  ;;  %v4223_v54 = vadd.f32 %v4222_v45, %v4204_v4  ;;  %4682 = vmatpush.bf16.msrb.mxu1 %v6845_v37  ;;  %v6842_v4 = vld [vmem:[%s9741_s3 + $0x178] sm:$0xff]  ;;  %v4489_v2 = vsel %vm1864_vm3, %v8945_v0, %v4398_v14  ;;  %v6833_v45 = vld [vmem:[%s9741_s3 + $0x130] sm:$0xff] }
 0x49d   :  { %4447 = vrot.lane.b32.xlu0 %v4410_v59, %s7185_s26 }
 0x49e   :  { %v4301_v17 = vmax.f32 %v4261_v56, %v6300_v36  ;;  %v4302_v41 = vmax.f32 %v4262_v60, %v6301_v19  ;;  %v4228_v47 = vmax.f32 %v4223_v54, 0.0  ;;  %v9036_v16 = vpop.permute.xlu0 %4417  ;;  %v6843_v56 = vld [vmem:[%s9741_s3 + $0x180] sm:$0xff]  ;;  %v6834_v60 = vld [vmem:[%s9741_s3 + $0x138] sm:$0xff] }
 0x49f   :  { %4670 = vmatpush.bf16.msrb.mxu3 %v6836_v3 }
 0x4a0   :  { %v4364_v6 = vperm.slane %v4301_v17, 0  ;;  %v4365_v25 = vperm.slane %v4302_v41, 0  ;;  %v4242_v20 = vrot.slane %v4228_v47, 2  ;;  %v4243_v53 = vrot.slane %v4228_v47, 4  ;;  %4683 = vmatpush.bf16.msrb.mxu1 %v6844_v55 }
 0x4a1   :  { %v4244_v51 = vrot.slane %v4228_v47, 6 }
 0x4a2   :  { %v4370_v7 = vsel %vm2162_vm5, %v4365_v25, %v4364_v6  ;;  %v4263_v43 = vmax.f32 %v4228_v47, %v4243_v53  ;;  %v9034_v27 = vpop.permute.xlu1 %4477  ;;  %v6832_v25 = vld [vmem:[%s9741_s3 + $0x128] sm:$0xff] }
 0x4a3   :  { %4379 = vst.msk [vmem:[#allocation4 + $0x15] sm:$0x3] %vm1866_vm4, %v4370_v7  ;;  %v4264_v29 = vmax.f32 %v4242_v20, %v4244_v51  ;;  %v8974_v44 = vld [vmem:[#allocation4 + $0x8] sm:$0xf]  ;;  %4415 = vrot.lane.b32.xlu2 %v4410_v59, %s7183_s28  ;;  %4671 = vmatpush.bf16.msrb.mxu3 %v6835_v8  ;;  %v6840_v20 = vld [vmem:[%s9741_s3 + $0x168] sm:$0xff] }
 0x4a4   :  { %v6302_v52 = vrot.slane %v4263_v43, 9  ;;  %4461 = vrot.lane.b32.xlu1 %v8974_v44, %s7183_s28  ;;  %4756 = vst.msk [vmem:[#allocation4 + $0x8] sm:$0xf] %vm3709_vm2, %v9766_v13  ;;  %v4445_v5 = vrot.slane %v8974_v44, 2  ;;  %v4439_v61 = vrot.slane %v8974_v44, 1  ;;  %4684 = vmatpush.bf16.msrb.mxu1 %v6843_v56  ;;  %v6841_v59 = vld [vmem:[%s9741_s3 + $0x170] sm:$0xff] }
 0x4a5   :  { %v6303_v34 = vrot.slane %v4264_v29, 9  ;;  %4399 = vrot.lane.b32.xlu0 %v4394_v30, %s7185_s26 }
 0x4a6   :  { %v4303_v63 = vmax.f32 %v4263_v43, %v6302_v52  ;;  %v4522_v53 = vrot.slane %v4445_v5, 4 }
 0x4a7   :  { %v4304_v31 = vmax.f32 %v4264_v29, %v6303_v34  ;;  %4672 = vmatpush.bf16.msrb.mxu3 %v6834_v60  ;;  %v6831_v29 = vld [vmem:[%s9741_s3 + $0x120] sm:$0xff]  ;;  %v6848_v34 = vld [vmem:[%s9741_s3 + $0x1a8] sm:$0xff] }
 0x4a8   :  { %v4366_v28 = vperm.slane %v4303_v63, 0  ;;  %4685 = vmatpush.bf16.msrb.mxu1 %v6842_v4 }
 0x4a9   :  { %v4367_v50 = vperm.slane %v4304_v31, 0 }
 0x4aa   :  { %v8986_v40 = vld [vmem:[#allocation4 + $0x14] sm:$0xf]  ;;  %v4414_v46 = vpop.permute.xlu1 %4413 }
 0x4ab   :  { %v4371_v18 = vsel %vm2162_vm5, %v4367_v50, %v4366_v28  ;;  %v4412_v23 = vrot.slane %v8986_v40, 2  ;;  %4759 = vst.msk [vmem:[#allocation4 + $0x14] sm:$0xf] %vm3709_vm2, %v9766_v13  ;;  %v4396_v57 = vrot.slane %v8986_v40, 1  ;;  %v4493_v54 = vsel %vm2852_vm14, %v4489_v2, %v4414_v46  ;;  %4673 = vmatpush.bf16.msrb.mxu3 %v6833_v45 }
 0x4ac   :  { %4380 = vst.msk [vmem:[#allocation4 + $0x19] sm:$0x3] %vm1866_vm4, %v4371_v18  ;;  %4449 = vrot.lane.b32.xlu1 %v4445_v5, %s7185_s26  ;;  %vm4529_vm5 = vcmask 1041408   ;;  %4686 = vmatpush.bf16.msrb.mxu1 %v6841_v59  ;;  %v6847_v5 = vld [vmem:[%s9741_s3 + $0x1a0] sm:$0xff]  ;;  %v4491_v18 = vsel %vm1864_vm3, %v8931_v49, %v9030_v12  ;;  %v6342_v46 = vrot.slane %v8921_v24, 6 }
 0x4ad   :  { %4475 = vrot.lane.b32.xlu0 %v4439_v61, %s7184_s24  ;;  %4451 = vrot.lane.b32.xlu2 %v4412_v23, %s7185_s26 }
 0x4af   :  { %4674 = vmatpush.bf16.msrb.mxu3 %v6832_v25 }
 0x4b0   :  { %4687 = vmatpush.bf16.msrb.mxu1 %v6840_v20 }
 0x4b3   :  { %v9001_v62 = vld [vmem:[#allocation4 + $0x18] sm:$0xf]  ;;  %4675 = vmatpush.bf16.msrb.mxu3 %v6831_v29 }
 0x4b4   :  { %4419 = vrot.lane.b32.xlu1 %v4412_v23, %s7183_s28  ;;  %4760 = vst.msk [vmem:[#allocation4 + $0x18] sm:$0xf] %vm3709_vm2, %v9766_v13  ;;  %v4446_v9 = vrot.slane %v9001_v62, 2  ;;  %v4440_v1 = vrot.slane %v9001_v62, 1 }
 0x4b5   :  { %4465 = vrot.lane.b32.xlu0 %v9001_v62, %s7183_s28  ;;  %4403 = vrot.lane.b32.xlu2 %v4396_v57, %s7185_s26 }
 0x4b6   :  { %v4526_v10 = vrot.slane %v4446_v9, 4 }
 0x4b7   :  { %4700 = vmatpush.bf16.msra.mxu3 %v6848_v34 }
 0x4bb   :  { %4701 = vmatpush.bf16.msra.mxu3 %v6847_v5 }
 0x4bc   :  { %4431 = vrot.lane.b32.xlu1 %v8986_v40, %s7184_s24 }
 0x4bd   :  { %4453 = vrot.lane.b32.xlu0 %v4446_v9, %s7185_s26  ;;  %4479 = vrot.lane.b32.xlu2 %v4440_v1, %s7184_s24 }
 0x4c5   :  { %4429 = vrot.lane.b32.xlu0 %v8974_v44, %s7184_s24  ;;  %4433 = vrot.lane.b32.xlu2 %v9001_v62, %s7184_s24 }
 0x4f5   :  { %v4428_v21 = vpop.permute.xlu2 %4427 }
 0x4f6   :  { %v4497_v51 = vsel %vm2869_vm15, %v4493_v54, %v4428_v21 }
 0x4fd   :  { %v9053_v58 = vpop.permute.xlu2 %4415 }
 0x507   :  { %v4452_v33 = vpop.permute.xlu2 %4451 }
 0x508   :  { %v4503_v63 = vsel %vm1864_vm3, %v4396_v57, %v4452_v33  ;;  %v4495_v57 = vsel %vm2852_vm14, %v4491_v18, %v9036_v16 }
 0x50f   :  { %v4448_v15 = vpop.permute.xlu0 %4447  ;;  %v4404_v17 = vpop.permute.xlu2 %4403 }
 0x510   :  { %v4501_v36 = vsel %vm1864_vm3, %v4394_v30, %v4448_v15  ;;  %v6839_v30 = vld [vmem:[%s9741_s3 + $0x160] sm:$0xff]  ;;  %v4492_v49 = vsel %vm1864_vm3, %v8986_v40, %v4404_v17  ;;  %v9175_v17 = vld [vmem:[#allocation4] sm:$0xf] }
 0x511   :  { %4688 = vmatpush.bf16.msrb.mxu1 %v6839_v30  ;;  %5138 = vst.msk [vmem:[#allocation4] sm:$0xf] %vm3709_vm2, %v9766_v13 }
 0x516   :  { %v4462_v42 = vpop.permute.xlu1 %4461 }
 0x517   :  { %v9058_v38 = vpop.permute.xlu0 %4399  ;;  %v4505_v0 = vsel %vm2852_vm14, %v4501_v36, %v4462_v42  ;;  %v4480_v50 = vpop.permute.xlu2 %4479  ;;  %v6341_v42 = vrot.slane %v8937_v32, 6 }
 0x51e   :  { %v4450_v19 = vpop.permute.xlu1 %4449 }
 0x51f   :  { %v4476_v41 = vpop.permute.xlu0 %4475  ;;  %v4502_v14 = vsel %vm1864_vm3, %v4439_v61, %v4450_v19  ;;  %v4434_v15 = vpop.permute.xlu2 %4433  ;;  %v9167_v19 = vld [vmem:[#allocation4 + $0xc] sm:$0xf] }
 0x520   :  { %v4509_v47 = vsel %vm2869_vm15, %v4505_v0, %v4476_v41  ;;  %v4506_v61 = vsel %vm2852_vm14, %v4502_v14, %v9026_v39  ;;  %v4858_v54 = vrot.slane %v9167_v19, 1  ;;  %5141 = vst.msk [vmem:[#allocation4 + $0xc] sm:$0xf] %vm3709_vm2, %v9766_v13  ;;  %4848 = vrot.lane.b32.xlu2 %v9167_v19, %s7183_s28  ;;  %v4794_v0 = vrot.slane %v9175_v17, 2 }
 0x521   :  { %v4521_v6 = vrot.slane %v4509_v47, 6  ;;  %v4510_v39 = vsel %vm2869_vm15, %v4506_v61, %v9034_v27  ;;  %v4778_v47 = vrot.slane %v9175_v17, 1 }
 0x523   :  { %v4530_v7 = vsel %vm4529_vm5, %v4497_v51, %v4521_v6  ;;  %v7165_v51 = vld [vmem:[%s9742_s4 + $0x2] ss:$0 sm:$0xff] }
 0x524   :  { %v4531_v43 = vsel %vm371_vm0, %v4530_v7, %v4522_v53 }
 0x525   :  { %4538 = vst [vmem:[#allocation1] ss:$4 sm:$0xff] %v4531_v43 }
 0x526   :  { %v4420_v52 = vpop.permute.xlu1 %4419 }
 0x527   :  { %v4466_v31 = vpop.permute.xlu0 %4465  ;;  %v4496_v16 = vsel %vm2852_vm14, %v4492_v49, %v4420_v52 }
 0x528   :  { %v4507_v28 = vsel %vm2852_vm14, %v4503_v63, %v4466_v31  ;;  %v4500_v55 = vsel %vm2869_vm15, %v4496_v16, %v4434_v15  ;;  %4782 = vrot.lane.b32.xlu2 %v4778_v47, %s7185_s26  ;;  %v6851_v15 = vld [vmem:[%s9741_s3 + $0x1c0] sm:$0xff] }
 0x529   :  { %v4511_v23 = vsel %vm2869_vm15, %v4507_v28, %v4480_v50 }
 0x52a   :  { %v4525_v21 = vrot.slane %v4511_v23, 6 }
 0x52e   :  { %v4432_v35 = vpop.permute.xlu1 %4431 }
 0x52f   :  { %v4499_v22 = vsel %vm2869_vm15, %v4495_v57, %v4432_v35  ;;  %v4454_v37 = vpop.permute.xlu0 %4453  ;;  %v6856_v35 = vld [vmem:[%s9741_s3 + $0x1e8] sm:$0xff] }
 0x530   :  { %v4534_v12 = vsel %vm4529_vm5, %v4499_v22, %v4525_v21  ;;  %v4504_v44 = vsel %vm1864_vm3, %v4440_v1, %v4454_v37  ;;  %v4490_v1 = vsel %vm1864_vm3, %v8962_v48, %v9058_v38  ;;  %v4523_v48 = vrot.slane %v4510_v39, 6  ;;  %v9157_v38 = vld [vmem:[#allocation4 + $0x10] sm:$0xf]  ;;  %5052 = vmatpush.bf16.msra.mxu2 %v6856_v35 }
 0x531   :  { %v4535_v3 = vsel %vm371_vm0, %v4534_v12, %v4526_v10  ;;  %v4508_v9 = vsel %vm2852_vm14, %v4504_v44, %v9028_v11  ;;  %v9147_v11 = vld [vmem:[#allocation4 + $0x1c] sm:$0xf]  ;;  %5142 = vst.msk [vmem:[#allocation4 + $0x10] sm:$0xf] %vm3709_vm2, %v9766_v13  ;;  %v4780_v60 = vrot.slane %v9157_v38, 1  ;;  %v4796_v6 = vrot.slane %v9157_v38, 2 }
 0x532   :  { %4542 = vst [vmem:[#allocation1 + $0x2] ss:$4 sm:$0xff] %v4535_v3  ;;  %v4512_v40 = vsel %vm2869_vm15, %v4508_v9, %v9032_v26  ;;  %4852 = vrot.lane.b32.xlu1 %v9147_v11, %s7183_s28  ;;  %v4494_v26 = vsel %vm2852_vm14, %v4490_v1, %v9053_v58  ;;  %v4859_v41 = vrot.slane %v9147_v11, 1  ;;  %v6854_v22 = vld [vmem:[%s9741_s3 + $0x1d8] sm:$0xff]  ;;  %v6853_v44 = vld [vmem:[%s9741_s3 + $0x1d0] sm:$0xff]  ;;  %v6852_v3 = vld [vmem:[%s9741_s3 + $0x1c8] sm:$0xff] }
 0x533   :  { %v4527_v62 = vrot.slane %v4512_v40, 6  ;;  %5145 = vst.msk [vmem:[#allocation4 + $0x1c] sm:$0xf] %vm3709_vm2, %v9766_v13 }
 0x534   :  { %4866 = vrot.lane.b32.xlu0 %v4859_v41, %s7184_s24  ;;  %v6865_v41 = vld [vmem:[%s9741_s3 + $0x230] sm:$0xff] }
 0x535   :  { %v4536_v33 = vsel %vm4529_vm5, %v4500_v55, %v4527_v62 }
 0x536   :  { %v4537_v24 = vsel %vm371_vm0, %v4536_v33, %v6342_v46  ;;  %v6850_v33 = vld [vmem:[%s9741_s3 + $0x1b8] sm:$0xff] }
 0x537   :  { %4544 = vst [vmem:[#allocation1 + $0x3] ss:$4 sm:$0xff] %v4537_v24  ;;  %v4430_v27 = vpop.permute.xlu0 %4429  ;;  %v6864_v24 = vld [vmem:[%s9741_s3 + $0x228] sm:$0xff] }
 0x538   :  { %v4498_v8 = vsel %vm2869_vm15, %v4494_v26, %v4430_v27 }
 0x539   :  { %v4532_v32 = vsel %vm4529_vm5, %v4498_v8, %v4523_v48 }
 0x53a   :  { %v4533_v56 = vsel %vm371_vm0, %v4532_v32, %v6341_v42  ;;  %4786 = vrot.lane.b32.xlu1 %v4780_v60, %s7185_s26  ;;  %v6862_v60 = vld [vmem:[%s9741_s3 + $0x218] sm:$0xff] }
 0x53b   :  { %4540 = vst [vmem:[#allocation1 + $0x1] ss:$4 sm:$0xff] %v4533_v56  ;;  %v6863_v56 = vld [vmem:[%s9741_s3 + $0x220] sm:$0xff] }
 0x53c   :  { %4802 = vrot.lane.b32.xlu0 %v4796_v6, %s7183_s28 }
 0x542   :  { %v4545_v4 = vld.sshfl [vmem:[#allocation1] sm:$0xff pattern:$0x73625140]  ;;  %v4546_v2 = vld.sshfl [vmem:[#allocation1 + $0x8] sm:$0xff pattern:$0x73625140]  ;;  %4862 = vrot.lane.b32.xlu1 %v4858_v54, %s7184_s24 }
 0x543   :  { %v4551_v58 = vpack.c.bf16 %v4545_v4, %v4545_v4  ;;  %v4552_v45 = vpack.c.bf16 %v4546_v2, %v4546_v2  ;;  %v4547_v59 = vld.sshfl [vmem:[#allocation1 + $0x10] sm:$0xff pattern:$0x73625140]  ;;  %v6866_v54 = vld [vmem:[%s9741_s3 + $0x238] sm:$0xff] }
 0x544   :  { %v4553_v36 = vpack.c.bf16 %v4547_v59, %v4547_v59  ;;  %v6861_v4 = vld [vmem:[%s9741_s3 + $0x210] sm:$0xff]  ;;  %5084 = vmatpush.bf16.msra.mxu1 %v6866_v54 }
 0x545   :  { %4676 = vmatmul.bf16.vlgmr.msrb.gmra.mxu3 %v4551_v58  ;;  %4689 = vmatmul.bf16.vlgmr.msrb.gmra.mxu1 %v4552_v45  ;;  %v6849_v2 = vld [vmem:[%s9741_s3 + $0x1b0] sm:$0xff] }
 0x546   :  { %5065 = vmatpush.bf16.msrb.mxu3 %v6864_v24 }
 0x548   :  { %5085 = vmatpush.bf16.msra.mxu1 %v6865_v41 }
 0x54a   :  { %4798 = vrot.lane.b32.xlu1 %v4794_v0, %s7183_s28  ;;  %5066 = vmatpush.bf16.msrb.mxu3 %v6863_v56  ;;  %v6859_v0 = vld [vmem:[%s9741_s3 + $0x200] sm:$0xff] }
 0x54e   :  { %5067 = vmatpush.bf16.msrb.mxu3 %v6862_v60 }
 0x552   :  { %5068 = vmatpush.bf16.msrb.mxu3 %v6861_v4 }
 0x555   :  { %6415 = vmatmul.msk.bf16.vlgmr.msra.gmra.mxu3 %vm1864_vm3, %v4553_v36  ;;  %v6860_v36 = vld [vmem:[%s9741_s3 + $0x208] sm:$0xff] }
 0x556   :  { %5069 = vmatpush.bf16.msrb.mxu3 %v6860_v36 }
 0x55a   :  { %5070 = vmatpush.bf16.msrb.mxu3 %v6859_v0 }
 0x57a   :  { %v9265_v9 = vpop.permute.xlu2 %4848 }
 0x582   :  { %v9267_v40 = vpop.permute.xlu2 %4782 }
 0x5a4   :  { %v4853_v46 = vpop.permute.xlu1 %4852 }
 0x5a6   :  { %v4867_v39 = vpop.permute.xlu0 %4866 }
 0x5ac   :  { %v4787_v62 = vpop.permute.xlu1 %4786 }
 0x5ae   :  { %v4803_v48 = vpop.permute.xlu0 %4802 }
 0x5b4   :  { %v9274_v55 = vpop.permute.xlu1 %4862 }
 0x5bc   :  { %v9284_v26 = vpop.permute.xlu1 %4798 }
 0x5c2   :  { %v4690_v25 = vpop.f32.mrf.mxu1 }
 0x5c8   :  { %v4677_v20 = vpop.f32.mrf.mxu3 }
 0x5c9   :  { %v4678_v43 = vadd.f32 %v7165_v51, %v4677_v20  ;;  %v6858_v51 = vld [vmem:[%s9741_s3 + $0x1f8] sm:$0xff] }
 0x5ca   :  { %v4692_v53 = vpop.f32.mrf.mxu1  ;;  %5071 = vmatpush.bf16.msrb.mxu3 %v6858_v51 }
 0x5cb   :  { %v4691_v29 = vadd.f32 %v4690_v25, %v4678_v43 }
 0x5d0   :  { %v4679_v7 = vpop.f32.mrf.mxu3 }
 0x5d1   :  { %v4876_v7 = vsel %vm1864_vm3, %v9157_v38, %v4787_v62 }
 0x5d8   :  { %v4703_v30 = vpop.f32.mrf.mxu3 }
 0x5d9   :  { %v4704_v52 = vadd.f32 %v4703_v30, %v4691_v29  ;;  %v6857_v29 = vld [vmem:[%s9741_s3 + $0x1f0] sm:$0xff]  ;;  %v9321_v30 = vld [vmem:[#allocation4 + $0x1c] sm:$0xf] }
 0x5da   :  { %5072 = vmatpush.bf16.msrb.mxu3 %v6857_v29  ;;  %v5243_v41 = vrot.slane %v9321_v30, 1 }
 0x5db   :  { %v4707_v34 = vmax.f32 %v4704_v52, 0.0  ;;  %v9323_v52 = vld [vmem:[#allocation4 + $0xc] sm:$0xf] }
 0x5dd   :  { %v4709_v63 = vrot.slane %v4707_v34, 2  ;;  %v4710_v31 = vrot.slane %v4707_v34, 4  ;;  %v4711_v28 = vrot.slane %v4707_v34, 6  ;;  %4762 = vst.msk [vmem:[#allocation4 + $0x5] sm:$0x3] %vm1866_vm4, %v4707_v34  ;;  %v4880_v34 = vsel %vm2852_vm14, %v4876_v7, %v4803_v48 }
 0x5df   :  { %4763 = vst.msk [vmem:[#allocation4 + $0x9] sm:$0x3] %vm1866_vm4, %v4709_v63 }
 0x5e0   :  { %4764 = vst.msk [vmem:[#allocation4 + $0x15] sm:$0x3] %vm1866_vm4, %v4710_v31  ;;  %v4705_v50 = vpop.f32.mrf.mxu3 }
 0x5e1   :  { %4765 = vst.msk [vmem:[#allocation4 + $0x19] sm:$0x3] %vm1866_vm4, %v4711_v28 }
 0x5e4   :  { %v9194_v5 = vld [vmem:[#allocation4 + $0x4] sm:$0xf] }
 0x5e5   :  { %4812 = vrot.lane.b32.xlu2 %v9194_v5, %s7184_s24  ;;  %5139 = vst.msk [vmem:[#allocation4 + $0x4] sm:$0xf] %vm3709_vm2, %v9766_v13  ;;  %v4795_v18 = vrot.slane %v9194_v5, 2  ;;  %v4779_v37 = vrot.slane %v9194_v5, 1 }
 0x5e6   :  { %v9201_v23 = vld [vmem:[#allocation4 + $0x8] sm:$0xf] }
 0x5e7   :  { %4832 = vrot.lane.b32.xlu0 %v4795_v18, %s7185_s26  ;;  %4846 = vrot.lane.b32.xlu1 %v9201_v23, %s7183_s28  ;;  %5140 = vst.msk [vmem:[#allocation4 + $0x8] sm:$0xf] %vm3709_vm2, %v9766_v13  ;;  %v9208_v57 = vld [vmem:[#allocation4 + $0x14] sm:$0xf]  ;;  %v4830_v21 = vrot.slane %v9201_v23, 2  ;;  %v4824_v16 = vrot.slane %v9201_v23, 1 }
 0x5e8   :  { %v9210_v14 = vld [vmem:[#allocation4 + $0x18] sm:$0xf]  ;;  %5143 = vst.msk [vmem:[#allocation4 + $0x14] sm:$0xf] %vm3709_vm2, %v9766_v13  ;;  %v4797_v10 = vrot.slane %v9208_v57, 2  ;;  %v4781_v49 = vrot.slane %v9208_v57, 1 }
 0x5e9   :  { %5144 = vst.msk [vmem:[#allocation4 + $0x18] sm:$0xf] %vm3709_vm2, %v9766_v13  ;;  %v6855_v13 = vld [vmem:[%s9741_s3 + $0x1e0] sm:$0xff]  ;;  %v4831_v12 = vrot.slane %v9210_v14, 2  ;;  %v4825_v61 = vrot.slane %v9210_v14, 1 }
 0x5ea   :  { %5053 = vmatpush.bf16.msra.mxu2 %v6855_v13  ;;  %v9338_v13 = vld [vmem:[#allocation4 + $0x10] sm:$0xf] }
 0x5eb   :  { %v4911_v38 = vrot.slane %v4831_v12, 4 }
 0x5ed   :  { %4800 = vrot.lane.b32.xlu2 %v4795_v18, %s7183_s28 }
 0x5ee   :  { %5054 = vmatpush.bf16.msra.mxu2 %v6854_v22 }
 0x5ef   :  { %4850 = vrot.lane.b32.xlu0 %v9210_v14, %s7183_s28  ;;  %4834 = vrot.lane.b32.xlu1 %v4830_v21, %s7185_s26 }
 0x5f2   :  { %5055 = vmatpush.bf16.msra.mxu2 %v6853_v44 }
 0x5f5   :  { %4836 = vrot.lane.b32.xlu2 %v4797_v10, %s7185_s26 }
 0x5f6   :  { %5056 = vmatpush.bf16.msra.mxu2 %v6852_v3 }
 0x5f7   :  { %4784 = vrot.lane.b32.xlu0 %v4779_v37, %s7185_s26  ;;  %4804 = vrot.lane.b32.xlu1 %v4797_v10, %s7183_s28 }
 0x5fa   :  { %5057 = vmatpush.bf16.msra.mxu2 %v6851_v15  ;;  %v4874_v15 = vsel %vm1864_vm3, %v9175_v17, %v9267_v40 }
 0x5fb   :  { %v4878_v24 = vsel %vm2852_vm14, %v4874_v15, %v9284_v26 }
 0x5fd   :  { %4788 = vrot.lane.b32.xlu2 %v4781_v49, %s7185_s26 }
 0x5fe   :  { %5058 = vmatpush.bf16.msra.mxu2 %v6850_v33 }
 0x5ff   :  { %4838 = vrot.lane.b32.xlu0 %v4831_v12, %s7185_s26  ;;  %4816 = vrot.lane.b32.xlu1 %v9208_v57, %s7184_s24  ;;  %v6454_v12 = vrot.slane %v9147_v11, 6 }
 0x602   :  { %5059 = vmatpush.bf16.msra.mxu2 %v6849_v2 }
 0x605   :  { %4864 = vrot.lane.b32.xlu2 %v4825_v61, %s7184_s24 }
 0x607   :  { %4860 = vrot.lane.b32.xlu0 %v4824_v16, %s7184_s24  ;;  %5236 = vrot.lane.b32.xlu1 %v9321_v30, %s7183_s28 }
 0x60d   :  { %4818 = vrot.lane.b32.xlu2 %v9210_v14, %s7184_s24 }
 0x60f   :  { %4814 = vrot.lane.b32.xlu0 %v9201_v23, %s7184_s24 }
 0x615   :  { %5232 = vrot.lane.b32.xlu2 %v9323_v52, %s7183_s28 }
 0x617   :  { %5250 = vrot.lane.b32.xlu0 %v5243_v41, %s7184_s24 }
 0x63f   :  { %v9272_v1 = vpop.permute.xlu2 %4812 }
 0x647   :  { %v9282_v42 = vpop.permute.xlu2 %4800 }
 0x64f   :  { %v4837_v27 = vpop.permute.xlu2 %4836 }
 0x650   :  { %v4888_v25 = vsel %vm1864_vm3, %v4781_v49, %v4837_v27 }
 0x657   :  { %v4789_v58 = vpop.permute.xlu2 %4788 }
 0x658   :  { %v4877_v50 = vsel %vm1864_vm3, %v9208_v57, %v4789_v58  ;;  %v9382_v58 = vld [vmem:[#allocation4] sm:$0xf] }
 0x659   :  { %v4833_v8 = vpop.permute.xlu0 %4832  ;;  %v4847_v32 = vpop.permute.xlu1 %4846 }
 0x65f   :  { %v4865_v20 = vpop.permute.xlu2 %4864 }
 0x661   :  { %v4851_v45 = vpop.permute.xlu0 %4850  ;;  %v4835_v59 = vpop.permute.xlu1 %4834 }
 0x662   :  { %v4892_v53 = vsel %vm2852_vm14, %v4888_v25, %v4851_v45  ;;  %v5178_v45 = vrot.slane %v9382_v58, 2 }
 0x663   :  { %v4896_v43 = vsel %vm2869_vm15, %v4892_v53, %v4865_v20  ;;  %v7166_v20 = vld [vmem:[%s9742_s4 + $0x3] ss:$0 sm:$0xff] }
 0x664   :  { %v4910_v63 = vrot.slane %v4896_v43, 6 }
 0x667   :  { %v4819_v14 = vpop.permute.xlu2 %4818 }
 0x669   :  { %v4785_v47 = vpop.permute.xlu0 %4784  ;;  %v4805_v6 = vpop.permute.xlu1 %4804 }
 0x66a   :  { %v4881_v10 = vsel %vm2852_vm14, %v4877_v50, %v4805_v6  ;;  %v4875_v60 = vsel %vm1864_vm3, %v9194_v5, %v4785_v47  ;;  %v5162_v47 = vrot.slane %v9382_v58, 1  ;;  %v5180_v6 = vrot.slane %v9338_v13, 2 }
 0x66b   :  { %v4885_v62 = vsel %vm2869_vm15, %v4881_v10, %v4819_v14 }
 0x66c   :  { %5166 = vrot.lane.b32.xlu2 %v5162_v47, %s7185_s26  ;;  %5186 = vrot.lane.b32.xlu0 %v5180_v6, %s7183_s28 }
 0x671   :  { %v4839_v31 = vpop.permute.xlu0 %4838  ;;  %v4817_v28 = vpop.permute.xlu1 %4816 }
 0x672   :  { %v4889_v18 = vsel %vm1864_vm3, %v4825_v61, %v4839_v31  ;;  %v4884_v35 = vsel %vm2869_vm15, %v4880_v34, %v4817_v28  ;;  %v5164_v61 = vrot.slane %v9338_v13, 1 }
 0x673   :  { %v4893_v22 = vsel %vm2852_vm14, %v4889_v18, %v4853_v46  ;;  %v4918_v49 = vsel %vm4529_vm5, %v4884_v35, %v4910_v63  ;;  %v4886_v46 = vsel %vm1864_vm3, %v4779_v37, %v4833_v8  ;;  %v4882_v8 = vsel %vm2869_vm15, %v4878_v24, %v9272_v1 }
 0x674   :  { %v4897_v44 = vsel %vm2869_vm15, %v4893_v22, %v4867_v39  ;;  %v4919_v57 = vsel %vm371_vm0, %v4918_v49, %v4911_v38  ;;  %v4887_v39 = vsel %vm1864_vm3, %v4824_v16, %v4835_v59  ;;  %v4890_v48 = vsel %vm2852_vm14, %v4886_v46, %v4847_v32  ;;  %5170 = vrot.lane.b32.xlu1 %v5164_v61, %s7185_s26 }
 0x675   :  { %v4912_v3 = vrot.slane %v4897_v44, 6  ;;  %4926 = vst [vmem:[#allocation1 + $0x2] ss:$4 sm:$0xff] %v4919_v57  ;;  %v4891_v40 = vsel %vm2852_vm14, %v4887_v39, %v9265_v9  ;;  %v4907_v16 = vrot.slane %v4830_v21, 4  ;;  %v5242_v32 = vrot.slane %v9323_v52, 1 }
 0x676   :  { %v4895_v56 = vsel %vm2869_vm15, %v4891_v40, %v9274_v55  ;;  %v6453_v9 = vrot.slane %v9167_v19, 6  ;;  %v4879_v21 = vsel %vm2852_vm14, %v4875_v60, %v9282_v42  ;;  %v6882_v40 = vld [vmem:[%s9741_s3 + $0x2b8] sm:$0xff]  ;;  %v6873_v60 = vld [vmem:[%s9741_s3 + $0x270] sm:$0xff] }
 0x677   :  { %v4920_v11 = vsel %vm4529_vm5, %v4885_v62, %v4912_v3  ;;  %v4908_v23 = vrot.slane %v4895_v56, 6  ;;  %v9450_v62 = vpop.permute.xlu2 %5232  ;;  %5449 = vmatpush.bf16.msrb.mxu1 %v6882_v40 }
 0x678   :  { %v4921_v33 = vsel %vm371_vm0, %v4920_v11, %v6454_v12 }
 0x679   :  { %4928 = vst [vmem:[#allocation1 + $0x3] ss:$4 sm:$0xff] %v4921_v33  ;;  %v4861_v17 = vpop.permute.xlu0 %4860  ;;  %v9452_v11 = vpop.permute.xlu1 %5236 }
 0x67a   :  { %v4894_v37 = vsel %vm2869_vm15, %v4890_v48, %v4861_v17 }
 0x67b   :  { %v4906_v27 = vrot.slane %v4894_v37, 6  ;;  %v6874_v37 = vld [vmem:[%s9741_s3 + $0x278] sm:$0xff] }
 0x67c   :  { %5246 = vrot.lane.b32.xlu1 %v5242_v32, %s7184_s24  ;;  %5436 = vmatpush.bf16.msrb.mxu2 %v6874_v37 }
 0x67d   :  { %v4914_v26 = vsel %vm4529_vm5, %v4882_v8, %v4906_v27 }
 0x67e   :  { %v4915_v4 = vsel %vm371_vm0, %v4914_v26, %v4907_v16 }
 0x67f   :  { %4922 = vst [vmem:[#allocation1] ss:$4 sm:$0xff] %v4915_v4  ;;  %v6881_v4 = vld [vmem:[%s9741_s3 + $0x2b0] sm:$0xff] }
 0x680   :  { %5437 = vmatpush.bf16.msrb.mxu2 %v6873_v60  ;;  %5450 = vmatpush.bf16.msrb.mxu1 %v6881_v4 }
 0x681   :  { %v4815_v1 = vpop.permute.xlu0 %4814 }
 0x682   :  { %v4883_v2 = vsel %vm2869_vm15, %v4879_v21, %v4815_v1  ;;  %v6871_v21 = vld [vmem:[%s9741_s3 + $0x260] sm:$0xff] }
 0x683   :  { %v4916_v55 = vsel %vm4529_vm5, %v4883_v2, %v4908_v23  ;;  %v6880_v23 = vld [vmem:[%s9741_s3 + $0x2a8] sm:$0xff]  ;;  %v6879_v1 = vld [vmem:[%s9741_s3 + $0x2a0] sm:$0xff] }
 0x684   :  { %v4917_v5 = vsel %vm371_vm0, %v4916_v55, %v6453_v9  ;;  %5182 = vrot.lane.b32.xlu1 %v5178_v45, %s7183_s28  ;;  %v6872_v9 = vld [vmem:[%s9741_s3 + $0x268] sm:$0xff]  ;;  %5451 = vmatpush.bf16.msrb.mxu1 %v6880_v23  ;;  %v6870_v45 = vld [vmem:[%s9741_s3 + $0x258] sm:$0xff] }
 0x685   :  { %4924 = vst [vmem:[#allocation1 + $0x1] ss:$4 sm:$0xff] %v4917_v5  ;;  %5438 = vmatpush.bf16.msrb.mxu2 %v6872_v9 }
 0x688   :  { %5452 = vmatpush.bf16.msrb.mxu1 %v6879_v1 }
 0x689   :  { %v9458_v48 = vpop.permute.xlu0 %5250  ;;  %5439 = vmatpush.bf16.msrb.mxu2 %v6871_v21 }
 0x68c   :  { %v4929_v19 = vld.sshfl [vmem:[#allocation1] sm:$0xff pattern:$0x73625140]  ;;  %v4930_v59 = vld.sshfl [vmem:[#allocation1 + $0x8] sm:$0xff pattern:$0x73625140] }
 0x68d   :  { %v4935_v36 = vpack.c.bf16 %v4929_v19, %v4929_v19  ;;  %v4936_v42 = vpack.c.bf16 %v4930_v59, %v4930_v59  ;;  %v4931_v54 = vld.sshfl [vmem:[#allocation1 + $0x10] sm:$0xff pattern:$0x73625140]  ;;  %v6878_v19 = vld [vmem:[%s9741_s3 + $0x298] sm:$0xff]  ;;  %v6884_v59 = vld [vmem:[%s9741_s3 + $0x2c8] sm:$0xff]  ;;  %5440 = vmatpush.bf16.msrb.mxu2 %v6870_v45 }
 0x68e   :  { %v4937_v0 = vpack.c.bf16 %v4931_v54, %v4931_v54  ;;  %5453 = vmatpush.bf16.msrb.mxu1 %v6878_v19  ;;  %5468 = vmatpush.bf16.msra.mxu3 %v6884_v59  ;;  %v6883_v54 = vld [vmem:[%s9741_s3 + $0x2c0] sm:$0xff]  ;;  %v6707_v59 = vld [vmem:[%s9745_s7 + $0x70] sm:$0xf] }
 0x68f   :  { %5060 = vmatmul.bf16.vlgmr.msra.gmra.mxu2 %v4935_v36  ;;  %5073 = vmatmul.bf16.vlgmr.msrb.gmra.mxu3 %v4936_v42  ;;  %v6869_v36 = vld [vmem:[%s9741_s3 + $0x250] sm:$0xff] }
 0x690   :  { %6527 = vmatmul.msk.bf16.vlgmr.msra.gmra.mxu1 %vm1864_vm3, %v4937_v0  ;;  %v6877_v42 = vld [vmem:[%s9741_s3 + $0x290] sm:$0xff] }
 0x691   :  { %5441 = vmatpush.bf16.msrb.mxu2 %v6869_v36  ;;  %v6902_v36 = vld [vmem:[%s9745_s7 + $0x74] sm:$0xf0] }
 0x692   :  { %5454 = vmatpush.bf16.msrb.mxu1 %v6877_v42  ;;  %5469 = vmatpush.bf16.msra.mxu3 %v6883_v54  ;;  %v6901_v42 = vld [vmem:[%s9745_s7 + $0x74] sm:$0xf]  ;;  %v6708_v54 = vor.u32 %v6902_v36, %v6707_v59  ;;  %v6908_v59 = vld [vmem:[%s9746_s9 + $0x28] sm:$0xff]  ;;  %v6907_v36 = vld [vmem:[%s9746_s9 + $0x20] sm:$0xff] }
 0x696   :  { %5617 = vmatpush.bf16.msrb.mxu3 %v6708_v54  ;;  %v7168_v54 = vld [vmem:[%s9743_s6] ss:$0 sm:$0xff] }
 0x6c6   :  { %v9454_v39 = vpop.permute.xlu2 %5166 }
 0x6c7   :  { %v5258_v37 = vsel %vm1864_vm3, %v9382_v58, %v9454_v39 }
 0x6de   :  { %v5187_v16 = vpop.permute.xlu0 %5186 }
 0x6e6   :  { %v5171_v33 = vpop.permute.xlu1 %5170 }
 0x6ee   :  { %v9460_v17 = vpop.permute.xlu1 %5246 }
 0x6f6   :  { %v9470_v8 = vpop.permute.xlu1 %5182 }
 0x70d   :  { %v5087_v25 = vpop.f32.mrf.mxu1 }
 0x712   :  { %v5061_v53 = vpop.f32.mrf.mxu2  ;;  %v5074_v51 = vpop.f32.mrf.mxu3 }
 0x713   :  { %v5062_v7 = vadd.f32 %v7166_v20, %v5061_v53  ;;  %v6868_v20 = vld [vmem:[%s9741_s3 + $0x248] sm:$0xff] }
 0x714   :  { %v6876_v53 = vld [vmem:[%s9741_s3 + $0x288] sm:$0xff]  ;;  %5442 = vmatpush.bf16.msrb.mxu2 %v6868_v20 }
 0x715   :  { %v5075_v43 = vadd.f32 %v5074_v51, %v5062_v7  ;;  %v5089_v29 = vpop.f32.mrf.mxu1  ;;  %v5260_v51 = vsel %vm1864_vm3, %v9338_v13, %v5171_v33  ;;  %5455 = vmatpush.bf16.msrb.mxu1 %v6876_v53  ;;  %v6701_v20 = vld [vmem:[%s9745_s7 + $0x68] sm:$0xf0] }
 0x716   :  { %v6875_v29 = vld [vmem:[%s9741_s3 + $0x280] sm:$0xff] }
 0x717   :  { %v5088_v34 = vadd.f32 %v5087_v25, %v5075_v43  ;;  %v6867_v43 = vld [vmem:[%s9741_s3 + $0x240] sm:$0xff] }
 0x718   :  { %5443 = vmatpush.bf16.msrb.mxu2 %v6867_v43  ;;  %v6898_v43 = vld [vmem:[%s9745_s7 + $0x54] sm:$0xf0] }
 0x719   :  { %v5091_v63 = vmax.f32 %v5088_v34, 0.0  ;;  %v5264_v34 = vsel %vm2852_vm14, %v5260_v51, %v5187_v16  ;;  %5456 = vmatpush.bf16.msrb.mxu1 %v6875_v29  ;;  %v6897_v29 = vld [vmem:[%s9745_s7 + $0x54] sm:$0xf] }
 0x71a   :  { %v5063_v31 = vpop.f32.mrf.mxu2  ;;  %v5076_v28 = vpop.f32.mrf.mxu3 }
 0x71b   :  { %v5093_v38 = vrot.slane %v5091_v63, 2  ;;  %v5094_v50 = vrot.slane %v5091_v63, 4  ;;  %v5095_v18 = vrot.slane %v5091_v63, 6  ;;  %5146 = vst.msk [vmem:[#allocation4 + $0x5] sm:$0x3] %vm1866_vm4, %v5091_v63 }
 0x71d   :  { %5147 = vst.msk [vmem:[#allocation4 + $0x9] sm:$0x3] %vm1866_vm4, %v5093_v38 }
 0x71e   :  { %5148 = vst.msk [vmem:[#allocation4 + $0x15] sm:$0x3] %vm1866_vm4, %v5094_v50 }
 0x71f   :  { %5149 = vst.msk [vmem:[#allocation4 + $0x19] sm:$0x3] %vm1866_vm4, %v5095_v18 }
 0x722   :  { %v9402_v35 = vld [vmem:[#allocation4 + $0x4] sm:$0xf] }
 0x723   :  { %5196 = vrot.lane.b32.xlu2 %v9402_v35, %s7184_s24  ;;  %v5179_v10 = vrot.slane %v9402_v35, 2  ;;  %v5163_v14 = vrot.slane %v9402_v35, 1 }
 0x724   :  { %v9407_v22 = vld [vmem:[#allocation4 + $0x8] sm:$0xf] }
 0x725   :  { %5216 = vrot.lane.b32.xlu0 %v5179_v10, %s7185_s26  ;;  %5230 = vrot.lane.b32.xlu1 %v9407_v22, %s7183_s28  ;;  %v5214_v49 = vrot.slane %v9407_v22, 2  ;;  %v9421_v44 = vld [vmem:[#allocation4 + $0x14] sm:$0xf]  ;;  %v5208_v46 = vrot.slane %v9407_v22, 1 }
 0x726   :  { %v9414_v12 = vld [vmem:[#allocation4 + $0x18] sm:$0xf]  ;;  %v5181_v57 = vrot.slane %v9421_v44, 2  ;;  %v5165_v3 = vrot.slane %v9421_v44, 1 }
 0x727   :  { %v5215_v61 = vrot.slane %v9414_v12, 2  ;;  %v5209_v15 = vrot.slane %v9414_v12, 1  ;;  %v5291_v4 = vrot.slane %v5214_v49, 4 }
 0x729   :  { %v5295_v13 = vrot.slane %v5215_v61, 4 }
 0x72b   :  { %5184 = vrot.lane.b32.xlu2 %v5179_v10, %s7183_s28 }
 0x72d   :  { %5234 = vrot.lane.b32.xlu0 %v9414_v12, %s7183_s28  ;;  %5218 = vrot.lane.b32.xlu1 %v5214_v49, %s7185_s26 }
 0x733   :  { %5220 = vrot.lane.b32.xlu2 %v5181_v57, %s7185_s26 }
 0x735   :  { %5168 = vrot.lane.b32.xlu0 %v5163_v14, %s7185_s26  ;;  %5188 = vrot.lane.b32.xlu1 %v5181_v57, %s7183_s28 }
 0x73b   :  { %5172 = vrot.lane.b32.xlu2 %v5165_v3, %s7185_s26 }
 0x73d   :  { %5222 = vrot.lane.b32.xlu0 %v5215_v61, %s7185_s26  ;;  %5200 = vrot.lane.b32.xlu1 %v9421_v44, %s7184_s24  ;;  %v6566_v61 = vrot.slane %v9321_v30, 6 }
 0x743   :  { %5248 = vrot.lane.b32.xlu2 %v5209_v15, %s7184_s24 }
 0x745   :  { %5244 = vrot.lane.b32.xlu0 %v5208_v46, %s7184_s24 }
 0x74b   :  { %5202 = vrot.lane.b32.xlu2 %v9414_v12, %s7184_s24 }
 0x74d   :  { %5198 = vrot.lane.b32.xlu0 %v9407_v22, %s7184_s24 }
 0x77d   :  { %v9456_v24 = vpop.permute.xlu2 %5196 }
 0x785   :  { %v9468_v27 = vpop.permute.xlu2 %5184 }
 0x78d   :  { %v5221_v26 = vpop.permute.xlu2 %5220 }
 0x78e   :  { %v5272_v47 = vsel %vm1864_vm3, %v5165_v3, %v5221_v26  ;;  %v5262_v26 = vsel %vm2852_vm14, %v5258_v37, %v9470_v8  ;;  %v6667_v37 = vld [vmem:[%s9745_s7 + $0x20] sm:$0xf] }
 0x795   :  { %v5173_v2 = vpop.permute.xlu2 %5172 }
 0x796   :  { %v5261_v38 = vsel %vm1864_vm3, %v9421_v44, %v5173_v2 }
 0x797   :  { %v9472_v32 = vpop.permute.xlu0 %5216  ;;  %v9474_v56 = vpop.permute.xlu1 %5230 }
 0x79d   :  { %v5249_v6 = vpop.permute.xlu2 %5248 }
 0x79f   :  { %v5235_v55 = vpop.permute.xlu0 %5234  ;;  %v5219_v5 = vpop.permute.xlu1 %5218 }
 0x7a0   :  { %v5276_v25 = vsel %vm2852_vm14, %v5272_v47, %v5235_v55  ;;  %v6900_v47 = vld [vmem:[%s9745_s7 + $0x64] sm:$0xf0] }
 0x7a1   :  { %v5280_v7 = vsel %vm2869_vm15, %v5276_v25, %v5249_v6  ;;  %v6899_v25 = vld [vmem:[%s9745_s7 + $0x64] sm:$0xf] }
 0x7a2   :  { %v5294_v63 = vrot.slane %v5280_v7, 6  ;;  %v6704_v51 = vor.u32 %v6899_v25, %v6701_v20  ;;  %v6691_v7 = vld [vmem:[%s9745_s7 + $0x50] sm:$0xf]  ;;  %v6912_v20 = vld [vmem:[%s9746_s9 + $0x48] sm:$0xff] }
 0x7a5   :  { %v5203_v33 = vpop.permute.xlu2 %5202 }
 0x7a7   :  { %v5169_v0 = vpop.permute.xlu0 %5168  ;;  %v5189_v41 = vpop.permute.xlu1 %5188 }
 0x7a8   :  { %v5265_v10 = vsel %vm2852_vm14, %v5261_v38, %v5189_v41  ;;  %v6699_v41 = vld [vmem:[%s9745_s7 + $0x60] sm:$0xf]  ;;  %v6895_v38 = vld [vmem:[%s9745_s7 + $0x44] sm:$0xf] }
 0x7a9   :  { %v5269_v40 = vsel %vm2869_vm15, %v5265_v10, %v5203_v33  ;;  %v6700_v53 = vor.u32 %v6900_v47, %v6699_v41 }
 0x7ab   :  { %5618 = vmatpush.bf16.msrb.mxu3 %v6700_v53  ;;  %v6905_v53 = vld [vmem:[%s9746_s9 + $0x10] sm:$0xff] }
 0x7af   :  { %v5223_v31 = vpop.permute.xlu0 %5222  ;;  %v5201_v28 = vpop.permute.xlu1 %5200 }
 0x7b0   :  { %v5273_v50 = vsel %vm1864_vm3, %v5209_v15, %v5223_v31  ;;  %v5268_v18 = vsel %vm2869_vm15, %v5264_v34, %v5201_v28  ;;  %v6693_v34 = vld [vmem:[%s9745_s7 + $0x58] sm:$0xf0]  ;;  %v6683_v28 = vld [vmem:[%s9745_s7 + $0x40] sm:$0xf] }
 0x7b1   :  { %v5277_v57 = vsel %vm2852_vm14, %v5273_v50, %v9452_v11  ;;  %v5302_v3 = vsel %vm4529_vm5, %v5268_v18, %v5294_v63  ;;  %v5270_v11 = vsel %vm1864_vm3, %v5163_v14, %v9472_v32  ;;  %v6692_v63 = vor.u32 %v6898_v43, %v6691_v7  ;;  %v6685_v50 = vld [vmem:[%s9745_s7 + $0x48] sm:$0xf0]  ;;  %v6903_v43 = vld [vmem:[%s9746_s9] sm:$0xff] }
 0x7b2   :  { %v5281_v44 = vsel %vm2869_vm15, %v5277_v57, %v9458_v48  ;;  %v5303_v12 = vsel %vm371_vm0, %v5302_v3, %v5295_v13  ;;  %v5271_v48 = vsel %vm1864_vm3, %v5208_v46, %v5219_v5  ;;  %v5274_v58 = vsel %vm2852_vm14, %v5270_v11, %v9474_v56  ;;  %v6896_v13 = vld [vmem:[%s9745_s7 + $0x44] sm:$0xf0]  ;;  %v6675_v57 = vld [vmem:[%s9745_s7 + $0x30] sm:$0xf]  ;;  %v6894_v3 = vld [vmem:[%s9745_s7 + $0x34] sm:$0xf0] }
 0x7b3   :  { %v5296_v15 = vrot.slane %v5281_v44, 6  ;;  %5310 = vst [vmem:[#allocation1 + $0x2] ss:$4 sm:$0xff] %v5303_v12  ;;  %v5275_v32 = vsel %vm2852_vm14, %v5271_v48, %v9450_v62  ;;  %v5266_v46 = vsel %vm2869_vm15, %v5262_v26, %v9456_v24  ;;  %v5259_v56 = vsel %vm1864_vm3, %v9402_v35, %v5169_v0  ;;  %v6709_v0 = vld [vmem:[%s9745_s7 + $0x78] sm:$0xf0]  ;;  %5619 = vmatpush.bf16.msrb.mxu3 %v6692_v63  ;;  %v6904_v7 = vld [vmem:[%s9746_s9 + $0x8] sm:$0xff] }
 0x7b4   :  { %v5279_v8 = vsel %vm2869_vm15, %v5275_v32, %v9460_v17  ;;  %v6565_v62 = vrot.slane %v9323_v52, 6  ;;  %v5263_v22 = vsel %vm2852_vm14, %v5259_v56, %v9468_v27  ;;  %v6886_v52 = vld [vmem:[%s9744_s5 + $0x8] sm:$0xff]  ;;  %v6885_v27 = vld [vmem:[%s9744_s5] sm:$0xff]  ;;  %v6712_v6 = vor.u32 %v6901_v42, %v6709_v0  ;;  %v6677_v44 = vld [vmem:[%s9745_s7 + $0x38] sm:$0xf0] }
 0x7b5   :  { %v5304_v30 = vsel %vm4529_vm5, %v5269_v40, %v5296_v15  ;;  %v5292_v21 = vrot.slane %v5279_v8, 6  ;;  %5506 = vmatpush.bf16.msra.mxu2 %v6886_v52  ;;  %v6696_v31 = vor.u32 %v6897_v29, %v6693_v34  ;;  %v6684_v18 = vor.u32 %v6896_v13, %v6683_v28  ;;  %v6892_v11 = vld [vmem:[%s9745_s7 + $0x24] sm:$0xf0]  ;;  %v6891_v40 = vld [vmem:[%s9745_s7 + $0x24] sm:$0xf]  ;;  %v6909_v52 = vld [vmem:[%s9746_s9 + $0x30] sm:$0xff] }
 0x7b6   :  { %v5305_v16 = vsel %vm371_vm0, %v5304_v30, %v6566_v61  ;;  %5630 = vmatpush.bf16.msra.mxu1 %v6712_v6  ;;  %v6688_v10 = vor.u32 %v6895_v38, %v6685_v50  ;;  %v6893_v61 = vld [vmem:[%s9745_s7 + $0x34] sm:$0xf]  ;;  %v6676_v33 = vor.u32 %v6894_v3, %v6675_v57  ;;  %v6669_v30 = vld [vmem:[%s9745_s7 + $0x28] sm:$0xf0]  ;;  %v7167_v48 = vld [vmem:[%s9742_s4 + $0x4] ss:$0 sm:$0xff] }
 0x7b7   :  { %5312 = vst [vmem:[#allocation1 + $0x3] ss:$4 sm:$0xff] %v5305_v16  ;;  %v5245_v39 = vpop.permute.xlu0 %5244  ;;  %5620 = vmatpush.bf16.msrb.mxu3 %v6684_v18  ;;  %v6680_v15 = vor.u32 %v6893_v61, %v6677_v44  ;;  %v6668_v16 = vor.u32 %v6892_v11, %v6667_v37  ;;  %v6672_v26 = vor.u32 %v6891_v40, %v6669_v30  ;;  %v6906_v42 = vld [vmem:[%s9746_s9 + $0x18] sm:$0xff]  ;;  %v5531_v29 = vld [vmem:[%s9747_s8] sm:$0x3] }
 0x7b8   :  { %v5278_v14 = vsel %vm2869_vm15, %v5274_v58, %v5245_v39  ;;  %v5534_v34 = vperm.slane %v5531_v29, 1  ;;  %v5533_v13 = vperm.slane %v5531_v29, 0 }
 0x7b9   :  { %v5290_v60 = vrot.slane %v5278_v14, 6  ;;  %5507 = vmatpush.bf16.msra.mxu2 %v6885_v27  ;;  %v6913_v27 = vld [vmem:[%s9746_s9 + $0x50] sm:$0xff] }
 0x7ba   :  { %5631 = vmatpush.bf16.msra.mxu1 %v6704_v51  ;;  %v6911_v51 = vld [vmem:[%s9746_s9 + $0x40] sm:$0xff] }
 0x7bb   :  { %v5298_v9 = vsel %vm4529_vm5, %v5266_v46, %v5290_v60  ;;  %5621 = vmatpush.bf16.msrb.mxu3 %v6676_v33 }
 0x7bc   :  { %v5299_v23 = vsel %vm371_vm0, %v5298_v9, %v5291_v4 }
 0x7bd   :  { %5306 = vst [vmem:[#allocation1] ss:$4 sm:$0xff] %v5299_v23  ;;  %v6659_v23 = vld [vmem:[%s9745_s7 + $0x10] sm:$0xf] }
 0x7be   :  { %5632 = vmatpush.bf16.msra.mxu1 %v6696_v31 }
 0x7bf   :  { %v5199_v49 = vpop.permute.xlu0 %5198  ;;  %5622 = vmatpush.bf16.msrb.mxu3 %v6668_v16 }
 0x7c0   :  { %v5267_v24 = vsel %vm2869_vm15, %v5263_v22, %v5199_v49  ;;  %v6661_v49 = vld [vmem:[%s9745_s7 + $0x18] sm:$0xf0] }
 0x7c1   :  { %v5300_v1 = vsel %vm4529_vm5, %v5267_v24, %v5292_v21  ;;  %v6889_v21 = vld [vmem:[%s9745_s7 + $0x14] sm:$0xf]  ;;  %v6651_v24 = vld [vmem:[%s9745_s7] sm:$0xf] }
 0x7c2   :  { %v5301_v2 = vsel %vm371_vm0, %v5300_v1, %v6565_v62  ;;  %5633 = vmatpush.bf16.msra.mxu1 %v6688_v10  ;;  %v6890_v62 = vld [vmem:[%s9745_s7 + $0x14] sm:$0xf0]  ;;  %v6888_v1 = vld [vmem:[%s9745_s7 + $0x4] sm:$0xf0] }
 0x7c3   :  { %5308 = vst [vmem:[#allocation1 + $0x1] ss:$4 sm:$0xff] %v5301_v2  ;;  %v6660_v22 = vor.u32 %v6890_v62, %v6659_v23  ;;  %v6664_v2 = vor.u32 %v6889_v21, %v6661_v49 }
 0x7c5   :  { %5623 = vmatpush.bf16.msrb.mxu3 %v6660_v22 }
 0x7c6   :  { %5634 = vmatpush.bf16.msra.mxu1 %v6680_v15 }
 0x7ca   :  { %v5313_v17 = vld.sshfl [vmem:[#allocation1] sm:$0xff pattern:$0x73625140]  ;;  %v5314_v55 = vld.sshfl [vmem:[#allocation1 + $0x8] sm:$0xff pattern:$0x73625140]  ;;  %5635 = vmatpush.bf16.msra.mxu1 %v6672_v26 }
 0x7cb   :  { %v5319_v35 = vpack.c.bf16 %v5313_v17, %v5313_v17  ;;  %v5320_v5 = vpack.c.bf16 %v5314_v55, %v5314_v55  ;;  %v5315_v45 = vld.sshfl [vmem:[#allocation1 + $0x10] sm:$0xff pattern:$0x73625140]  ;;  %v6887_v17 = vld [vmem:[%s9745_s7 + $0x4] sm:$0xf] }
 0x7cc   :  { %v5321_v19 = vpack.c.bf16 %v5315_v45, %v5315_v45  ;;  %v6653_v55 = vld [vmem:[%s9745_s7 + $0x8] sm:$0xf0] }
 0x7cd   :  { %5444 = vmatmul.bf16.vlgmr.msrb.gmra.mxu2 %v5319_v35  ;;  %5457 = vmatmul.bf16.vlgmr.msrb.gmra.mxu1 %v5320_v5  ;;  %v6652_v35 = vor.u32 %v6888_v1, %v6651_v24  ;;  %v6910_v5 = vld [vmem:[%s9746_s9 + $0x38] sm:$0xff]  ;;  %v6656_v45 = vor.u32 %v6887_v17, %v6653_v55 }
 0x7ce   :  { %6639 = vmatmul.msk.bf16.vlgmr.msra.gmra.mxu3 %vm1864_vm3, %v5321_v19  ;;  %5636 = vmatpush.bf16.msra.mxu1 %v6664_v2  ;;  %v6914_v19 = vld [vmem:[%s9746_s9 + $0x58] sm:$0xff] }
 0x7cf   :  { %5750 = vmatpush.bf16.msrb.mxu2 %v6910_v5  ;;  %5624 = vmatpush.bf16.msrb.mxu3 %v6652_v35 }
 0x7d2   :  { %5637 = vmatpush.bf16.msra.mxu1 %v6656_v45 }
 0x7d3   :  { %5767 = vmatpush.bf16.msra.mxu3 %v6914_v19  ;;  %5751 = vmatpush.bf16.msrb.mxu2 %v6909_v52 }
 0x7d7   :  { %5768 = vmatpush.bf16.msra.mxu3 %v6913_v27  ;;  %5752 = vmatpush.bf16.msrb.mxu2 %v6908_v59 }
 0x7db   :  { %5753 = vmatpush.bf16.msrb.mxu2 %v6907_v36  ;;  %5769 = vmatpush.bf16.msra.mxu3 %v6912_v20 }
 0x7df   :  { %5754 = vmatpush.bf16.msrb.mxu2 %v6906_v42  ;;  %5770 = vmatpush.bf16.msra.mxu3 %v6911_v51 }
 0x7e3   :  { %5755 = vmatpush.bf16.msrb.mxu2 %v6905_v53 }
 0x7e7   :  { %5756 = vmatpush.bf16.msrb.mxu2 %v6904_v7 }
 0x7eb   :  { %5757 = vmatpush.bf16.msrb.mxu2 %v6903_v43 }
 0x84a   :  { %v5458_v12 = vpop.f32.mrf.mxu1 }
 0x850   :  { %v5445_v58 = vpop.f32.mrf.mxu2 }
 0x851   :  { %v5446_v39 = vadd.f32 %v7167_v48, %v5445_v58  ;;  %v5471_v14 = vpop.f32.mrf.mxu3 }
 0x852   :  { %v5460_v32 = vpop.f32.mrf.mxu1 }
 0x853   :  { %v5459_v60 = vadd.f32 %v5458_v12, %v5446_v39  ;;  %v7169_v12 = vld [vmem:[%s9748_s10] ss:$0 sm:$0xff] }
 0x855   :  { %v5472_v4 = vadd.f32 %v5471_v14, %v5459_v60 }
 0x857   :  { %v5475_v46 = vmax.f32 %v5472_v4, 0.0 }
 0x858   :  { %v5447_v9 = vpop.f32.mrf.mxu2 }
 0x859   :  { %v5476_v8 = vpack.c.bf16 %v5475_v46, %v5475_v46  ;;  %v5473_v56 = vpop.f32.mrf.mxu3 }
 0x85b   :  { %6648 = vmatmul.msk.bf16.vlgmr.msra.gmra.mxu2 %vm1864_vm3, %v5476_v8 }
 0x8de   :  { %v5509_v0 = vpop.f32.mrf.mxu2 }
 0x8df   :  { %v5510_v41 = vadd.f32 %v7168_v54, %v5509_v0 }
 0x8e1   :  { %v5513_v47 = vmax.f32 %v5510_v41, 0.0 }
 0x8e3   :  { %v5514_v6 = vpack.c.bf16 %v5513_v47, %v5513_v47 }
 0x8e5   :  { %5625 = vmatmul.bf16.vlgmr.msrb.gmra.mxu3 %v5514_v6  ;;  %5638 = vmatmul.bf16.vlgmr.msra.gmra.mxu1 %v5514_v6 }
 0x8e6   :  { %v5511_v25 = vpop.f32.mrf.mxu2 }
 0x962   :  { %v5639_v63 = vpop.f32.mrf.mxu1 }
 0x963   :  { %v5640_v31 = vadd.f32 %v5639_v63, %v5534_v34 }
 0x965   :  { %v5644_v28 = vmax.f32 %v5640_v31, 0.0 }
 0x967   :  { %v5646_v38 = vpack.c.bf16 %v5644_v28, %v5644_v28 }
 0x968   :  { %v5626_v50 = vpop.f32.mrf.mxu3 }
 0x969   :  { %v5627_v18 = vadd.f32 %v5626_v50, %v5533_v13  ;;  %6761 = vmatmul.msk.bf16.vlgmr.msra.gmra.mxu3 %vm2852_vm14, %v5646_v38 }
 0x96a   :  { %v5641_v10 = vpop.f32.mrf.mxu1 }
 0x96b   :  { %v5643_v57 = vmax.f32 %v5627_v18, 0.0 }
 0x96d   :  { %v5645_v3 = vpack.c.bf16 %v5643_v57, %v5643_v57 }
 0x96f   :  { %5758 = vmatmul.bf16.vlgmr.msrb.gmra.mxu2 %v5645_v3 }
 0x970   :  { %v5628_v61 = vpop.f32.mrf.mxu3 }
 0x9ec   :  { %v5772_v44 = vpop.f32.mrf.mxu3 }
 0x9f2   :  { %v5759_v33 = vpop.f32.mrf.mxu2 }
 0x9f3   :  { %v5760_v15 = vadd.f32 %v7169_v12, %v5759_v33 }
 0x9f4   :  { %v5774_v37 = vpop.f32.mrf.mxu3 }
 0x9f5   :  { %v5773_v11 = vadd.f32 %v5772_v44, %v5760_v15 }
 0x9f7   :  { %5776 = vst [vmem:[%s9749_s11] sm:$0xff] %v5773_v11 }
 0x9fa   :  { %v5761_v40 = vpop.f32.mrf.mxu2 }

</bundles_post_ra>
